<compile_context>
chip_gen: v5e
topology: v5e:2x2
jax: 0.10.0
libtpu: 0.0.40
codegen_flags: <defaults>
</compile_context>

<pallas_src>
import jax
import jax.numpy as jnp
from jax.experimental import pallas as pl
from jax.experimental.pallas import tpu as pltpu


# ----------------------------------------------------------------------------
# Fused kernel: RNN (unrolled in-kernel) + split-first-layer MLP head.
#   x_ref     (T*B, D)      f32   time-major sequence, flattened over (T, B)
#   lbl_ref   (B, NC)       bf16  labels.float() pre-cast to bf16
#   rnn_ref   (D+H+1, H)    f32   rows [0:D]=W_ih, [D:D+H]=W_hh, [D+H]=b_rnn
#   w1_ref    (H+NC, 1024)  bf16  first MLP layer, split in-kernel at row H
#   bias_ref  (3, 1024)     f32   rows: b1, b2, w3^T
#   w2_hbm    (1024, 1024)  bf16  raw HBM ref (memory_space=pl.ANY)
#   b3_ref    (1,)          f32   SMEM scalar
#   o_ref     (B, 1)        f32   sigmoid(logits)
#   w2_vmem   (1024, 1024)  bf16  VMEM scratch (manual DMA target)
#   w2_sem                        DMA semaphore
# ----------------------------------------------------------------------------
def fused_kernel(x_ref, lbl_ref, rnn_ref, w1_ref, bias_ref, w2_hbm, b3_ref,
                 o_ref, w2_vmem, w2_sem):
    # Kick off the big w2 transfer immediately; it overlaps the serial RNN.
    w2_copy = pltpu.make_async_copy(w2_hbm, w2_vmem, w2_sem)
    w2_copy.start()

    TB, D = x_ref.shape
    B, NC = lbl_ref.shape
    H = rnn_ref.shape[1]
    T = TB // B

    # ---- unpack consolidated small buffers (single prologue DMA each) ------
    rnn = rnn_ref[...]                                # (D+H+1, H) f32
    wih = rnn[:D, :]
    whh = rnn[D:D + H, :]                             # hoisted out of the loop
    brnn = rnn[D + H:D + H + 1, :]                    # (1, H)

    biases = bias_ref[...]                            # (3, 1024) f32
    b1 = biases[0:1, :]
    b2 = biases[1:2, :]
    w3t = biases[2:3, :]                              # w3 transposed to a lane row
    b3 = b3_ref[0]                                    # SMEM read before DMA wait

    # ---- RNN: hoist input projection out of the recurrence -----------------
    pre_ih = (jnp.dot(x_ref[...], wih,
                      preferred_element_type=jnp.float32)
              + brnn)                                 # (T*B, H)

    h = jnp.zeros((B, H), jnp.float32)
    for t in range(T):                                # static unroll (T known at trace time)
        pre = (jnp.dot(h, whh, preferred_element_type=jnp.float32)
               + pre_ih[t * B:(t + 1) * B, :])        # B=8 -> sublane-aligned slice
        h = jnp.tanh(pre)                             # f32 activation (v5e-safe)

    # ---- MLP head; concat fused algebraically into the first layer ---------
    w1 = w1_ref[...]                                  # (H+NC, 1024) bf16
    h1 = (jnp.dot(h.astype(jnp.bfloat16), w1[:H, :],
                  preferred_element_type=jnp.float32)
          + jnp.dot(lbl_ref[...], w1[H:H + NC, :],
                    preferred_element_type=jnp.float32)
          + b1)
    h1 = jnp.maximum(h1, 0.0)                         # ReLU (Dropout = identity in eval)

    w2_copy.wait()                                    # w2 DMA hidden behind RNN + layer 1
    h2 = (jnp.dot(h1.astype(jnp.bfloat16), w2_vmem[...],
                  preferred_element_type=jnp.float32)
          + b2)
    h2 = jnp.maximum(h2, 0.0)

    # Final projection: VPU multiply + XLU lane reduce (no 256 KiB padded w3).
    logits = jnp.sum(h2 * w3t, axis=-1, keepdims=True) + b3   # (B, 1)

    # Sigmoid via tanh (EUP), exact and bounded: sig(x) = 0.5*tanh(x/2) + 0.5
    o_ref[...] = 0.5 * jnp.tanh(0.5 * logits) + 0.5


# ----------------------------------------------------------------------------
# Wrapper: one grid-less pallas_call (total VMEM ~2.2 MiB incl. the w2 scratch).
# ----------------------------------------------------------------------------
def categorical_cluster_labels_forward(inputs, labels, packed):
    T, B, D = inputs.shape
    x2d = inputs.reshape(T * B, D).astype(jnp.float32)   # contiguous reshape (free)
    labels_bf = labels.astype(jnp.bfloat16)              # labels.float() -> bf16 feed

    vmem = pl.BlockSpec(memory_space=pltpu.MemorySpace.VMEM)
    smem = pl.BlockSpec(memory_space=pltpu.MemorySpace.SMEM)
    hbm = pl.BlockSpec(memory_space=pl.ANY)              # w2 stays in HBM; manual DMA

    w2 = packed["w2"]

    out = pl.pallas_call(
        fused_kernel,
        out_shape=jax.ShapeDtypeStruct((B, 1), jnp.float32),
        in_specs=[vmem, vmem,          # x, labels
                  vmem, vmem, vmem,    # rnn pack, w1, bias pack
                  hbm,                 # w2 (raw HBM ref)
                  smem],               # b3 scalar
        out_specs=vmem,
        scratch_shapes=[pltpu.VMEM(w2.shape, w2.dtype),   # w2 landing buffer
                        pltpu.SemaphoreType.DMA(())],
        cost_estimate=pl.CostEstimate(flops=20_000_000,
                                      transcendentals=2_112,
                                      bytes_accessed=2_400_000),
    )(x2d, labels_bf,
      packed["rnn"], packed["w1"], packed["biases"],
      w2, packed["b3"])

    return out                                           # (B, 1) in [0, 1]


# ----------------------------------------------------------------------------
# Parameter construction (shapes match the module's __init__) and one-time packing.
# ----------------------------------------------------------------------------
def init_params(key, input_dim, hidden, n_cluster_params):
    F = hidden + n_cluster_params  # recurrent_clf.output_size + n_cluster_params
    keys = jax.random.split(key, 8)
    s = 0.05
    return {
        "w_ih": s * jax.random.normal(keys[0], (input_dim, hidden), jnp.float32),
        "w_hh": s * jax.random.normal(keys[1], (hidden, hidden), jnp.float32),
        "b_rnn": s * jax.random.normal(keys[2], (1, hidden), jnp.float32),
        "w1": s * jax.random.normal(keys[3], (F, 1024), jnp.float32),
        "b1": s * jax.random.normal(keys[4], (1, 1024), jnp.float32),
        "w2": s * jax.random.normal(keys[5], (1024, 1024), jnp.float32),
        "b2": s * jax.random.normal(keys[6], (1, 1024), jnp.float32),
        "w3": s * jax.random.normal(keys[7], (1024, 1), jnp.float32),
        "b3": jnp.zeros((1,), jnp.float32),
    }


def pack_params(params, hidden):
    """One-time packing:
       * RNN weights + bias consolidated into one (D+H+1, H) f32 buffer.
       * b1 / b2 / w3^T consolidated into one (3, 1024) f32 buffer (no w3 padding).
       * Large MLP weights (w1, w2) cast to bf16 (HBM-bandwidth win; f32 accum in-kernel)."""
    rnn = jnp.concatenate(
        [params["w_ih"], params["w_hh"], params["b_rnn"]], axis=0
    ).astype(jnp.float32)                                      # (D+H+1, H)
    biases = jnp.concatenate(
        [params["b1"], params["b2"], params["w3"].T], axis=0
    ).astype(jnp.float32)                                      # (3, 1024)
    return {
        "rnn": rnn,
        "w1": params["w1"].astype(jnp.bfloat16),               # (H+NC, 1024)
        "biases": biases,
        "w2": params["w2"].astype(jnp.bfloat16),               # (1024, 1024)
        "b3": params["b3"].reshape((1,)).astype(jnp.float32),
    }


if __name__ == "__main__":
    # batch, seq len, input dim, rnn hidden, n_cluster_params
    B, T, D, H, NC = 8, 8, 32, 32, 16

    key = jax.random.PRNGKey(0)
    k_x, k_l, k_p = jax.random.split(key, 3)
    inputs = jax.random.normal(k_x, (T, B, D), jnp.float32)              # time-major sequence
    labels = (jax.random.uniform(k_l, (B, NC)) > 0.5).astype(jnp.int32)  # categorical cluster labels

    params = init_params(k_p, D, H, NC)
    packed = pack_params(params, H)

    out = categorical_cluster_labels_forward(inputs, labels, packed)
    out = jax.block_until_ready(out)

    assert out.shape == (B, 1)
    assert bool(jnp.all((out >= 0.0) & (out <= 1.0)))
    print("KERNEL_OK")
</pallas_src>

<mosaic_0001>
module attributes {stable_mosaic.version = 11 : i64} {
  func.func @fused_kernel(%arg0: memref<64x32xf32, #tpu.memory_space<vmem>>, %arg1: memref<8x16xbf16, #tpu.memory_space<vmem>>, %arg2: memref<65x32xf32, #tpu.memory_space<vmem>>, %arg3: memref<48x1024xbf16, #tpu.memory_space<vmem>>, %arg4: memref<3x1024xf32, #tpu.memory_space<vmem>>, %arg5: memref<1024x1024xbf16, #tpu.memory_space<any>>, %arg6: memref<1xf32, #tpu.memory_space<smem>>, %arg7: memref<8x1xf32, #tpu.memory_space<vmem>>, %arg8: memref<1024x1024xbf16, #tpu.memory_space<vmem>>, %arg9: memref<!tpu.dma_semaphore, #tpu.memory_space<semaphore_mem>>) attributes {dimension_semantics = [], scalar_prefetch = 0 : i64, scratch_operands = 2 : i64, tpu.core_type = #tpu.core_type<tc>} {
    tpu.enqueue_dma source(%arg5 : memref<1024x1024xbf16, #tpu.memory_space<any>>) target(%arg8 : memref<1024x1024xbf16, #tpu.memory_space<vmem>>) target_semaphore(%arg9 : memref<!tpu.dma_semaphore, #tpu.memory_space<semaphore_mem>>)
    %c0 = arith.constant 0 : index
    %c0_0 = arith.constant 0 : index
    %0 = vector.load %arg2[%c0, %c0_0] : memref<65x32xf32, #tpu.memory_space<vmem>>, vector<65x32xf32>
    %1 = vector.extract_strided_slice %0 {offsets = [0, 0], sizes = [32, 32], strides = [1, 1]} : vector<65x32xf32> to vector<32x32xf32>
    %2 = vector.extract_strided_slice %0 {offsets = [32, 0], sizes = [32, 32], strides = [1, 1]} : vector<65x32xf32> to vector<32x32xf32>
    %3 = vector.extract_strided_slice %0 {offsets = [64, 0], sizes = [1, 32], strides = [1, 1]} : vector<65x32xf32> to vector<1x32xf32>
    %c0_1 = arith.constant 0 : index
    %c0_2 = arith.constant 0 : index
    %4 = vector.load %arg4[%c0_1, %c0_2] : memref<3x1024xf32, #tpu.memory_space<vmem>>, vector<3x1024xf32>
    %5 = vector.extract_strided_slice %4 {offsets = [0, 0], sizes = [1, 1024], strides = [1, 1]} : vector<3x1024xf32> to vector<1x1024xf32>
    %6 = vector.extract_strided_slice %4 {offsets = [1, 0], sizes = [1, 1024], strides = [1, 1]} : vector<3x1024xf32> to vector<1x1024xf32>
    %7 = vector.extract_strided_slice %4 {offsets = [2, 0], sizes = [1, 1024], strides = [1, 1]} : vector<3x1024xf32> to vector<1x1024xf32>
    %c0_3 = arith.constant 0 : index
    %8 = memref.load %arg6[%c0_3] : memref<1xf32, #tpu.memory_space<smem>>
    %c0_4 = arith.constant 0 : index
    %c0_5 = arith.constant 0 : index
    %9 = vector.load %arg0[%c0_4, %c0_5] : memref<64x32xf32, #tpu.memory_space<vmem>>, vector<64x32xf32>
    %cst = arith.constant dense<0.000000e+00> : vector<64x32xf32>
    %10 = tpu.matmul %9, %1, %cst {dimension_numbers = #tpu.dot_dimension_numbers<[1], [0], [0], [1], [0, 0, 1, 1], [], []>} : vector<64x32xf32>, vector<32x32xf32>, vector<64x32xf32> -> vector<64x32xf32>
    %11 = vector.broadcast %3 : vector<1x32xf32> to vector<64x32xf32>
    %12 = arith.addf %10, %11 : vector<64x32xf32>
    %cst_6 = arith.constant 0.000000e+00 : f32
    %13 = vector.broadcast %cst_6 : f32 to vector<8x32xf32>
    %cst_7 = arith.constant dense<0.000000e+00> : vector<8x32xf32>
    %14 = tpu.matmul %13, %2, %cst_7 {dimension_numbers = #tpu.dot_dimension_numbers<[1], [0], [0], [1], [0, 0, 1, 1], [], []>} : vector<8x32xf32>, vector<32x32xf32>, vector<8x32xf32> -> vector<8x32xf32>
    %15 = vector.extract_strided_slice %12 {offsets = [0, 0], sizes = [8, 32], strides = [1, 1]} : vector<64x32xf32> to vector<8x32xf32>
    %16 = arith.addf %14, %15 : vector<8x32xf32>
    %17 = math.tanh %16 : vector<8x32xf32>
    %cst_8 = arith.constant dense<0.000000e+00> : vector<8x32xf32>
    %18 = tpu.matmul %17, %2, %cst_8 {dimension_numbers = #tpu.dot_dimension_numbers<[1], [0], [0], [1], [0, 0, 1, 1], [], []>} : vector<8x32xf32>, vector<32x32xf32>, vector<8x32xf32> -> vector<8x32xf32>
    %19 = vector.extract_strided_slice %12 {offsets = [8, 0], sizes = [8, 32], strides = [1, 1]} : vector<64x32xf32> to vector<8x32xf32>
    %20 = arith.addf %18, %19 : vector<8x32xf32>
    %21 = math.tanh %20 : vector<8x32xf32>
    %cst_9 = arith.constant dense<0.000000e+00> : vector<8x32xf32>
    %22 = tpu.matmul %21, %2, %cst_9 {dimension_numbers = #tpu.dot_dimension_numbers<[1], [0], [0], [1], [0, 0, 1, 1], [], []>} : vector<8x32xf32>, vector<32x32xf32>, vector<8x32xf32> -> vector<8x32xf32>
    %23 = vector.extract_strided_slice %12 {offsets = [16, 0], sizes = [8, 32], strides = [1, 1]} : vector<64x32xf32> to vector<8x32xf32>
    %24 = arith.addf %22, %23 : vector<8x32xf32>
    %25 = math.tanh %24 : vector<8x32xf32>
    %cst_10 = arith.constant dense<0.000000e+00> : vector<8x32xf32>
    %26 = tpu.matmul %25, %2, %cst_10 {dimension_numbers = #tpu.dot_dimension_numbers<[1], [0], [0], [1], [0, 0, 1, 1], [], []>} : vector<8x32xf32>, vector<32x32xf32>, vector<8x32xf32> -> vector<8x32xf32>
    %27 = vector.extract_strided_slice %12 {offsets = [24, 0], sizes = [8, 32], strides = [1, 1]} : vector<64x32xf32> to vector<8x32xf32>
    %28 = arith.addf %26, %27 : vector<8x32xf32>
    %29 = math.tanh %28 : vector<8x32xf32>
    %cst_11 = arith.constant dense<0.000000e+00> : vector<8x32xf32>
    %30 = tpu.matmul %29, %2, %cst_11 {dimension_numbers = #tpu.dot_dimension_numbers<[1], [0], [0], [1], [0, 0, 1, 1], [], []>} : vector<8x32xf32>, vector<32x32xf32>, vector<8x32xf32> -> vector<8x32xf32>
    %31 = vector.extract_strided_slice %12 {offsets = [32, 0], sizes = [8, 32], strides = [1, 1]} : vector<64x32xf32> to vector<8x32xf32>
    %32 = arith.addf %30, %31 : vector<8x32xf32>
    %33 = math.tanh %32 : vector<8x32xf32>
    %cst_12 = arith.constant dense<0.000000e+00> : vector<8x32xf32>
    %34 = tpu.matmul %33, %2, %cst_12 {dimension_numbers = #tpu.dot_dimension_numbers<[1], [0], [0], [1], [0, 0, 1, 1], [], []>} : vector<8x32xf32>, vector<32x32xf32>, vector<8x32xf32> -> vector<8x32xf32>
    %35 = vector.extract_strided_slice %12 {offsets = [40, 0], sizes = [8, 32], strides = [1, 1]} : vector<64x32xf32> to vector<8x32xf32>
    %36 = arith.addf %34, %35 : vector<8x32xf32>
    %37 = math.tanh %36 : vector<8x32xf32>
    %cst_13 = arith.constant dense<0.000000e+00> : vector<8x32xf32>
    %38 = tpu.matmul %37, %2, %cst_13 {dimension_numbers = #tpu.dot_dimension_numbers<[1], [0], [0], [1], [0, 0, 1, 1], [], []>} : vector<8x32xf32>, vector<32x32xf32>, vector<8x32xf32> -> vector<8x32xf32>
    %39 = vector.extract_strided_slice %12 {offsets = [48, 0], sizes = [8, 32], strides = [1, 1]} : vector<64x32xf32> to vector<8x32xf32>
    %40 = arith.addf %38, %39 : vector<8x32xf32>
    %41 = math.tanh %40 : vector<8x32xf32>
    %cst_14 = arith.constant dense<0.000000e+00> : vector<8x32xf32>
    %42 = tpu.matmul %41, %2, %cst_14 {dimension_numbers = #tpu.dot_dimension_numbers<[1], [0], [0], [1], [0, 0, 1, 1], [], []>} : vector<8x32xf32>, vector<32x32xf32>, vector<8x32xf32> -> vector<8x32xf32>
    %43 = vector.extract_strided_slice %12 {offsets = [56, 0], sizes = [8, 32], strides = [1, 1]} : vector<64x32xf32> to vector<8x32xf32>
    %44 = arith.addf %42, %43 : vector<8x32xf32>
    %45 = math.tanh %44 : vector<8x32xf32>
    %c0_15 = arith.constant 0 : index
    %c0_16 = arith.constant 0 : index
    %46 = vector.load %arg3[%c0_15, %c0_16] : memref<48x1024xbf16, #tpu.memory_space<vmem>>, vector<48x1024xbf16>
    %47 = arith.truncf %45 : vector<8x32xf32> to vector<8x32xbf16>
    %48 = vector.extract_strided_slice %46 {offsets = [0, 0], sizes = [32, 1024], strides = [1, 1]} : vector<48x1024xbf16> to vector<32x1024xbf16>
    %cst_17 = arith.constant dense<0.000000e+00> : vector<8x1024xf32>
    %49 = tpu.matmul %47, %48, %cst_17 {dimension_numbers = #tpu.dot_dimension_numbers<[1], [0], [0], [1], [0, 0, 1, 1], [], []>} : vector<8x32xbf16>, vector<32x1024xbf16>, vector<8x1024xf32> -> vector<8x1024xf32>
    %c0_18 = arith.constant 0 : index
    %c0_19 = arith.constant 0 : index
    %50 = vector.load %arg1[%c0_18, %c0_19] : memref<8x16xbf16, #tpu.memory_space<vmem>>, vector<8x16xbf16>
    %51 = vector.extract_strided_slice %46 {offsets = [32, 0], sizes = [16, 1024], strides = [1, 1]} : vector<48x1024xbf16> to vector<16x1024xbf16>
    %cst_20 = arith.constant dense<0.000000e+00> : vector<8x1024xf32>
    %52 = tpu.matmul %50, %51, %cst_20 {dimension_numbers = #tpu.dot_dimension_numbers<[1], [0], [0], [1], [0, 0, 1, 1], [], []>} : vector<8x16xbf16>, vector<16x1024xbf16>, vector<8x1024xf32> -> vector<8x1024xf32>
    %53 = arith.addf %49, %52 : vector<8x1024xf32>
    %54 = vector.broadcast %5 : vector<1x1024xf32> to vector<8x1024xf32>
    %55 = arith.addf %53, %54 : vector<8x1024xf32>
    %cst_21 = arith.constant 0.000000e+00 : f32
    %56 = vector.broadcast %cst_21 : f32 to vector<8x1024xf32>
    %57 = arith.maximumf %55, %56 : vector<8x1024xf32>
    tpu.wait_dma2 semaphore(%arg9 : memref<!tpu.dma_semaphore, #tpu.memory_space<semaphore_mem>>) src(%arg5 : memref<1024x1024xbf16, #tpu.memory_space<any>>) dst(%arg8 : memref<1024x1024xbf16, #tpu.memory_space<vmem>>)
    %58 = arith.truncf %57 : vector<8x1024xf32> to vector<8x1024xbf16>
    %c0_22 = arith.constant 0 : index
    %c0_23 = arith.constant 0 : index
    %59 = vector.load %arg8[%c0_22, %c0_23] : memref<1024x1024xbf16, #tpu.memory_space<vmem>>, vector<1024x1024xbf16>
    %cst_24 = arith.constant dense<0.000000e+00> : vector<8x1024xf32>
    %60 = tpu.matmul %58, %59, %cst_24 {dimension_numbers = #tpu.dot_dimension_numbers<[1], [0], [0], [1], [0, 0, 1, 1], [], []>} : vector<8x1024xbf16>, vector<1024x1024xbf16>, vector<8x1024xf32> -> vector<8x1024xf32>
    %61 = vector.broadcast %6 : vector<1x1024xf32> to vector<8x1024xf32>
    %62 = arith.addf %60, %61 : vector<8x1024xf32>
    %cst_25 = arith.constant 0.000000e+00 : f32
    %63 = vector.broadcast %cst_25 : f32 to vector<8x1024xf32>
    %64 = arith.maximumf %62, %63 : vector<8x1024xf32>
    %65 = vector.broadcast %7 : vector<1x1024xf32> to vector<8x1024xf32>
    %66 = arith.mulf %64, %65 : vector<8x1024xf32>
    %cst_26 = arith.constant dense<0.000000e+00> : vector<8xf32>
    %67 = vector.multi_reduction <add>, %66, %cst_26 [1] : vector<8x1024xf32> to vector<8xf32>
    %68 = vector.shape_cast %67 : vector<8xf32> to vector<8x1xf32>
    %69 = vector.broadcast %8 : f32 to vector<8x1xf32>
    %70 = arith.addf %68, %69 : vector<8x1xf32>
    %cst_27 = arith.constant 5.000000e-01 : f32
    %71 = vector.broadcast %cst_27 : f32 to vector<8x1xf32>
    %72 = arith.mulf %71, %70 : vector<8x1xf32>
    %73 = math.tanh %72 : vector<8x1xf32>
    %cst_28 = arith.constant 5.000000e-01 : f32
    %74 = vector.broadcast %cst_28 : f32 to vector<8x1xf32>
    %75 = arith.mulf %74, %73 : vector<8x1xf32>
    %cst_29 = arith.constant 5.000000e-01 : f32
    %76 = vector.broadcast %cst_29 : f32 to vector<8x1xf32>
    %77 = arith.addf %75, %76 : vector<8x1xf32>
    %c0_30 = arith.constant 0 : index
    %c0_31 = arith.constant 0 : index
    %78 = vector.load %arg7[%c0_30, %c0_31] : memref<8x1xf32, #tpu.memory_space<vmem>>, vector<8x1xf32>
    tpu.vector_store %arg7[%c0_30, %c0_31], %77 {strides = array<i32>} : memref<8x1xf32, #tpu.memory_space<vmem>>, vector<8x1xf32>,
    return
  }
}

</mosaic_0001>

<bundles_post_ra>
// kernel: tpu_custom_call.1
= control target key start
LH: loop header
LB: loop body
LE: loop exit
PB: predicated region body
PF: predicated region fallthrough
CT: control target
= control target key end

     0   :  { %13 = vsyncpa [#allocation6], 0  ;;  %s7967_s0 = inlined_call_operand.vmem [shape: f32[64,32], index: 0, kind: input, shape index: {}]   ;;  %s7968_s1 = inlined_call_operand.hbm [shape: bf16[8,16], index: 1, kind: input, shape index: {}]   ;;  %s7969_s2 = inlined_call_operand.vmem [shape: f32[65,32], index: 2, kind: input, shape index: {}]   ;;  %s7970_s3 = inlined_call_operand.hbm [shape: bf16[48,1024], index: 3, kind: input, shape index: {}]   ;;  %s7971_s4 = inlined_call_operand.hbm [shape: f32[3,1024], index: 4, kind: input, shape index: {}]   ;;  %s7972_s5 = inlined_call_operand.hbm [shape: bf16[1024,1024], index: 5, kind: input, shape index: {}]   ;;  %s7973_s6 = inlined_call_operand.<no memory space> [shape: f32[1], index: 6, kind: input, shape index: {}]   ;;  %s7974_s7 = inlined_call_operand.vmem [shape: f32[8,1], index: 7, kind: output, shape index: {}]  }
   0x1   :  { %14 = vsyncpa [#allocation8], 0  ;;  %s34_s26 = sshll.u32 %s7970_s3, 4  ;;  %s7617_s27 = smov [#allocation7]   ;;  %s35_s26 = int_to_ptr.hbm [resolvable:$true] %s34_s26 }
   0x2   :  { %s36_s28 = sshll.u32 %s7617_s27, 4  ;;  %s22_s8 = sshll.u32 %s7968_s1, 4  ;;  %s37_s28 = int_to_ptr.vmem [resolvable:$true] %s36_s28  ;;  %s23_s8 = int_to_ptr.hbm [resolvable:$true] %s22_s8 }
   0x3   :  { %s7618_s9 = smov 512   ;;  %s7619_s10 = smov 32  }
   0x4   :  { %42 = dma.hbm_to_vmem [thread:$0]  %s35_s26, 3072, %s37_s28, [#allocation8], %s7618_s9, %s7618_s9, %s7619_s10  }
   0x5   :  { %s7620_s11 = smov [#allocation5]   ;;  %s48_s15 = sshll.u32 %s7971_s4, 4  ;;  %s49_s15 = int_to_ptr.hbm [resolvable:$true] %s48_s15 }
   0x6   :  { %s24_s12 = sshll.u32 %s7620_s11, 4  ;;  %s7621_s3 = smov [#allocation9]   ;;  %s25_s12 = int_to_ptr.vmem [resolvable:$true] %s24_s12 }
   0x7   :  { %27 = dma.hbm_to_vmem [thread:$0]  %s23_s8, 64, %s25_s12, [#allocation6]  }
   0x8   :  { %s50_s16 = sshll.u32 %s7621_s3, 4  ;;  %s51_s16 = int_to_ptr.vmem [resolvable:$true] %s50_s16 }
   0x9   :  { %53 = dma.hbm_to_vmem [thread:$0]  %s49_s15, 512, %s51_s16, [#allocation8]  }
   0xa   :  { %7611 = dma.done.wait [#allocation6], 64  }
   0xb   :  { %7612 = vsyncadd [#allocation6], 4294967232 }
   0xc   :  { %7613 = dma.done.wait [#allocation8], 3584  }
   0xd   :  { %7614 = vsyncadd [#allocation8], 4294963712  ;;  %v89_v0 = vld [vmem:[%s7969_s2 + $0x38] sm:$0xff]  ;;  %v88_v1 = vld [vmem:[%s7969_s2 + $0x30] sm:$0xff]  ;;  %vm105_vm0 = vcmask 261120   ;;  %v7622_v9 = vmov 0.0  }
   0xe   :  { %v85_v2 = vld [vmem:[%s7969_s2 + $0x18] sm:$0xff]  ;;  %186 = vmatpush.msra.mxu2 %v89_v0  ;;  %v84_v3 = vld [vmem:[%s7969_s2 + $0x10] sm:$0xff]  ;;  %v87_v4 = vld [vmem:[%s7969_s2 + $0x28] sm:$0xff]  ;;  %234 = vmatpush.msra.mxu3 %v89_v0  ;;  %vm429_vm1 = vcmask 130048   ;;  %s76_s23 = sshll.u32 %s7972_s5, 4  ;;  %s7623_s24 = smov [#allocation2]   ;;  %s77_s23 = int_to_ptr.hbm [resolvable:$true] %s76_s23 }
   0xf   :  { %142 = vmatpush.msra.mxu0 %v85_v2  ;;  %v83_v5 = vld [vmem:[%s7969_s2 + $0x8] sm:$0xff]  ;;  %258 = vmatpush.msra.mxu1 %v89_v0  ;;  %v86_v6 = vld [vmem:[%s7969_s2 + $0x20] sm:$0xff]  ;;  %v98_v17 = vld [vmem:[%s7967_s0 + $0x10] sm:$0xff]  ;;  %s78_s25 = sshll.u32 %s7623_s24, 4  ;;  %s79_s25 = int_to_ptr.vmem [resolvable:$true] %s78_s25 }
  0x10   :  { %187 = vmatpush.msra.mxu2 %v88_v1  ;;  %v82_v7 = vld [vmem:[%s7969_s2] sm:$0xff]  ;;  %235 = vmatpush.msra.mxu3 %v88_v1  ;;  %v97_v10 = vld [vmem:[%s7967_s0 + $0x8] sm:$0xff]  ;;  %v99_v23 = vld [vmem:[%s7967_s0 + $0x18] sm:$0xff]  ;;  %81 = dma.hbm_to_vmem [thread:$0]  %s77_s23, 65536, %s79_s25, [#allocation3] }
  0x11   :  { %143 = vmatpush.msra.mxu0 %v84_v3  ;;  %259 = vmatpush.msra.mxu1 %v88_v1  ;;  %v96_v8 = vld [vmem:[%s7967_s0] sm:$0xff]  ;;  %v101_v35 = vld [vmem:[%s7967_s0 + $0x28] sm:$0xff]  ;;  %v102_v41 = vld [vmem:[%s7967_s0 + $0x30] sm:$0xff] }
  0x12   :  { %188 = vmatpush.msra.mxu2 %v87_v4  ;;  %236 = vmatpush.msra.mxu3 %v87_v4  ;;  %v7708_v11 = vld [vmem:[%s7969_s2 + $0x40] ss:$0 sm:$0xff]  ;;  %v103_v47 = vld [vmem:[%s7967_s0 + $0x38] sm:$0xff]  ;;  %v4794_v48 = vld [vmem:[#allocation7 + $0x80] sm:$0xf] }
  0x13   :  { %144 = vmatpush.msra.mxu0 %v83_v5  ;;  %260 = vmatpush.msra.mxu1 %v87_v4  ;;  %v100_v29 = vld [vmem:[%s7967_s0 + $0x20] sm:$0xff]  ;;  %v6961_v51 = vld [vmem:[#allocation7 + $0x44] sm:$0xf]  ;;  %v6970_v57 = vld [vmem:[#allocation7 + $0x8c] sm:$0xf] }
  0x14   :  { %189 = vmatpush.msra.mxu2 %v86_v6  ;;  %237 = vmatpush.msra.mxu3 %v86_v6  ;;  %v6973_v49 = vld [vmem:[#allocation7 + $0x9c] sm:$0xf0]  ;;  %v4868_v52 = vld [vmem:[#allocation7 + $0x60] sm:$0xf0]  ;;  %v388_v53 = vld [vmem:[#allocation5] sm:$0xf] }
  0x15   :  { %145 = vmatpush.msra.mxu0 %v82_v7  ;;  %190 = vmatmul.f32.vlgmr.msra.gmra.mxu2 %v7622_v9  ;;  %v4795_v50 = vor.u32 %v6973_v49, %v4794_v48  ;;  %v4871_v54 = vor.u32 %v6961_v51, %v4868_v52  ;;  %v6969_v55 = vld [vmem:[#allocation7 + $0x84] sm:$0xf]  ;;  %v4804_v59 = vld [vmem:[#allocation7 + $0xa8] sm:$0xf0]  ;;  %v4802_v60 = vld [vmem:[#allocation7 + $0x88] sm:$0xf] }
  0x16   :  { %4777 = vmatmul.msk.f32.vlgmr.msra.gmra.mxu0 %vm105_vm0, %v96_v8  ;;  %210 = vmatpush.msrb.mxu2 %v89_v0  ;;  %v4796_v56 = vld [vmem:[#allocation7 + $0xa0] sm:$0xf0]  ;;  %v6974_v61 = vld [vmem:[#allocation7 + $0xa4] sm:$0xf0]  ;;  %v4807_v62 = vor.u32 %v6970_v57, %v4804_v59  ;;  %v4818_v3 = vld [vmem:[#allocation7 + $0x98] sm:$0xf] }
  0x17   :  { %261 = vmatpush.msra.mxu1 %v86_v6  ;;  %306 = vmatpush.msrb.mxu3 %v89_v0  ;;  %v4799_v58 = vor.u32 %v6969_v55, %v4796_v56  ;;  %v4803_v63 = vor.u32 %v6974_v61, %v4802_v60  ;;  %v6972_v5 = vld [vmem:[#allocation7 + $0x9c] sm:$0xf]  ;;  %v6953_v9 = vld [vmem:[#allocation7 + $0x4] sm:$0xf]  ;;  %v6959_v52 = vld [vmem:[#allocation7 + $0x2c] sm:$0xf0] }
  0x18   :  { %211 = vmatpush.msrb.mxu2 %v88_v1  ;;  %639 = vmatpush.bf16.msrb.mxu0 %v4871_v54  ;;  %v6964_v48 = vld [vmem:[#allocation7 + $0x5c] sm:$0xf]  ;;  %v6960_v54 = vld [vmem:[#allocation7 + $0x34] sm:$0xf0]  ;;  %v6955_v57 = vld [vmem:[#allocation7 + $0x14] sm:$0xf] }
  0x19   :  { %330 = vmatpush.msrb.mxu1 %v89_v0  ;;  %307 = vmatpush.msrb.mxu3 %v88_v1  ;;  %v4892_v49 = vld [vmem:[#allocation7 + $0x78] sm:$0xf0] }
  0x1a   :  { %212 = vmatpush.msrb.mxu2 %v87_v4  ;;  %v4895_v51 = vor.u32 %v6964_v48, %v4892_v49  ;;  %v6956_v59 = vld [vmem:[#allocation7 + $0x1c] sm:$0xf] }
  0x1b   :  { %331 = vmatpush.msrb.mxu1 %v88_v1  ;;  %308 = vmatpush.msrb.mxu3 %v87_v4  ;;  %v4860_v61 = vld [vmem:[#allocation7 + $0x38] sm:$0xf0] }
  0x1c   :  { %213 = vmatpush.msrb.mxu2 %v86_v6 }
  0x1d   :  { %332 = vmatpush.msrb.mxu1 %v87_v4  ;;  %309 = vmatpush.msrb.mxu3 %v86_v6 }
  0x1e   :  { %282 = vmatpush.msra.mxu2 %v89_v0  ;;  %4778 = vmatmul.msk.f32.gmra.mxu0 %vm105_vm0, %v97_v10  ;;  %v4836_v10 = vld [vmem:[#allocation7 + $0x20] sm:$0xf0] }
  0x1f   :  { %333 = vmatpush.msrb.mxu1 %v86_v6 }
  0x20   :  { %283 = vmatpush.msra.mxu2 %v88_v1 }
  0x22   :  { %284 = vmatpush.msra.mxu2 %v87_v4 }
  0x24   :  { %285 = vmatpush.msra.mxu2 %v86_v6 }
  0x26   :  { %4779 = vmatmul.msk.f32.gmra.mxu0 %vm105_vm0, %v98_v17  ;;  %v4874_v17 = vld [vmem:[#allocation7 + $0x48] sm:$0xf] }
  0x2e   :  { %4780 = vmatmul.msk.f32.gmra.mxu0 %vm105_vm0, %v99_v23 }
  0x36   :  { %4781 = vmatmul.msk.f32.gmra.mxu0 %vm105_vm0, %v100_v29 }
  0x3e   :  { %4782 = vmatmul.msk.f32.gmra.mxu0 %vm105_vm0, %v101_v35  ;;  %v6954_v35 = vld [vmem:[#allocation7 + $0xc] sm:$0xf] }
  0x46   :  { %4783 = vmatmul.msk.f32.gmra.mxu0 %vm105_vm0, %v102_v41  ;;  %v4890_v41 = vld [vmem:[#allocation7 + $0x58] sm:$0xf] }
  0x4e   :  { %4784 = vmatmul.msk.f32.gmra.mxu0 %vm105_vm0, %v103_v47 }
  0x93   :  { %v147_v12 = vpop.f32.mrf.mxu0 }
  0x94   :  { %v148_v13 = vadd.f32 %v7708_v11, %v147_v12  ;;  %v4839_v12 = vor.u32 %v6953_v9, %v4836_v10 }
  0x96   :  { %640 = vmatpush.bf16.msrb.mxu0 %v4839_v12 }
  0x98   :  { %v191_v14 = vpop.f32.mrf.mxu2 }
  0x99   :  { %v192_v15 = vadd.f32 %v191_v14, %v148_v13 }
  0x9b   :  { %7497 = vtanh.f32 %v192_v15  ;;  %v150_v18 = vpop.f32.mrf.mxu0 }
  0x9c   :  { %v151_v19 = vadd.f32 %v7708_v11, %v150_v18  ;;  %v6966_v18 = vld [vmem:[#allocation7 + $0x64] sm:$0xf0] }
  0xa1   :  { %v7498_v16 = vpop.eup %7497 }
  0xa2   :  { %4785 = vmatmul.msk.f32.vlgmr.msrb.gmra.mxu2 %vm105_vm0, %v7498_v16 }
  0xa3   :  { %354 = vmatpush.msrb.mxu2 %v89_v0  ;;  %v153_v24 = vpop.f32.mrf.mxu0  ;;  %v4810_v0 = vld [vmem:[#allocation7 + $0x90] sm:$0xf] }
  0xa4   :  { %v154_v25 = vadd.f32 %v7708_v11, %v153_v24  ;;  %v4866_v24 = vld [vmem:[#allocation7 + $0x40] sm:$0xf] }
  0xa5   :  { %355 = vmatpush.msrb.mxu2 %v88_v1  ;;  %v6975_v1 = vld [vmem:[#allocation7 + $0xac] sm:$0xf0] }
  0xa6   :  { %v4811_v2 = vor.u32 %v6975_v1, %v4810_v0 }
  0xa7   :  { %356 = vmatpush.msrb.mxu2 %v87_v4  ;;  %v6976_v4 = vld [vmem:[#allocation7 + $0xb4] sm:$0xf0] }
  0xa8   :  { %v4819_v7 = vor.u32 %v6976_v4, %v4818_v3 }
  0xa9   :  { %357 = vmatpush.msrb.mxu2 %v86_v6  ;;  %v4820_v6 = vld [vmem:[#allocation7 + $0xb8] sm:$0xf0] }
  0xaa   :  { %v4823_v8 = vor.u32 %v6972_v5, %v4820_v6 }
  0xab   :  { %v156_v30 = vpop.f32.mrf.mxu0 }
  0xac   :  { %v157_v31 = vadd.f32 %v7708_v11, %v156_v30  ;;  %v4834_v30 = vld [vmem:[#allocation7] sm:$0xf] }
  0xb3   :  { %v159_v36 = vpop.f32.mrf.mxu0 }
  0xb4   :  { %v160_v37 = vadd.f32 %v7708_v11, %v159_v36  ;;  %v4844_v36 = vld [vmem:[#allocation7 + $0x28] sm:$0xf0] }
  0xbb   :  { %v162_v42 = vpop.f32.mrf.mxu0 }
  0xbc   :  { %v163_v43 = vadd.f32 %v7708_v11, %v162_v42 }
  0xc3   :  { %v165_v13 = vpop.f32.mrf.mxu0 }
  0xc4   :  { %v166_v14 = vadd.f32 %v7708_v11, %v165_v13 }
 0x125   :  { %v215_v20 = vpop.f32.mrf.mxu2 }
 0x126   :  { %v216_v21 = vadd.f32 %v215_v20, %v151_v19  ;;  %v6971_v19 = vld [vmem:[#allocation7 + $0x94] sm:$0xf] }
 0x127   :  { %v4812_v20 = vld [vmem:[#allocation7 + $0xb0] sm:$0xf0] }
 0x128   :  { %7499 = vtanh.f32 %v216_v21  ;;  %v4875_v21 = vor.u32 %v6966_v18, %v4874_v17 }
 0x12e   :  { %v7500_v22 = vpop.eup %7499 }
 0x12f   :  { %4786 = vmatmul.msk.f32.vlgmr.msra.gmra.mxu3 %vm105_vm0, %v7500_v22  ;;  %v4815_v22 = vor.u32 %v6971_v19, %v4812_v20 }
 0x130   :  { %440 = vmatpush.bf16.msra.mxu3 %v4795_v50  ;;  %v4850_v50 = vld [vmem:[#allocation7 + $0x10] sm:$0xf] }
 0x131   :  { %v4851_v55 = vor.u32 %v6959_v52, %v4850_v50 }
 0x1b2   :  { %v239_v26 = vpop.f32.mrf.mxu3 }
 0x1b3   :  { %v240_v27 = vadd.f32 %v239_v26, %v154_v25  ;;  %v6965_v25 = vld [vmem:[#allocation7 + $0x5c] sm:$0xf0] }
 0x1b4   :  { %v4867_v26 = vor.u32 %v6965_v25, %v4866_v24 }
 0x1b5   :  { %7501 = vtanh.f32 %v240_v27  ;;  %v6962_v27 = vld [vmem:[#allocation7 + $0x4c] sm:$0xf] }
 0x1bb   :  { %v7502_v28 = vpop.eup %7501 }
 0x1bc   :  { %4787 = vmatmul.msk.f32.vlgmr.msra.gmra.mxu1 %vm105_vm0, %v7502_v28  ;;  %v4876_v28 = vld [vmem:[#allocation7 + $0x68] sm:$0xf0] }
 0x1bd   :  { %453 = vmatpush.bf16.msra.mxu1 %v4799_v58  ;;  %v4879_v29 = vor.u32 %v6962_v27, %v4876_v28  ;;  %v4852_v58 = vld [vmem:[#allocation7 + $0x30] sm:$0xf0] }
 0x1be   :  { %v4855_v60 = vor.u32 %v6955_v57, %v4852_v58 }
 0x239   :  { %v263_v32 = vpop.f32.mrf.mxu1 }
 0x23a   :  { %v264_v33 = vadd.f32 %v263_v32, %v157_v31  ;;  %v6957_v31 = vld [vmem:[#allocation7 + $0x1c] sm:$0xf0]  ;;  %v4842_v32 = vld [vmem:[#allocation7 + $0x8] sm:$0xf] }
 0x23c   :  { %7503 = vtanh.f32 %v264_v33  ;;  %v4835_v33 = vor.u32 %v6957_v31, %v4834_v30 }
 0x242   :  { %v7504_v34 = vpop.eup %7503 }
 0x243   :  { %4788 = vmatmul.msk.f32.vlgmr.msra.gmra.mxu2 %vm105_vm0, %v7504_v34  ;;  %v6958_v34 = vld [vmem:[#allocation7 + $0x24] sm:$0xf0] }
 0x244   :  { %466 = vmatpush.bf16.msra.mxu2 %v4803_v63  ;;  %v168_v63 = vpop.f32.mrf.mxu0 }
 0x245   :  { %v169_v0 = vadd.f32 %v7708_v11, %v168_v63 }
 0x2c6   :  { %v287_v38 = vpop.f32.mrf.mxu2 }
 0x2c7   :  { %v288_v39 = vadd.f32 %v287_v38, %v160_v37  ;;  %v4843_v37 = vor.u32 %v6958_v34, %v4842_v32  ;;  %v4847_v38 = vor.u32 %v6954_v35, %v4844_v36 }
 0x2c9   :  { %7505 = vtanh.f32 %v288_v39  ;;  %v4882_v39 = vld [vmem:[#allocation7 + $0x50] sm:$0xf] }
 0x2cf   :  { %v7506_v40 = vpop.eup %7505 }
 0x2d0   :  { %4789 = vmatmul.msk.f32.vlgmr.msrb.gmra.mxu3 %vm105_vm0, %v7506_v40  ;;  %v6967_v40 = vld [vmem:[#allocation7 + $0x6c] sm:$0xf0] }
 0x2d1   :  { %479 = vmatpush.bf16.msrb.mxu3 %v4807_v62  ;;  %v4883_v42 = vor.u32 %v6967_v40, %v4882_v39  ;;  %v4863_v62 = vor.u32 %v6956_v59, %v4860_v61 }
 0x2d8   :  { %4824 = vmatmul.msk.bf16.vlgmr.msra.gmra.mxu3 %vm429_vm1, %v388_v53 }
 0x2d9   :  { %518 = vmatpush.bf16.msra.mxu3 %v4819_v7 }
 0x2e8   :  { %4827 = vmatmul.msk.bf16.vlgmr.msrb.gmra.mxu3 %vm429_vm1, %v388_v53 }
 0x2e9   :  { %652 = vmatpush.bf16.msrb.mxu3 %v4875_v21  ;;  %v7770_v21 = vld [vmem:[#allocation9] sm:$0x77] }
 0x2ea   :  { %v728_v30 = vperm.slane %v7770_v21, 0 }
 0x2ec   :  { %v744_v36 = vperm.slane %v728_v30, 0 }
 0x2ed   :  { %653 = vmatpush.bf16.msrb.mxu3 %v4843_v37 }
 0x2f8   :  { %4830 = vmatmul.msk.bf16.vlgmr.msra.gmra.mxu3 %vm429_vm1, %v388_v53 }
 0x353   :  { %v311_v44 = vpop.f32.mrf.mxu3 }
 0x354   :  { %v312_v45 = vadd.f32 %v311_v44, %v163_v43  ;;  %v6968_v43 = vld [vmem:[#allocation7 + $0x74] sm:$0xf0]  ;;  %v6963_v44 = vld [vmem:[#allocation7 + $0x54] sm:$0xf] }
 0x356   :  { %7507 = vtanh.f32 %v312_v45  ;;  %v4884_v45 = vld [vmem:[#allocation7 + $0x70] sm:$0xf0] }
 0x357   :  { %v4887_v47 = vor.u32 %v6963_v44, %v4884_v45  ;;  %v7784_v44 = vld [vmem:[#allocation9 + $0x10] sm:$0x77] }
 0x358   :  { %v733_v50 = vperm.slane %v7784_v44, 4 }
 0x359   :  { %691 = vmatpush.bf16.msra.mxu0 %v4887_v47  ;;  %v7788_v47 = vld [vmem:[#allocation9 + $0x18] sm:$0x77] }
 0x35a   :  { %v735_v52 = vperm.slane %v7788_v47, 4 }
 0x35b   :  { %v442_v1 = vpop.f32.mrf.mxu3 }
 0x35c   :  { %v7508_v46 = vpop.eup %7507  ;;  %v751_v57 = vperm.slane %v735_v52, 0 }
 0x35d   :  { %4790 = vmatmul.msk.f32.vlgmr.msrb.gmra.mxu1 %vm105_vm0, %v7508_v46  ;;  %v4891_v46 = vor.u32 %v6968_v43, %v4890_v41  ;;  %692 = vmatpush.bf16.msra.mxu0 %v4855_v60  ;;  %v732_v60 = vperm.slane %v7784_v44, 0 }
 0x35e   :  { %492 = vmatpush.bf16.msrb.mxu1 %v4811_v2 }
 0x35f   :  { %704 = vmatpush.bf16.msra.mxu3 %v4891_v46 }
 0x363   :  { %v444_v5 = vpop.f32.mrf.mxu3 }
 0x365   :  { %4825 = vmatmul.msk.bf16.vlgmr.msra.gmra.mxu1 %vm429_vm1, %v388_v53 }
 0x366   :  { %531 = vmatpush.bf16.msra.mxu1 %v4823_v8 }
 0x36b   :  { %v481_v10 = vpop.f32.mrf.mxu3 }
 0x373   :  { %v483_v13 = vpop.f32.mrf.mxu3 }
 0x375   :  { %4828 = vmatmul.msk.bf16.vlgmr.msrb.gmra.mxu1 %vm429_vm1, %v388_v53 }
 0x376   :  { %665 = vmatpush.bf16.msrb.mxu1 %v4879_v29 }
 0x37a   :  { %666 = vmatpush.bf16.msrb.mxu1 %v4847_v38 }
 0x385   :  { %4831 = vmatmul.msk.bf16.vlgmr.msra.gmra.mxu1 %vm429_vm1, %v388_v53 }
 0x386   :  { %717 = vmatpush.bf16.msra.mxu1 %v4895_v51 }
 0x38a   :  { %718 = vmatpush.bf16.msra.mxu1 %v4863_v62  ;;  %v734_v62 = vperm.slane %v7788_v47, 0 }
 0x38c   :  { %v750_v5 = vperm.slane %v734_v62, 0 }
 0x3da   :  { %v335_v15 = vpop.f32.mrf.mxu1 }
 0x3db   :  { %v336_v16 = vadd.f32 %v335_v15, %v166_v14 }
 0x3dd   :  { %7509 = vtanh.f32 %v336_v16  ;;  %v520_v16 = vpop.f32.mrf.mxu3 }
 0x3e2   :  { %v455_v2 = vpop.f32.mrf.mxu1 }
 0x3e3   :  { %v7510_v23 = vpop.eup %7509 }
 0x3e4   :  { %4791 = vmatmul.msk.f32.vlgmr.msrb.gmra.mxu2 %vm105_vm0, %v7510_v23  ;;  %v729_v23 = vperm.slane %v7770_v21, 4 }
 0x3e5   :  { %505 = vmatpush.bf16.msrb.mxu2 %v4815_v22  ;;  %v522_v19 = vpop.f32.mrf.mxu3  ;;  %v7772_v22 = vld [vmem:[#allocation9 + $0x8] sm:$0x77] }
 0x3e6   :  { %v731_v24 = vperm.slane %v7772_v22, 4  ;;  %v745_v25 = vperm.slane %v729_v23, 0  ;;  %v730_v32 = vperm.slane %v7772_v22, 0 }
 0x3e8   :  { %v747_v27 = vperm.slane %v731_v24, 0  ;;  %v746_v39 = vperm.slane %v730_v32, 0 }
 0x3ea   :  { %v457_v6 = vpop.f32.mrf.mxu1 }
 0x3ec   :  { %4826 = vmatmul.msk.bf16.vlgmr.msra.gmra.mxu2 %vm429_vm1, %v388_v53 }
 0x3ed   :  { %626 = vmatpush.bf16.msra.mxu2 %v4867_v26 }
 0x3f1   :  { %627 = vmatpush.bf16.msra.mxu2 %v4835_v33 }
 0x3f2   :  { %v7761_v11 = vpop.f32.mrf.mxu1 }
 0x3fa   :  { %v496_v14 = vpop.f32.mrf.mxu1 }
 0x3fc   :  { %4829 = vmatmul.msk.bf16.vlgmr.msrb.gmra.mxu2 %vm429_vm1, %v388_v53  ;;  %v4858_v53 = vld [vmem:[#allocation7 + $0x18] sm:$0xf] }
 0x3fd   :  { %678 = vmatpush.bf16.msrb.mxu2 %v4883_v42  ;;  %v4859_v56 = vor.u32 %v6960_v54, %v4858_v53 }
 0x3ff   :  { %705 = vmatpush.bf16.msra.mxu3 %v4859_v56 }
 0x401   :  { %679 = vmatpush.bf16.msrb.mxu2 %v4851_v55  ;;  %v749_v55 = vperm.slane %v733_v50, 0 }
 0x402   :  { %v533_v17 = vpop.f32.mrf.mxu1 }
 0x40a   :  { %v535_v20 = vpop.f32.mrf.mxu1 }
 0x467   :  { %v359_v3 = vpop.f32.mrf.mxu2 }
 0x468   :  { %v360_v4 = vadd.f32 %v359_v3, %v169_v0 }
 0x46a   :  { %7511 = vtanh.f32 %v360_v4 }
 0x46f   :  { %v468_v7 = vpop.f32.mrf.mxu2 }
 0x470   :  { %v7512_v8 = vpop.eup %7511 }
 0x471   :  { %v387_v9 = vpack.c.bf16 %v7512_v8, %v7512_v8 }
 0x473   :  { %4896 = vmatmul.msk.bf16.vlgmr.msra.gmra.mxu2 %vm105_vm0, %v387_v9  ;;  %4897 = vmatmul.msk.bf16.vlgmr.msrb.gmra.mxu0 %vm105_vm0, %v387_v9 }
 0x474   :  { %4898 = vmatmul.msk.bf16.vlgmr.msrb.gmra.mxu3 %vm105_vm0, %v387_v9  ;;  %4899 = vmatmul.msk.bf16.vlgmr.msrb.gmra.mxu1 %vm105_vm0, %v387_v9 }
 0x477   :  { %v470_v12 = vpop.f32.mrf.mxu2 }
 0x47f   :  { %v507_v15 = vpop.f32.mrf.mxu2 }
 0x483   :  { %4900 = vmatmul.msk.bf16.vlgmr.msrb.gmra.mxu2 %vm105_vm0, %v387_v9  ;;  %4901 = vmatmul.msk.bf16.vlgmr.msra.gmra.mxu0 %vm105_vm0, %v387_v9 }
 0x484   :  { %4902 = vmatmul.msk.bf16.vlgmr.msra.gmra.mxu3 %vm105_vm0, %v387_v9  ;;  %4903 = vmatmul.msk.bf16.vlgmr.msra.gmra.mxu1 %vm105_vm0, %v387_v9 }
 0x487   :  { %v509_v18 = vpop.f32.mrf.mxu2 }
 0x4f0   :  { %v642_v26 = vpop.f32.mrf.mxu0 }
 0x4f1   :  { %v643_v28 = vadd.f32 %v642_v26, %v455_v2  ;;  %v668_v29 = vpop.f32.mrf.mxu1  ;;  %v748_v2 = vperm.slane %v732_v60, 0 }
 0x4f2   :  { %v669_v31 = vadd.f32 %v668_v29, %v481_v10 }
 0x4f3   :  { %v7778_v33 = vadd.f32 %v745_v25, %v643_v28 }
 0x4f4   :  { %v7780_v34 = vadd.f32 %v747_v27, %v669_v31 }
 0x4f5   :  { %v761_v35 = vmax.f32 %v7778_v33, 0.0 }
 0x4f6   :  { %v763_v37 = vmax.f32 %v7780_v34, 0.0  ;;  %v629_v38 = vpop.f32.mrf.mxu2 }
 0x4f7   :  { %v630_v40 = vadd.f32 %v629_v38, %v442_v1  ;;  %v655_v41 = vpop.f32.mrf.mxu3 }
 0x4f8   :  { %v656_v42 = vadd.f32 %v655_v41, %v468_v7  ;;  %v644_v43 = vpop.f32.mrf.mxu0 }
 0x4f9   :  { %v7786_v45 = vadd.f32 %v744_v36, %v630_v40  ;;  %v670_v46 = vpop.f32.mrf.mxu1 }
 0x4fa   :  { %v7790_v48 = vadd.f32 %v746_v39, %v656_v42 }
 0x4fb   :  { %v760_v49 = vmax.f32 %v7786_v45, 0.0 }
 0x4fc   :  { %v762_v51 = vmax.f32 %v7790_v48, 0.0 }
 0x4fe   :  { %v631_v53 = vpop.f32.mrf.mxu2 }
 0x4ff   :  { %v657_v54 = vpop.f32.mrf.mxu3 }
 0x500   :  { %v694_v56 = vpop.f32.mrf.mxu0 }
 0x501   :  { %v695_v58 = vadd.f32 %v694_v56, %v507_v15  ;;  %v720_v59 = vpop.f32.mrf.mxu1 }
 0x502   :  { %v721_v61 = vadd.f32 %v720_v59, %v533_v17 }
 0x503   :  { %v7798_v63 = vadd.f32 %v749_v55, %v695_v58 }
 0x504   :  { %v7800_v0 = vadd.f32 %v751_v57, %v721_v61 }
 0x505   :  { %v765_v1 = vmax.f32 %v7798_v63, 0.0 }
 0x506   :  { %v767_v3 = vmax.f32 %v7800_v0, 0.0  ;;  %v681_v4 = vpop.f32.mrf.mxu2 }
 0x507   :  { %v682_v6 = vadd.f32 %v681_v4, %v7761_v11  ;;  %v707_v7 = vpop.f32.mrf.mxu3 }
 0x508   :  { %v708_v8 = vadd.f32 %v707_v7, %v520_v16  ;;  %v696_v9 = vpop.f32.mrf.mxu0 }
 0x509   :  { %v7805_v10 = vadd.f32 %v748_v2, %v682_v6  ;;  %v722_v12 = vpop.f32.mrf.mxu1 }
 0x50a   :  { %v7807_v13 = vadd.f32 %v750_v5, %v708_v8 }
 0x50b   :  { %v764_v14 = vmax.f32 %v7805_v10, 0.0 }
 0x50c   :  { %v766_v15 = vmax.f32 %v7807_v13, 0.0 }
 0x50e   :  { %v683_v17 = vpop.f32.mrf.mxu2 }
 0x50f   :  { %v709_v18 = vpop.f32.mrf.mxu3 }
 0x510   :  { %7615 = dma.done.wait [#allocation3], 65536 }
 0x511   :  { %7616 = vsyncadd [#allocation3], 4294901760  ;;  %v5130_v19 = vld [vmem:[#allocation2 + $0x1c0] sm:$0xf]  ;;  %v7824_v45 = vpack.c.bf16 %v761_v35, %v761_v35  ;;  %v7830_v33 = vpack.c.bf16 %v763_v37, %v763_v37  ;;  %v7848_v10 = vpack.c.bf16 %v765_v1, %v765_v1  ;;  %v7081_v13 = vld [vmem:[#allocation2 + $0x344] sm:$0xf]  ;;  %v7854_v63 = vpack.c.bf16 %v767_v3, %v767_v3 }
 0x512   :  { %v7037_v20 = vld [vmem:[#allocation2 + $0x1dc] sm:$0xf0]  ;;  %v7073_v0 = vld [vmem:[#allocation2 + $0x304] sm:$0xf]  ;;  %vm4763_vm2 = vcmask 7168  }
 0x513   :  { %v5386_v23 = vld [vmem:[#allocation2 + $0x3c0] sm:$0xf]  ;;  %v5131_v11 = vor.u32 %v7037_v20, %v5130_v19  ;;  %v7137_v3 = vld [vmem:[#allocation2 + $0x504] sm:$0xf] }
 0x514   :  { %v7101_v24 = vld [vmem:[#allocation2 + $0x3dc] sm:$0xf0] }
 0x515   :  { %v5642_v16 = vld [vmem:[#allocation2 + $0x5c0] sm:$0xf]  ;;  %v5387_v26 = vor.u32 %v7101_v24, %v5386_v23  ;;  %3876 = vmatpush.bf16.msra.mxu2 %v5131_v11 }
 0x516   :  { %v7165_v25 = vld [vmem:[#allocation2 + $0x5dc] sm:$0xf0] }
 0x517   :  { %v5643_v27 = vor.u32 %v7165_v25, %v5642_v16  ;;  %v5098_v28 = vld [vmem:[#allocation2 + $0x180] sm:$0xf]  ;;  %3889 = vmatpush.bf16.msrb.mxu0 %v5387_v26 }
 0x518   :  { %v7029_v29 = vld [vmem:[#allocation2 + $0x19c] sm:$0xf0] }
 0x519   :  { %v5354_v30 = vld [vmem:[#allocation2 + $0x380] sm:$0xf]  ;;  %v5099_v31 = vor.u32 %v7029_v29, %v5098_v28  ;;  %3902 = vmatpush.bf16.msrb.mxu3 %v5643_v27 }
 0x51a   :  { %v7093_v32 = vld [vmem:[#allocation2 + $0x39c] sm:$0xf0] }
 0x51b   :  { %v5610_v36 = vld [vmem:[#allocation2 + $0x580] sm:$0xf]  ;;  %v5355_v39 = vor.u32 %v7093_v32, %v5354_v30  ;;  %3877 = vmatpush.bf16.msra.mxu2 %v5099_v31 }
 0x51c   :  { %v7157_v38 = vld [vmem:[#allocation2 + $0x59c] sm:$0xf0] }
 0x51d   :  { %v5611_v40 = vor.u32 %v7157_v38, %v5610_v36  ;;  %v5898_v41 = vld [vmem:[#allocation2 + $0x7c0] sm:$0xf]  ;;  %3890 = vmatpush.bf16.msrb.mxu0 %v5355_v39 }
 0x51e   :  { %v7229_v42 = vld [vmem:[#allocation2 + $0x7dc] sm:$0xf0] }
 0x51f   :  { %v5066_v43 = vld [vmem:[#allocation2 + $0x140] sm:$0xf]  ;;  %v5899_v46 = vor.u32 %v7229_v42, %v5898_v41  ;;  %3903 = vmatpush.bf16.msrb.mxu3 %v5611_v40 }
 0x520   :  { %v7021_v50 = vld [vmem:[#allocation2 + $0x15c] sm:$0xf0] }
 0x521   :  { %v5322_v52 = vld [vmem:[#allocation2 + $0x340] sm:$0xf]  ;;  %3915 = vmatpush.bf16.msrb.mxu1 %v5899_v46  ;;  %v5067_v57 = vor.u32 %v7021_v50, %v5066_v43 }
 0x522   :  { %v7085_v53 = vld [vmem:[#allocation2 + $0x35c] sm:$0xf0] }
 0x523   :  { %v5578_v54 = vld [vmem:[#allocation2 + $0x540] sm:$0xf]  ;;  %v5323_v61 = vor.u32 %v7085_v53, %v5322_v52  ;;  %3878 = vmatpush.bf16.msra.mxu2 %v5067_v57 }
 0x524   :  { %v7149_v55 = vld [vmem:[#allocation2 + $0x55c] sm:$0xf0] }
 0x525   :  { %v5866_v56 = vld [vmem:[#allocation2 + $0x780] sm:$0xf]  ;;  %v5579_v62 = vor.u32 %v7149_v55, %v5578_v54  ;;  %3891 = vmatpush.bf16.msrb.mxu0 %v5323_v61 }
 0x526   :  { %v7221_v58 = vld [vmem:[#allocation2 + $0x79c] sm:$0xf0] }
 0x527   :  { %v5034_v59 = vld [vmem:[#allocation2 + $0x100] sm:$0xf]  ;;  %v5867_v2 = vor.u32 %v7221_v58, %v5866_v56  ;;  %3904 = vmatpush.bf16.msrb.mxu3 %v5579_v62 }
 0x528   :  { %v7013_v60 = vld [vmem:[#allocation2 + $0x11c] sm:$0xf0] }
 0x529   :  { %v5290_v4 = vld [vmem:[#allocation2 + $0x300] sm:$0xf]  ;;  %3916 = vmatpush.bf16.msrb.mxu1 %v5867_v2  ;;  %v5035_v12 = vor.u32 %v7013_v60, %v5034_v59 }
 0x52a   :  { %v7077_v5 = vld [vmem:[#allocation2 + $0x31c] sm:$0xf0] }
 0x52b   :  { %v5546_v6 = vld [vmem:[#allocation2 + $0x500] sm:$0xf]  ;;  %v5291_v20 = vor.u32 %v7077_v5, %v5290_v4  ;;  %3879 = vmatpush.bf16.msra.mxu2 %v5035_v12 }
 0x52c   :  { %v7141_v7 = vld [vmem:[#allocation2 + $0x51c] sm:$0xf0] }
 0x52d   :  { %v5834_v8 = vld [vmem:[#allocation2 + $0x740] sm:$0xf]  ;;  %v5547_v23 = vor.u32 %v7141_v7, %v5546_v6  ;;  %3892 = vmatpush.bf16.msrb.mxu0 %v5291_v20 }
 0x52e   :  { %v7213_v9 = vld [vmem:[#allocation2 + $0x75c] sm:$0xf0] }
 0x52f   :  { %v5835_v17 = vor.u32 %v7213_v9, %v5834_v8  ;;  %v5002_v18 = vld [vmem:[#allocation2 + $0xc0] sm:$0xf]  ;;  %3905 = vmatpush.bf16.msrb.mxu3 %v5547_v23 }
 0x530   :  { %v7005_v19 = vld [vmem:[#allocation2 + $0xdc] sm:$0xf0] }
 0x531   :  { %v5258_v11 = vld [vmem:[#allocation2 + $0x2c0] sm:$0xf]  ;;  %3917 = vmatpush.bf16.msrb.mxu1 %v5835_v17  ;;  %v5003_v28 = vor.u32 %v7005_v19, %v5002_v18 }
 0x532   :  { %v5802_v24 = vld [vmem:[#allocation2 + $0x700] sm:$0xf] }
 0x533   :  { %v7205_v16 = vld [vmem:[#allocation2 + $0x71c] sm:$0xf0]  ;;  %3880 = vmatpush.bf16.msra.mxu2 %v5003_v28 }
 0x534   :  { %v7069_v25 = vld [vmem:[#allocation2 + $0x2dc] sm:$0xf0]  ;;  %v5803_v29 = vor.u32 %v7205_v16, %v5802_v24 }
 0x535   :  { %v5514_v26 = vld [vmem:[#allocation2 + $0x4c0] sm:$0xf]  ;;  %v5259_v32 = vor.u32 %v7069_v25, %v5258_v11 }
 0x536   :  { %v7133_v27 = vld [vmem:[#allocation2 + $0x4dc] sm:$0xf0]  ;;  %3918 = vmatpush.bf16.msrb.mxu1 %v5803_v29 }
 0x537   :  { %v4970_v30 = vld [vmem:[#allocation2 + $0x80] sm:$0xf]  ;;  %v5515_v36 = vor.u32 %v7133_v27, %v5514_v26  ;;  %3893 = vmatpush.bf16.msrb.mxu0 %v5259_v32 }
 0x538   :  { %v6997_v31 = vld [vmem:[#allocation2 + $0x9c] sm:$0xf0] }
 0x539   :  { %v5226_v38 = vld [vmem:[#allocation2 + $0x280] sm:$0xf]  ;;  %v4971_v46 = vor.u32 %v6997_v31, %v4970_v30  ;;  %3906 = vmatpush.bf16.msrb.mxu3 %v5515_v36 }
 0x53a   :  { %v5770_v39 = vld [vmem:[#allocation2 + $0x6c0] sm:$0xf] }
 0x53b   :  { %v7197_v40 = vld [vmem:[#allocation2 + $0x6dc] sm:$0xf0]  ;;  %3881 = vmatpush.bf16.msra.mxu2 %v4971_v46 }
 0x53c   :  { %v7061_v41 = vld [vmem:[#allocation2 + $0x29c] sm:$0xf0]  ;;  %v5771_v50 = vor.u32 %v7197_v40, %v5770_v39 }
 0x53d   :  { %v5482_v42 = vld [vmem:[#allocation2 + $0x480] sm:$0xf]  ;;  %v5227_v54 = vor.u32 %v7061_v41, %v5226_v38 }
 0x53e   :  { %v7125_v43 = vld [vmem:[#allocation2 + $0x49c] sm:$0xf0]  ;;  %3919 = vmatpush.bf16.msrb.mxu1 %v5771_v50  ;;  %v7814_v50 = vpack.c.bf16 %v760_v49, %v760_v49 }
 0x53f   :  { %v4938_v52 = vld [vmem:[#allocation2 + $0x40] sm:$0xf]  ;;  %v5483_v55 = vor.u32 %v7125_v43, %v5482_v42  ;;  %3894 = vmatpush.bf16.msrb.mxu0 %v5227_v54 }
 0x540   :  { %v6989_v53 = vld [vmem:[#allocation2 + $0x5c] sm:$0xf0] }
 0x541   :  { %v5194_v56 = vld [vmem:[#allocation2 + $0x240] sm:$0xf]  ;;  %v4939_v62 = vor.u32 %v6989_v53, %v4938_v52  ;;  %3907 = vmatpush.bf16.msrb.mxu3 %v5483_v55  ;;  %v7819_v55 = vpack.c.bf16 %v762_v51, %v762_v51 }
 0x542   :  { %v5738_v57 = vld [vmem:[#allocation2 + $0x680] sm:$0xf] }
 0x543   :  { %v7189_v58 = vld [vmem:[#allocation2 + $0x69c] sm:$0xf0]  ;;  %3882 = vmatpush.bf16.msra.mxu2 %v4939_v62 }
 0x544   :  { %v7053_v59 = vld [vmem:[#allocation2 + $0x25c] sm:$0xf0]  ;;  %v5739_v2 = vor.u32 %v7189_v58, %v5738_v57 }
 0x545   :  { %v5450_v60 = vld [vmem:[#allocation2 + $0x440] sm:$0xf]  ;;  %v5195_v7 = vor.u32 %v7053_v59, %v5194_v56 }
 0x546   :  { %v7117_v61 = vld [vmem:[#allocation2 + $0x45c] sm:$0xf0]  ;;  %3920 = vmatpush.bf16.msrb.mxu1 %v5739_v2 }
 0x547   :  { %v4906_v4 = vld [vmem:[#allocation2] sm:$0xf]  ;;  %v5451_v8 = vor.u32 %v7117_v61, %v5450_v60  ;;  %3895 = vmatpush.bf16.msrb.mxu0 %v5195_v7 }
 0x548   :  { %v6981_v5 = vld [vmem:[#allocation2 + $0x1c] sm:$0xf0] }
 0x549   :  { %v5162_v6 = vld [vmem:[#allocation2 + $0x200] sm:$0xf]  ;;  %v4907_v16 = vor.u32 %v6981_v5, %v4906_v4  ;;  %3908 = vmatpush.bf16.msrb.mxu3 %v5451_v8 }
 0x54a   :  { %v7045_v9 = vld [vmem:[#allocation2 + $0x21c] sm:$0xf0] }
 0x54b   :  { %v5706_v12 = vld [vmem:[#allocation2 + $0x640] sm:$0xf]  ;;  %v5163_v28 = vor.u32 %v7045_v9, %v5162_v6  ;;  %3883 = vmatpush.bf16.msra.mxu2 %v4907_v16 }
 0x54c   :  { %v7181_v17 = vld [vmem:[#allocation2 + $0x65c] sm:$0xf0] }
 0x54d   :  { %v5418_v18 = vld [vmem:[#allocation2 + $0x400] sm:$0xf]  ;;  %v5707_v25 = vor.u32 %v7181_v17, %v5706_v12  ;;  %3896 = vmatpush.bf16.msrb.mxu0 %v5163_v28 }
 0x54e   :  { %v7109_v19 = vld [vmem:[#allocation2 + $0x41c] sm:$0xf0]  ;;  %3884 = vmatmul.bf16.vlgmr.msra.gmra.mxu2 %v7814_v50 }
 0x54f   :  { %v6154_v20 = vld [vmem:[#allocation2 + $0x9c0] sm:$0xf]  ;;  %v5419_v29 = vor.u32 %v7109_v19, %v5418_v18  ;;  %3921 = vmatpush.bf16.msrb.mxu1 %v5707_v25 }
 0x550   :  { %v7293_v23 = vld [vmem:[#allocation2 + $0x9dc] sm:$0xf0]  ;;  %3897 = vmatmul.bf16.vlgmr.msrb.gmra.mxu0 %v7824_v45 }
 0x551   :  { %v6410_v11 = vld [vmem:[#allocation2 + $0xbc0] sm:$0xf]  ;;  %v6155_v32 = vor.u32 %v7293_v23, %v6154_v20  ;;  %3909 = vmatpush.bf16.msrb.mxu3 %v5419_v29 }
 0x552   :  { %v7357_v24 = vld [vmem:[#allocation2 + $0xbdc] sm:$0xf0] }
 0x553   :  { %v6666_v26 = vld [vmem:[#allocation2 + $0xdc0] sm:$0xf]  ;;  %v6411_v36 = vor.u32 %v7357_v24, %v6410_v11  ;;  %3928 = vmatpush.bf16.msrb.mxu2 %v6155_v32 }
 0x554   :  { %v7421_v27 = vld [vmem:[#allocation2 + $0xddc] sm:$0xf0]  ;;  %3910 = vmatmul.bf16.vlgmr.msrb.gmra.mxu3 %v7819_v55 }
 0x555   :  { %v5674_v30 = vld [vmem:[#allocation2 + $0x600] sm:$0xf]  ;;  %v6667_v41 = vor.u32 %v7421_v27, %v6666_v26  ;;  %3941 = vmatpush.bf16.msra.mxu0 %v6411_v36 }
 0x556   :  { %v7173_v31 = vld [vmem:[#allocation2 + $0x61c] sm:$0xf0] }
 0x557   :  { %v6122_v38 = vld [vmem:[#allocation2 + $0x980] sm:$0xf]  ;;  %v5675_v52 = vor.u32 %v7173_v31, %v5674_v30  ;;  %3954 = vmatpush.bf16.msra.mxu3 %v6667_v41 }
 0x558   :  { %v6922_v39 = vld [vmem:[#allocation2 + $0xfc0] sm:$0xf] }
 0x559   :  { %v7485_v40 = vld [vmem:[#allocation2 + $0xfdc] sm:$0xf0]  ;;  %3922 = vmatpush.bf16.msrb.mxu1 %v5675_v52 }
 0x55a   :  { %v7285_v42 = vld [vmem:[#allocation2 + $0x99c] sm:$0xf0]  ;;  %v6923_v56 = vor.u32 %v7485_v40, %v6922_v39 }
 0x55b   :  { %v6378_v43 = vld [vmem:[#allocation2 + $0xb80] sm:$0xf]  ;;  %v6123_v49 = vor.u32 %v7285_v42, %v6122_v38 }
 0x55c   :  { %v7349_v46 = vld [vmem:[#allocation2 + $0xb9c] sm:$0xf0]  ;;  %3923 = vmatmul.bf16.vlgmr.msrb.gmra.mxu1 %v7830_v33 }
 0x55d   :  { %v6634_v53 = vld [vmem:[#allocation2 + $0xd80] sm:$0xf]  ;;  %v6379_v57 = vor.u32 %v7349_v46, %v6378_v43  ;;  %3967 = vmatpush.bf16.msra.mxu1 %v6923_v56  ;;  %3929 = vmatpush.bf16.msrb.mxu2 %v6123_v49 }
 0x55e   :  { %v7413_v54 = vld [vmem:[#allocation2 + $0xd9c] sm:$0xf0] }
 0x55f   :  { %v6090_v58 = vld [vmem:[#allocation2 + $0x940] sm:$0xf]  ;;  %v6635_v48 = vor.u32 %v7413_v54, %v6634_v53  ;;  %3942 = vmatpush.bf16.msra.mxu0 %v6379_v57 }
 0x560   :  { %v6890_v59 = vld [vmem:[#allocation2 + $0xf80] sm:$0xf] }
 0x561   :  { %v7477_v60 = vld [vmem:[#allocation2 + $0xf9c] sm:$0xf0]  ;;  %3955 = vmatpush.bf16.msra.mxu3 %v6635_v48 }
 0x562   :  { %v7277_v61 = vld [vmem:[#allocation2 + $0x95c] sm:$0xf0]  ;;  %v6891_v4 = vor.u32 %v7477_v60, %v6890_v59 }
 0x563   :  { %v6346_v51 = vld [vmem:[#allocation2 + $0xb40] sm:$0xf]  ;;  %v6091_v5 = vor.u32 %v7277_v61, %v6090_v58 }
 0x564   :  { %v7341_v62 = vld [vmem:[#allocation2 + $0xb5c] sm:$0xf0]  ;;  %3968 = vmatpush.bf16.msra.mxu1 %v6891_v4 }
 0x565   :  { %v6602_v35 = vld [vmem:[#allocation2 + $0xd40] sm:$0xf]  ;;  %v6347_v6 = vor.u32 %v7341_v62, %v6346_v51  ;;  %3930 = vmatpush.bf16.msrb.mxu2 %v6091_v5 }
 0x566   :  { %v7405_v2 = vld [vmem:[#allocation2 + $0xd5c] sm:$0xf0] }
 0x567   :  { %v6058_v7 = vld [vmem:[#allocation2 + $0x900] sm:$0xf]  ;;  %v6603_v34 = vor.u32 %v7405_v2, %v6602_v35  ;;  %3943 = vmatpush.bf16.msra.mxu0 %v6347_v6 }
 0x568   :  { %v6858_v8 = vld [vmem:[#allocation2 + $0xf40] sm:$0xf] }
 0x569   :  { %v7469_v9 = vld [vmem:[#allocation2 + $0xf5c] sm:$0xf0]  ;;  %3956 = vmatpush.bf16.msra.mxu3 %v6603_v34 }
 0x56a   :  { %v7269_v37 = vld [vmem:[#allocation2 + $0x91c] sm:$0xf0]  ;;  %v6859_v20 = vor.u32 %v7469_v9, %v6858_v8 }
 0x56b   :  { %v6314_v12 = vld [vmem:[#allocation2 + $0xb00] sm:$0xf]  ;;  %v6059_v23 = vor.u32 %v7269_v37, %v6058_v7 }
 0x56c   :  { %v7333_v17 = vld [vmem:[#allocation2 + $0xb1c] sm:$0xf0]  ;;  %3969 = vmatpush.bf16.msra.mxu1 %v6859_v20  ;;  %v7033_v20 = vld [vmem:[#allocation2 + $0x1c4] sm:$0xf] }
 0x56d   :  { %v6570_v18 = vld [vmem:[#allocation2 + $0xd00] sm:$0xf]  ;;  %v6315_v11 = vor.u32 %v7333_v17, %v6314_v12  ;;  %3931 = vmatpush.bf16.msrb.mxu2 %v6059_v23  ;;  %v5132_v23 = vld [vmem:[#allocation2 + $0x1e0] sm:$0xf0] }
 0x56e   :  { %v7397_v19 = vld [vmem:[#allocation2 + $0xd1c] sm:$0xf0] }
 0x56f   :  { %v6026_v24 = vld [vmem:[#allocation2 + $0x8c0] sm:$0xf]  ;;  %v6571_v26 = vor.u32 %v7397_v19, %v6570_v18  ;;  %3944 = vmatpush.bf16.msra.mxu0 %v6315_v11  ;;  %v7097_v11 = vld [vmem:[#allocation2 + $0x3c4] sm:$0xf] }
 0x570   :  { %v6826_v16 = vld [vmem:[#allocation2 + $0xf00] sm:$0xf] }
 0x571   :  { %v7461_v25 = vld [vmem:[#allocation2 + $0xf1c] sm:$0xf0]  ;;  %3957 = vmatpush.bf16.msra.mxu3 %v6571_v26  ;;  %v5644_v26 = vld [vmem:[#allocation2 + $0x5e0] sm:$0xf0] }
 0x572   :  { %v7261_v27 = vld [vmem:[#allocation2 + $0x8dc] sm:$0xf0]  ;;  %v6827_v32 = vor.u32 %v7461_v25, %v6826_v16  ;;  %v5388_v16 = vld [vmem:[#allocation2 + $0x3e0] sm:$0xf0] }
 0x573   :  { %v6282_v28 = vld [vmem:[#allocation2 + $0xac0] sm:$0xf]  ;;  %v6027_v36 = vor.u32 %v7261_v27, %v6026_v24  ;;  %v7161_v25 = vld [vmem:[#allocation2 + $0x5c4] sm:$0xf] }
 0x574   :  { %v7325_v29 = vld [vmem:[#allocation2 + $0xadc] sm:$0xf0]  ;;  %3970 = vmatpush.bf16.msra.mxu1 %v6827_v32  ;;  %v5135_v32 = vor.u32 %v7033_v20, %v5132_v23 }
 0x575   :  { %v6538_v30 = vld [vmem:[#allocation2 + $0xcc0] sm:$0xf]  ;;  %v6283_v38 = vor.u32 %v7325_v29, %v6282_v28  ;;  %3932 = vmatpush.bf16.msrb.mxu2 %v6027_v36  ;;  %v7225_v36 = vld [vmem:[#allocation2 + $0x7c4] sm:$0xf] }
 0x576   :  { %v7389_v31 = vld [vmem:[#allocation2 + $0xcdc] sm:$0xf0] }
 0x577   :  { %v5994_v39 = vld [vmem:[#allocation2 + $0x880] sm:$0xf]  ;;  %v6539_v42 = vor.u32 %v7389_v31, %v6538_v30  ;;  %3945 = vmatpush.bf16.msra.mxu0 %v6283_v38  ;;  %v5900_v38 = vld [vmem:[#allocation2 + $0x7e0] sm:$0xf0] }
 0x578   :  { %v6794_v40 = vld [vmem:[#allocation2 + $0xec0] sm:$0xf] }
 0x579   :  { %v7453_v41 = vld [vmem:[#allocation2 + $0xedc] sm:$0xf0]  ;;  %3958 = vmatpush.bf16.msra.mxu3 %v6539_v42  ;;  %v5100_v42 = vld [vmem:[#allocation2 + $0x1a0] sm:$0xf0] }
 0x57a   :  { %v7253_v43 = vld [vmem:[#allocation2 + $0x89c] sm:$0xf0]  ;;  %v6795_v56 = vor.u32 %v7453_v41, %v6794_v40  ;;  %v5647_v40 = vor.u32 %v7161_v25, %v5644_v26  ;;  %v7025_v41 = vld [vmem:[#allocation2 + $0x184] sm:$0xf] }
 0x57b   :  { %v6250_v46 = vld [vmem:[#allocation2 + $0xa80] sm:$0xf]  ;;  %v5995_v49 = vor.u32 %v7253_v43, %v5994_v39  ;;  %v5391_v39 = vor.u32 %v7097_v11, %v5388_v16  ;;  %v7089_v43 = vld [vmem:[#allocation2 + $0x384] sm:$0xf] }
 0x57c   :  { %v7317_v52 = vld [vmem:[#allocation2 + $0xa9c] sm:$0xf0]  ;;  %3971 = vmatpush.bf16.msra.mxu1 %v6795_v56  ;;  %v7838_v56 = vpack.c.bf16 %v764_v14, %v764_v14  ;;  %v7001_v11 = vld [vmem:[#allocation2 + $0xc4] sm:$0xf] }
 0x57d   :  { %v6506_v53 = vld [vmem:[#allocation2 + $0xc80] sm:$0xf]  ;;  %v6251_v57 = vor.u32 %v7317_v52, %v6250_v46  ;;  %3933 = vmatpush.bf16.msrb.mxu2 %v5995_v49  ;;  %v5356_v52 = vld [vmem:[#allocation2 + $0x3a0] sm:$0xf0]  ;;  %v5903_v49 = vor.u32 %v7225_v36, %v5900_v38 }
 0x57e   :  { %v7381_v54 = vld [vmem:[#allocation2 + $0xc9c] sm:$0xf0]  ;;  %v5359_v14 = vor.u32 %v7089_v43, %v5356_v52  ;;  %v7065_v16 = vld [vmem:[#allocation2 + $0x2c4] sm:$0xf] }
 0x57f   :  { %v5962_v58 = vld [vmem:[#allocation2 + $0x840] sm:$0xf]  ;;  %v6507_v48 = vor.u32 %v7381_v54, %v6506_v53  ;;  %3946 = vmatpush.bf16.msra.mxu0 %v6251_v57  ;;  %v7153_v53 = vld [vmem:[#allocation2 + $0x584] sm:$0xf]  ;;  %v7843_v57 = vpack.c.bf16 %v766_v15, %v766_v15 }
 0x580   :  { %v6762_v59 = vld [vmem:[#allocation2 + $0xe80] sm:$0xf]  ;;  %v5612_v54 = vld [vmem:[#allocation2 + $0x5a0] sm:$0xf0] }
 0x581   :  { %v7445_v60 = vld [vmem:[#allocation2 + $0xe9c] sm:$0xf0]  ;;  %3959 = vmatpush.bf16.msra.mxu3 %v6507_v48  ;;  %v5615_v48 = vor.u32 %v7153_v53, %v5612_v54  ;;  %v5324_v15 = vld [vmem:[#allocation2 + $0x360] sm:$0xf0] }
 0x582   :  { %v7245_v61 = vld [vmem:[#allocation2 + $0x85c] sm:$0xf0]  ;;  %v6763_v4 = vor.u32 %v7445_v60, %v6762_v59  ;;  %v7217_v59 = vld [vmem:[#allocation2 + $0x784] sm:$0xf] }
 0x583   :  { %v6218_v51 = vld [vmem:[#allocation2 + $0xa40] sm:$0xf]  ;;  %v5963_v7 = vor.u32 %v7245_v61, %v5962_v58  ;;  %v5103_v58 = vor.u32 %v7025_v41, %v5100_v42  ;;  %v5868_v60 = vld [vmem:[#allocation2 + $0x7a0] sm:$0xf0] }
 0x584   :  { %v7309_v62 = vld [vmem:[#allocation2 + $0xa5c] sm:$0xf0]  ;;  %3972 = vmatpush.bf16.msra.mxu1 %v6763_v4  ;;  %v7017_v61 = vld [vmem:[#allocation2 + $0x144] sm:$0xf]  ;;  %v5871_v1 = vor.u32 %v7217_v59, %v5868_v60 }
 0x585   :  { %v6474_v35 = vld [vmem:[#allocation2 + $0xc40] sm:$0xf]  ;;  %v6219_v8 = vor.u32 %v7309_v62, %v6218_v51  ;;  %3934 = vmatpush.bf16.msrb.mxu2 %v5963_v7  ;;  %v5068_v51 = vld [vmem:[#allocation2 + $0x160] sm:$0xf0] }
 0x586   :  { %v7373_v2 = vld [vmem:[#allocation2 + $0xc5c] sm:$0xf0]  ;;  %v7145_v62 = vld [vmem:[#allocation2 + $0x544] sm:$0xf] }
 0x587   :  { %v5930_v5 = vld [vmem:[#allocation2 + $0x800] sm:$0xf]  ;;  %v6475_v12 = vor.u32 %v7373_v2, %v6474_v35  ;;  %3947 = vmatpush.bf16.msra.mxu0 %v6219_v8  ;;  %v5580_v35 = vld [vmem:[#allocation2 + $0x560] sm:$0xf0]  ;;  %v5071_v2 = vor.u32 %v7017_v61, %v5068_v51 }
 0x588   :  { %v7237_v6 = vld [vmem:[#allocation2 + $0x81c] sm:$0xf0]  ;;  %v7209_v4 = vld [vmem:[#allocation2 + $0x744] sm:$0xf]  ;;  %v5583_v7 = vor.u32 %v7145_v62, %v5580_v35 }
 0x589   :  { %v6186_v9 = vld [vmem:[#allocation2 + $0xa00] sm:$0xf]  ;;  %v5931_v27 = vor.u32 %v7237_v6, %v5930_v5  ;;  %3960 = vmatpush.bf16.msra.mxu3 %v6475_v12  ;;  %v5836_v5 = vld [vmem:[#allocation2 + $0x760] sm:$0xf0]  ;;  %v5327_v6 = vor.u32 %v7081_v13, %v5324_v15 }
 0x58a   :  { %v6730_v34 = vld [vmem:[#allocation2 + $0xe40] sm:$0xf]  ;;  %v7009_v8 = vld [vmem:[#allocation2 + $0x104] sm:$0xf]  ;;  %v5839_v12 = vor.u32 %v7209_v4, %v5836_v5 }
 0x58b   :  { %v7437_v37 = vld [vmem:[#allocation2 + $0xe5c] sm:$0xf0]  ;;  %3935 = vmatpush.bf16.msrb.mxu2 %v5931_v27  ;;  %v5260_v25 = vld [vmem:[#allocation2 + $0x2e0] sm:$0xf0] }
 0x58c   :  { %v7301_v17 = vld [vmem:[#allocation2 + $0xa1c] sm:$0xf0]  ;;  %v6731_v24 = vor.u32 %v7437_v37, %v6730_v34  ;;  %v5292_v34 = vld [vmem:[#allocation2 + $0x320] sm:$0xf0] }
 0x58d   :  { %v6442_v18 = vld [vmem:[#allocation2 + $0xc00] sm:$0xf]  ;;  %v6187_v28 = vor.u32 %v7301_v17, %v6186_v9  ;;  %v5036_v9 = vld [vmem:[#allocation2 + $0x120] sm:$0xf0]  ;;  %v5295_v20 = vor.u32 %v7073_v0, %v5292_v34 }
 0x58e   :  { %v7365_v19 = vld [vmem:[#allocation2 + $0xc1c] sm:$0xf0]  ;;  %3973 = vmatpush.bf16.msra.mxu1 %v6731_v24  ;;  %3936 = vmatmul.bf16.vlgmr.msrb.gmra.mxu2 %v7838_v56  ;;  %v5548_v37 = vld [vmem:[#allocation2 + $0x520] sm:$0xf0]  ;;  %v5039_v17 = vor.u32 %v7009_v8, %v5036_v9 }
 0x58f   :  { %v6698_v29 = vld [vmem:[#allocation2 + $0xe00] sm:$0xf]  ;;  %v6443_v31 = vor.u32 %v7365_v19, %v6442_v18  ;;  %3948 = vmatpush.bf16.msra.mxu0 %v6187_v28  ;;  %3980 = vmatpush.bf16.msra.mxu2 %v5135_v32  ;;  %v7201_v18 = vld [vmem:[#allocation2 + $0x704] sm:$0xf]  ;;  %v5551_v23 = vor.u32 %v7137_v3, %v5548_v37  ;;  %v5263_v32 = vor.u32 %v7065_v16, %v5260_v25 }
 0x590   :  { %v7429_v30 = vld [vmem:[#allocation2 + $0xe1c] sm:$0xf0]  ;;  %v5804_v19 = vld [vmem:[#allocation2 + $0x720] sm:$0xf0] }
 0x591   :  { %v6699_v46 = vor.u32 %v7429_v30, %v6698_v29  ;;  %3961 = vmatpush.bf16.msra.mxu3 %v6443_v31  ;;  %v5004_v24 = vld [vmem:[#allocation2 + $0xe0] sm:$0xf0]  ;;  %v5807_v28 = vor.u32 %v7201_v18, %v5804_v19 }
 0x592   :  { %3949 = vmatmul.bf16.vlgmr.msra.gmra.mxu0 %v7848_v10  ;;  %v7129_v26 = vld [vmem:[#allocation2 + $0x4c4] sm:$0xf]  ;;  %v5007_v29 = vor.u32 %v7001_v11, %v5004_v24 }
 0x593   :  { %3993 = vmatpush.bf16.msrb.mxu0 %v5391_v39  ;;  %3974 = vmatpush.bf16.msra.mxu1 %v6699_v46  ;;  %v5516_v27 = vld [vmem:[#allocation2 + $0x4e0] sm:$0xf0] }
 0x594   :  { %3962 = vmatmul.bf16.vlgmr.msra.gmra.mxu3 %v7843_v57  ;;  %3981 = vmatpush.bf16.msra.mxu2 %v5103_v58  ;;  %v7193_v30 = vld [vmem:[#allocation2 + $0x6c4] sm:$0xf]  ;;  %v5519_v36 = vor.u32 %v7129_v26, %v5516_v27 }
 0x595   :  { %4006 = vmatpush.bf16.msrb.mxu3 %v5647_v40  ;;  %v5772_v31 = vld [vmem:[#allocation2 + $0x6e0] sm:$0xf0] }
 0x596   :  { %3975 = vmatmul.bf16.vlgmr.msra.gmra.mxu1 %v7854_v63  ;;  %v6993_v38 = vld [vmem:[#allocation2 + $0x84] sm:$0xf]  ;;  %v5775_v46 = vor.u32 %v7193_v30, %v5772_v31 }
 0x597   :  { %4019 = vmatpush.bf16.msrb.mxu1 %v5903_v49  ;;  %3994 = vmatpush.bf16.msrb.mxu0 %v5359_v14  ;;  %v4972_v39 = vld [vmem:[#allocation2 + $0xa0] sm:$0xf0] }
 0x598   :  { %3982 = vmatpush.bf16.msra.mxu2 %v5071_v2  ;;  %v7057_v40 = vld [vmem:[#allocation2 + $0x284] sm:$0xf]  ;;  %v4975_v52 = vor.u32 %v6993_v38, %v4972_v39 }
 0x599   :  { %4007 = vmatpush.bf16.msrb.mxu3 %v5615_v48  ;;  %v5228_v41 = vld [vmem:[#allocation2 + $0x2a0] sm:$0xf0] }
 0x59a   :  { %v7121_v42 = vld [vmem:[#allocation2 + $0x484] sm:$0xf]  ;;  %v5231_v49 = vor.u32 %v7057_v40, %v5228_v41 }
 0x59b   :  { %4020 = vmatpush.bf16.msrb.mxu1 %v5871_v1  ;;  %3995 = vmatpush.bf16.msrb.mxu0 %v5327_v6  ;;  %v5484_v43 = vld [vmem:[#allocation2 + $0x4a0] sm:$0xf0] }
 0x59c   :  { %3983 = vmatpush.bf16.msra.mxu2 %v5039_v17  ;;  %v7185_v53 = vld [vmem:[#allocation2 + $0x684] sm:$0xf]  ;;  %v5487_v58 = vor.u32 %v7121_v42, %v5484_v43 }
 0x59d   :  { %4008 = vmatpush.bf16.msrb.mxu3 %v5583_v7  ;;  %v5740_v54 = vld [vmem:[#allocation2 + $0x6a0] sm:$0xf0] }
 0x59e   :  { %v6985_v59 = vld [vmem:[#allocation2 + $0x44] sm:$0xf]  ;;  %v5743_v13 = vor.u32 %v7185_v53, %v5740_v54 }
 0x59f   :  { %4021 = vmatpush.bf16.msrb.mxu1 %v5839_v12  ;;  %3996 = vmatpush.bf16.msrb.mxu0 %v5295_v20  ;;  %v4940_v60 = vld [vmem:[#allocation2 + $0x60] sm:$0xf0] }
 0x5a0   :  { %3984 = vmatpush.bf16.msra.mxu2 %v5007_v29  ;;  %v7049_v14 = vld [vmem:[#allocation2 + $0x244] sm:$0xf]  ;;  %v4943_v62 = vor.u32 %v6985_v59, %v4940_v60 }
 0x5a1   :  { %4009 = vmatpush.bf16.msrb.mxu3 %v5551_v23  ;;  %v5196_v48 = vld [vmem:[#allocation2 + $0x260] sm:$0xf0] }
 0x5a2   :  { %v7113_v61 = vld [vmem:[#allocation2 + $0x444] sm:$0xf]  ;;  %v5199_v4 = vor.u32 %v7049_v14, %v5196_v48 }
 0x5a3   :  { %4022 = vmatpush.bf16.msrb.mxu1 %v5807_v28  ;;  %3997 = vmatpush.bf16.msrb.mxu0 %v5263_v32  ;;  %v5452_v51 = vld [vmem:[#allocation2 + $0x460] sm:$0xf0] }
 0x5a4   :  { %v6977_v15 = vld [vmem:[#allocation2 + $0x4] sm:$0xf]  ;;  %3985 = vmatpush.bf16.msra.mxu2 %v4975_v52  ;;  %v5455_v5 = vor.u32 %v7113_v61, %v5452_v51 }
 0x5a5   :  { %4010 = vmatpush.bf16.msrb.mxu3 %v5519_v36  ;;  %v4908_v35 = vld [vmem:[#allocation2 + $0x20] sm:$0xf0] }
 0x5a6   :  { %v7177_v1 = vld [vmem:[#allocation2 + $0x644] sm:$0xf]  ;;  %v4911_v18 = vor.u32 %v6977_v15, %v4908_v35 }
 0x5a7   :  { %4023 = vmatpush.bf16.msrb.mxu1 %v5775_v46  ;;  %v5708_v2 = vld [vmem:[#allocation2 + $0x660] sm:$0xf0]  ;;  %3998 = vmatpush.bf16.msrb.mxu0 %v5231_v49 }
 0x5a8   :  { %v7041_v6 = vld [vmem:[#allocation2 + $0x204] sm:$0xf]  ;;  %v5711_v3 = vor.u32 %v7177_v1, %v5708_v2  ;;  %3986 = vmatpush.bf16.msra.mxu2 %v4943_v62 }
 0x5a9   :  { %4011 = vmatpush.bf16.msrb.mxu3 %v5487_v58  ;;  %v5164_v7 = vld [vmem:[#allocation2 + $0x220] sm:$0xf0] }
 0x5aa   :  { %v7105_v8 = vld [vmem:[#allocation2 + $0x404] sm:$0xf]  ;;  %v5167_v11 = vor.u32 %v7041_v6, %v5164_v7 }
 0x5ab   :  { %v5420_v9 = vld [vmem:[#allocation2 + $0x420] sm:$0xf0]  ;;  %4024 = vmatpush.bf16.msrb.mxu1 %v5743_v13  ;;  %3999 = vmatpush.bf16.msrb.mxu0 %v5199_v4 }
 0x5ac   :  { %v7289_v0 = vld [vmem:[#allocation2 + $0x9c4] sm:$0xf]  ;;  %v5423_v24 = vor.u32 %v7105_v8, %v5420_v9  ;;  %3987 = vmatpush.bf16.msra.mxu2 %v4911_v18 }
 0x5ad   :  { %v6156_v34 = vld [vmem:[#allocation2 + $0x9e0] sm:$0xf0]  ;;  %4012 = vmatpush.bf16.msrb.mxu3 %v5455_v5 }
 0x5ae   :  { %v7353_v37 = vld [vmem:[#allocation2 + $0xbc4] sm:$0xf]  ;;  %v6159_v26 = vor.u32 %v7289_v0, %v6156_v34 }
 0x5af   :  { %v6412_v12 = vld [vmem:[#allocation2 + $0xbe0] sm:$0xf0]  ;;  %4025 = vmatpush.bf16.msrb.mxu1 %v5711_v3  ;;  %4000 = vmatpush.bf16.msrb.mxu0 %v5167_v11 }
 0x5b0   :  { %v7417_v17 = vld [vmem:[#allocation2 + $0xdc4] sm:$0xf]  ;;  %v6415_v27 = vor.u32 %v7353_v37, %v6412_v12  ;;  %4032 = vmatpush.bf16.msrb.mxu2 %v6159_v26 }
 0x5b1   :  { %v6668_v19 = vld [vmem:[#allocation2 + $0xde0] sm:$0xf0]  ;;  %4013 = vmatpush.bf16.msrb.mxu3 %v5423_v24  ;;  %3988 = vmatmul.bf16.vlgmr.msra.gmra.mxu2 %v7814_v50 }
 0x5b2   :  { %v7169_v20 = vld [vmem:[#allocation2 + $0x604] sm:$0xf]  ;;  %v6671_v29 = vor.u32 %v7417_v17, %v6668_v19  ;;  %4001 = vmatmul.bf16.vlgmr.msrb.gmra.mxu0 %v7824_v45 }
 0x5b3   :  { %v5676_v23 = vld [vmem:[#allocation2 + $0x620] sm:$0xf0]  ;;  %4045 = vmatpush.bf16.msra.mxu0 %v6415_v27 }
 0x5b4   :  { %v7481_v16 = vld [vmem:[#allocation2 + $0xfc4] sm:$0xf]  ;;  %v5679_v30 = vor.u32 %v7169_v20, %v5676_v23  ;;  %4014 = vmatmul.bf16.vlgmr.msrb.gmra.mxu3 %v7819_v55 }
 0x5b5   :  { %v6924_v25 = vld [vmem:[#allocation2 + $0xfe0] sm:$0xf0]  ;;  %4058 = vmatpush.bf16.msra.mxu3 %v6671_v29 }
 0x5b6   :  { %v7281_v28 = vld [vmem:[#allocation2 + $0x984] sm:$0xf]  ;;  %v6927_v40 = vor.u32 %v7481_v16, %v6924_v25  ;;  %4026 = vmatpush.bf16.msrb.mxu1 %v5679_v30 }
 0x5b7   :  { %v6124_v31 = vld [vmem:[#allocation2 + $0x9a0] sm:$0xf0] }
 0x5b8   :  { %v7345_v32 = vld [vmem:[#allocation2 + $0xb84] sm:$0xf]  ;;  %v6127_v43 = vor.u32 %v7281_v28, %v6124_v31 }
 0x5b9   :  { %v6380_v36 = vld [vmem:[#allocation2 + $0xba0] sm:$0xf0]  ;;  %4027 = vmatmul.bf16.vlgmr.msrb.gmra.mxu1 %v7830_v33 }
 0x5ba   :  { %v7409_v38 = vld [vmem:[#allocation2 + $0xd84] sm:$0xf]  ;;  %v6383_v46 = vor.u32 %v7345_v32, %v6380_v36  ;;  %4071 = vmatpush.bf16.msra.mxu1 %v6927_v40  ;;  %4033 = vmatpush.bf16.msrb.mxu2 %v6127_v43 }
 0x5bb   :  { %v6636_v39 = vld [vmem:[#allocation2 + $0xda0] sm:$0xf0] }
 0x5bc   :  { %v7473_v41 = vld [vmem:[#allocation2 + $0xf84] sm:$0xf]  ;;  %v6639_v53 = vor.u32 %v7409_v38, %v6636_v39  ;;  %4046 = vmatpush.bf16.msra.mxu0 %v6383_v46 }
 0x5bd   :  { %v6892_v42 = vld [vmem:[#allocation2 + $0xfa0] sm:$0xf0] }
 0x5be   :  { %v7273_v52 = vld [vmem:[#allocation2 + $0x944] sm:$0xf]  ;;  %v6895_v14 = vor.u32 %v7473_v41, %v6892_v42  ;;  %4059 = vmatpush.bf16.msra.mxu3 %v6639_v53 }
 0x5bf   :  { %v6092_v54 = vld [vmem:[#allocation2 + $0x960] sm:$0xf0] }
 0x5c0   :  { %v7337_v49 = vld [vmem:[#allocation2 + $0xb44] sm:$0xf]  ;;  %v6095_v51 = vor.u32 %v7273_v52, %v6092_v54  ;;  %4072 = vmatpush.bf16.msra.mxu1 %v6895_v14 }
 0x5c1   :  { %v6348_v58 = vld [vmem:[#allocation2 + $0xb60] sm:$0xf0] }
 0x5c2   :  { %v7401_v59 = vld [vmem:[#allocation2 + $0xd44] sm:$0xf]  ;;  %v6351_v13 = vor.u32 %v7337_v49, %v6348_v58  ;;  %4034 = vmatpush.bf16.msrb.mxu2 %v6095_v51 }
 0x5c3   :  { %v6604_v60 = vld [vmem:[#allocation2 + $0xd60] sm:$0xf0] }
 0x5c4   :  { %v7465_v48 = vld [vmem:[#allocation2 + $0xf44] sm:$0xf]  ;;  %v6607_v62 = vor.u32 %v7401_v59, %v6604_v60  ;;  %4047 = vmatpush.bf16.msra.mxu0 %v6351_v13 }
 0x5c5   :  { %v6860_v61 = vld [vmem:[#allocation2 + $0xf60] sm:$0xf0] }
 0x5c6   :  { %v7265_v15 = vld [vmem:[#allocation2 + $0x904] sm:$0xf]  ;;  %v6863_v6 = vor.u32 %v7465_v48, %v6860_v61  ;;  %4060 = vmatpush.bf16.msra.mxu3 %v6607_v62 }
 0x5c7   :  { %v6060_v35 = vld [vmem:[#allocation2 + $0x920] sm:$0xf0] }
 0x5c8   :  { %v7329_v1 = vld [vmem:[#allocation2 + $0xb04] sm:$0xf]  ;;  %v6063_v9 = vor.u32 %v7265_v15, %v6060_v35  ;;  %4073 = vmatpush.bf16.msra.mxu1 %v6863_v6  ;;  %v7102_v6 = vld [vmem:[#allocation2 + $0x3e4] sm:$0xf0] }
 0x5c9   :  { %v6316_v2 = vld [vmem:[#allocation2 + $0xb20] sm:$0xf0] }
 0x5ca   :  { %v7393_v4 = vld [vmem:[#allocation2 + $0xd04] sm:$0xf]  ;;  %v6319_v0 = vor.u32 %v7329_v1, %v6316_v2  ;;  %4035 = vmatpush.bf16.msrb.mxu2 %v6063_v9  ;;  %v5138_v2 = vld [vmem:[#allocation2 + $0x1c8] sm:$0xf] }
 0x5cb   :  { %v6572_v5 = vld [vmem:[#allocation2 + $0xd20] sm:$0xf0] }
 0x5cc   :  { %v7457_v7 = vld [vmem:[#allocation2 + $0xf04] sm:$0xf]  ;;  %v6575_v3 = vor.u32 %v7393_v4, %v6572_v5  ;;  %4048 = vmatpush.bf16.msra.mxu0 %v6319_v0  ;;  %v7038_v4 = vld [vmem:[#allocation2 + $0x1e4] sm:$0xf0] }
 0x5cd   :  { %v6828_v8 = vld [vmem:[#allocation2 + $0xf20] sm:$0xf0]  ;;  %v5394_v5 = vld [vmem:[#allocation2 + $0x3c8] sm:$0xf] }
 0x5ce   :  { %v7257_v34 = vld [vmem:[#allocation2 + $0x8c4] sm:$0xf]  ;;  %v6831_v20 = vor.u32 %v7457_v7, %v6828_v8  ;;  %4061 = vmatpush.bf16.msra.mxu3 %v6575_v3  ;;  %v5650_v7 = vld [vmem:[#allocation2 + $0x5c8] sm:$0xf] }
 0x5cf   :  { %v6028_v37 = vld [vmem:[#allocation2 + $0x8e0] sm:$0xf0]  ;;  %v7166_v8 = vld [vmem:[#allocation2 + $0x5e4] sm:$0xf0] }
 0x5d0   :  { %v7321_v12 = vld [vmem:[#allocation2 + $0xac4] sm:$0xf]  ;;  %v6031_v24 = vor.u32 %v7257_v34, %v6028_v37  ;;  %4074 = vmatpush.bf16.msra.mxu1 %v6831_v20  ;;  %v5651_v20 = vor.u32 %v7166_v8, %v5650_v7  ;;  %v7070_v7 = vld [vmem:[#allocation2 + $0x2e4] sm:$0xf0] }
 0x5d1   :  { %v6284_v17 = vld [vmem:[#allocation2 + $0xae0] sm:$0xf0]  ;;  %v5522_v8 = vld [vmem:[#allocation2 + $0x4c8] sm:$0xf] }
 0x5d2   :  { %v7385_v18 = vld [vmem:[#allocation2 + $0xcc4] sm:$0xf]  ;;  %v6287_v16 = vor.u32 %v7321_v12, %v6284_v17  ;;  %4036 = vmatpush.bf16.msrb.mxu2 %v6031_v24  ;;  %v5139_v12 = vor.u32 %v7038_v4, %v5138_v2  ;;  %v5906_v17 = vld [vmem:[#allocation2 + $0x7c8] sm:$0xf] }
 0x5d3   :  { %v6540_v19 = vld [vmem:[#allocation2 + $0xce0] sm:$0xf0]  ;;  %v5362_v24 = vld [vmem:[#allocation2 + $0x388] sm:$0xf] }
 0x5d4   :  { %v7449_v23 = vld [vmem:[#allocation2 + $0xec4] sm:$0xf]  ;;  %v6543_v26 = vor.u32 %v7385_v18, %v6540_v19  ;;  %4049 = vmatpush.bf16.msra.mxu0 %v6287_v16  ;;  %v7230_v18 = vld [vmem:[#allocation2 + $0x7e4] sm:$0xf0]  ;;  %v5395_v19 = vor.u32 %v7102_v6, %v5394_v5 }
 0x5d5   :  { %v6796_v11 = vld [vmem:[#allocation2 + $0xee0] sm:$0xf0]  ;;  %v5010_v4 = vld [vmem:[#allocation2 + $0xc8] sm:$0xf] }
 0x5d6   :  { %v7249_v25 = vld [vmem:[#allocation2 + $0x884] sm:$0xf]  ;;  %v6799_v32 = vor.u32 %v7449_v23, %v6796_v11  ;;  %4062 = vmatpush.bf16.msra.mxu3 %v6543_v26  ;;  %v5106_v23 = vld [vmem:[#allocation2 + $0x188] sm:$0xf] }
 0x5d7   :  { %v5996_v27 = vld [vmem:[#allocation2 + $0x8a0] sm:$0xf0]  ;;  %v7030_v11 = vld [vmem:[#allocation2 + $0x1a4] sm:$0xf0] }
 0x5d8   :  { %v7313_v28 = vld [vmem:[#allocation2 + $0xa84] sm:$0xf]  ;;  %v5999_v39 = vor.u32 %v7249_v25, %v5996_v27  ;;  %4075 = vmatpush.bf16.msra.mxu1 %v6799_v32  ;;  %v7094_v25 = vld [vmem:[#allocation2 + $0x3a4] sm:$0xf0] }
 0x5d9   :  { %v6252_v29 = vld [vmem:[#allocation2 + $0xaa0] sm:$0xf0]  ;;  %v5618_v26 = vld [vmem:[#allocation2 + $0x588] sm:$0xf]  ;;  %v5363_v32 = vor.u32 %v7094_v25, %v5362_v24 }
 0x5da   :  { %v7377_v30 = vld [vmem:[#allocation2 + $0xc84] sm:$0xf]  ;;  %v6255_v40 = vor.u32 %v7313_v28, %v6252_v29  ;;  %4037 = vmatpush.bf16.msrb.mxu2 %v5999_v39  ;;  %v7158_v27 = vld [vmem:[#allocation2 + $0x5a4] sm:$0xf0]  ;;  %v5907_v28 = vor.u32 %v7230_v18, %v5906_v17  ;;  %v5107_v29 = vor.u32 %v7030_v11, %v5106_v23 }
 0x5db   :  { %v6508_v31 = vld [vmem:[#allocation2 + $0xca0] sm:$0xf0]  ;;  %v7022_v39 = vld [vmem:[#allocation2 + $0x164] sm:$0xf0] }
 0x5dc   :  { %v7441_v36 = vld [vmem:[#allocation2 + $0xe84] sm:$0xf]  ;;  %v6511_v42 = vor.u32 %v7377_v30, %v6508_v31  ;;  %4050 = vmatpush.bf16.msra.mxu0 %v6255_v40  ;;  %v5874_v30 = vld [vmem:[#allocation2 + $0x788] sm:$0xf] }
 0x5dd   :  { %v6764_v38 = vld [vmem:[#allocation2 + $0xea0] sm:$0xf0]  ;;  %v7222_v31 = vld [vmem:[#allocation2 + $0x7a4] sm:$0xf0] }
 0x5de   :  { %v7241_v41 = vld [vmem:[#allocation2 + $0x844] sm:$0xf]  ;;  %v6767_v49 = vor.u32 %v7441_v36, %v6764_v38  ;;  %4063 = vmatpush.bf16.msra.mxu3 %v6511_v42  ;;  %v5619_v36 = vor.u32 %v7158_v27, %v5618_v26  ;;  %v5074_v38 = vld [vmem:[#allocation2 + $0x148] sm:$0xf] }
 0x5df   :  { %v5964_v43 = vld [vmem:[#allocation2 + $0x860] sm:$0xf0]  ;;  %v5330_v40 = vld [vmem:[#allocation2 + $0x348] sm:$0xf] }
 0x5e0   :  { %v7305_v46 = vld [vmem:[#allocation2 + $0xa44] sm:$0xf]  ;;  %v5967_v60 = vor.u32 %v7241_v41, %v5964_v43  ;;  %4076 = vmatpush.bf16.msra.mxu1 %v6767_v49  ;;  %v7086_v41 = vld [vmem:[#allocation2 + $0x364] sm:$0xf0] }
 0x5e1   :  { %v6220_v52 = vld [vmem:[#allocation2 + $0xa60] sm:$0xf0]  ;;  %v5586_v42 = vld [vmem:[#allocation2 + $0x548] sm:$0xf]  ;;  %v5331_v49 = vor.u32 %v7086_v41, %v5330_v40 }
 0x5e2   :  { %v7369_v53 = vld [vmem:[#allocation2 + $0xc44] sm:$0xf]  ;;  %v6223_v14 = vor.u32 %v7305_v46, %v6220_v52  ;;  %4038 = vmatpush.bf16.msrb.mxu2 %v5967_v60  ;;  %v7150_v43 = vld [vmem:[#allocation2 + $0x564] sm:$0xf0]  ;;  %v5875_v46 = vor.u32 %v7222_v31, %v5874_v30  ;;  %v5075_v52 = vor.u32 %v7022_v39, %v5074_v38 }
 0x5e3   :  { %v6476_v54 = vld [vmem:[#allocation2 + $0xc60] sm:$0xf0]  ;;  %v7014_v60 = vld [vmem:[#allocation2 + $0x124] sm:$0xf0] }
 0x5e4   :  { %v7433_v58 = vld [vmem:[#allocation2 + $0xe44] sm:$0xf]  ;;  %v6479_v13 = vor.u32 %v7369_v53, %v6476_v54  ;;  %4051 = vmatpush.bf16.msra.mxu0 %v6223_v14  ;;  %v5842_v53 = vld [vmem:[#allocation2 + $0x748] sm:$0xf] }
 0x5e5   :  { %v6732_v59 = vld [vmem:[#allocation2 + $0xe60] sm:$0xf0]  ;;  %v7214_v54 = vld [vmem:[#allocation2 + $0x764] sm:$0xf0] }
 0x5e6   :  { %v7233_v48 = vld [vmem:[#allocation2 + $0x804] sm:$0xf]  ;;  %v6735_v1 = vor.u32 %v7433_v58, %v6732_v59  ;;  %4064 = vmatpush.bf16.msra.mxu3 %v6479_v13  ;;  %v5587_v58 = vor.u32 %v7150_v43, %v5586_v42  ;;  %v5042_v59 = vld [vmem:[#allocation2 + $0x108] sm:$0xf]  ;;  %v5843_v13 = vor.u32 %v7214_v54, %v5842_v53 }
 0x5e7   :  { %v5932_v61 = vld [vmem:[#allocation2 + $0x820] sm:$0xf0]  ;;  %v5298_v14 = vld [vmem:[#allocation2 + $0x308] sm:$0xf] }
 0x5e8   :  { %v7297_v51 = vld [vmem:[#allocation2 + $0xa04] sm:$0xf]  ;;  %v5935_v9 = vor.u32 %v7233_v48, %v5932_v61  ;;  %4077 = vmatpush.bf16.msra.mxu1 %v6735_v1  ;;  %v7078_v48 = vld [vmem:[#allocation2 + $0x324] sm:$0xf0] }
 0x5e9   :  { %v6188_v15 = vld [vmem:[#allocation2 + $0xa20] sm:$0xf0]  ;;  %v5554_v61 = vld [vmem:[#allocation2 + $0x508] sm:$0xf]  ;;  %v5299_v1 = vor.u32 %v7078_v48, %v5298_v14 }
 0x5ea   :  { %v7361_v62 = vld [vmem:[#allocation2 + $0xc04] sm:$0xf]  ;;  %v6191_v0 = vor.u32 %v7297_v51, %v6188_v15  ;;  %4039 = vmatpush.bf16.msrb.mxu2 %v5935_v9  ;;  %v7142_v51 = vld [vmem:[#allocation2 + $0x524] sm:$0xf0]  ;;  %v5043_v15 = vor.u32 %v7014_v60, %v5042_v59 }
 0x5eb   :  { %v6444_v35 = vld [vmem:[#allocation2 + $0xc20] sm:$0xf0]  ;;  %v5555_v2 = vor.u32 %v7142_v51, %v5554_v61  ;;  %v7006_v5 = vld [vmem:[#allocation2 + $0xe4] sm:$0xf0] }
 0x5ec   :  { %v7425_v34 = vld [vmem:[#allocation2 + $0xe04] sm:$0xf]  ;;  %v6447_v37 = vor.u32 %v7361_v62, %v6444_v35  ;;  %4052 = vmatpush.bf16.msra.mxu0 %v6191_v0  ;;  %v5810_v62 = vld [vmem:[#allocation2 + $0x708] sm:$0xf] }
 0x5ed   :  { %v6700_v3 = vld [vmem:[#allocation2 + $0xe20] sm:$0xf0]  ;;  %4040 = vmatmul.bf16.vlgmr.msrb.gmra.mxu2 %v7838_v56  ;;  %v7206_v35 = vld [vmem:[#allocation2 + $0x724] sm:$0xf0] }
 0x5ee   :  { %v6703_v16 = vor.u32 %v7425_v34, %v6700_v3  ;;  %4065 = vmatpush.bf16.msra.mxu3 %v6447_v37  ;;  %4084 = vmatpush.bf16.msra.mxu2 %v5139_v12  ;;  %v5266_v6 = vld [vmem:[#allocation2 + $0x2c8] sm:$0xf]  ;;  %v5811_v0 = vor.u32 %v7206_v35, %v5810_v62  ;;  %v5011_v34 = vor.u32 %v7006_v5, %v5010_v4 }
 0x5ef   :  { %4053 = vmatmul.bf16.vlgmr.msra.gmra.mxu0 %v7848_v10  ;;  %v7134_v9 = vld [vmem:[#allocation2 + $0x4e4] sm:$0xf0]  ;;  %v5267_v12 = vor.u32 %v7070_v7, %v5266_v6 }
 0x5f0   :  { %4097 = vmatpush.bf16.msrb.mxu0 %v5395_v19  ;;  %4078 = vmatpush.bf16.msra.mxu1 %v6703_v16  ;;  %v5778_v3 = vld [vmem:[#allocation2 + $0x6c8] sm:$0xf]  ;;  %v5523_v17 = vor.u32 %v7134_v9, %v5522_v8 }
 0x5f1   :  { %4066 = vmatmul.bf16.vlgmr.msra.gmra.mxu3 %v7843_v57  ;;  %v7198_v37 = vld [vmem:[#allocation2 + $0x6e4] sm:$0xf0] }
 0x5f2   :  { %4110 = vmatpush.bf16.msrb.mxu3 %v5651_v20  ;;  %4085 = vmatpush.bf16.msra.mxu2 %v5107_v29  ;;  %v4978_v18 = vld [vmem:[#allocation2 + $0x88] sm:$0xf]  ;;  %v5779_v16 = vor.u32 %v7198_v37, %v5778_v3 }
 0x5f3   :  { %4079 = vmatmul.bf16.vlgmr.msra.gmra.mxu1 %v7854_v63  ;;  %v6998_v19 = vld [vmem:[#allocation2 + $0xa4] sm:$0xf0] }
 0x5f4   :  { %4123 = vmatpush.bf16.msrb.mxu1 %v5907_v28  ;;  %4098 = vmatpush.bf16.msrb.mxu0 %v5363_v32  ;;  %v5234_v20 = vld [vmem:[#allocation2 + $0x288] sm:$0xf]  ;;  %v4979_v25 = vor.u32 %v6998_v19, %v4978_v18 }
 0x5f5   :  { %v7062_v23 = vld [vmem:[#allocation2 + $0x2a4] sm:$0xf0] }
 0x5f6   :  { %4111 = vmatpush.bf16.msrb.mxu3 %v5619_v36  ;;  %4086 = vmatpush.bf16.msra.mxu2 %v5075_v52  ;;  %v5490_v11 = vld [vmem:[#allocation2 + $0x488] sm:$0xf]  ;;  %v5235_v28 = vor.u32 %v7062_v23, %v5234_v20 }
 0x5f7   :  { %v7126_v24 = vld [vmem:[#allocation2 + $0x4a4] sm:$0xf0] }
 0x5f8   :  { %4124 = vmatpush.bf16.msrb.mxu1 %v5875_v46  ;;  %4099 = vmatpush.bf16.msrb.mxu0 %v5331_v49  ;;  %v5746_v26 = vld [vmem:[#allocation2 + $0x688] sm:$0xf]  ;;  %v5491_v29 = vor.u32 %v7126_v24, %v5490_v11 }
 0x5f9   :  { %v7190_v27 = vld [vmem:[#allocation2 + $0x6a4] sm:$0xf0] }
 0x5fa   :  { %4112 = vmatpush.bf16.msrb.mxu3 %v5587_v58  ;;  %4087 = vmatpush.bf16.msra.mxu2 %v5043_v15  ;;  %v4946_v30 = vld [vmem:[#allocation2 + $0x48] sm:$0xf]  ;;  %v5747_v40 = vor.u32 %v7190_v27, %v5746_v26 }
 0x5fb   :  { %v6990_v31 = vld [vmem:[#allocation2 + $0x64] sm:$0xf0] }
 0x5fc   :  { %4125 = vmatpush.bf16.msrb.mxu1 %v5843_v13  ;;  %4100 = vmatpush.bf16.msrb.mxu0 %v5299_v1  ;;  %v5202_v32 = vld [vmem:[#allocation2 + $0x248] sm:$0xf]  ;;  %v4947_v42 = vor.u32 %v6990_v31, %v4946_v30 }
 0x5fd   :  { %v7054_v36 = vld [vmem:[#allocation2 + $0x264] sm:$0xf0] }
 0x5fe   :  { %4113 = vmatpush.bf16.msrb.mxu3 %v5555_v2  ;;  %4088 = vmatpush.bf16.msra.mxu2 %v5011_v34  ;;  %v5458_v38 = vld [vmem:[#allocation2 + $0x448] sm:$0xf]  ;;  %v5203_v53 = vor.u32 %v7054_v36, %v5202_v32 }
 0x5ff   :  { %v7118_v39 = vld [vmem:[#allocation2 + $0x464] sm:$0xf0] }
 0x600   :  { %4126 = vmatpush.bf16.msrb.mxu1 %v5811_v0  ;;  %4101 = vmatpush.bf16.msrb.mxu0 %v5267_v12  ;;  %v4914_v41 = vld [vmem:[#allocation2 + $0x8] sm:$0xf]  ;;  %v5459_v54 = vor.u32 %v7118_v39, %v5458_v38 }
 0x601   :  { %v6982_v43 = vld [vmem:[#allocation2 + $0x24] sm:$0xf0] }
 0x602   :  { %4114 = vmatpush.bf16.msrb.mxu3 %v5523_v17  ;;  %4089 = vmatpush.bf16.msra.mxu2 %v4979_v25  ;;  %v5714_v46 = vld [vmem:[#allocation2 + $0x648] sm:$0xf]  ;;  %v4915_v62 = vor.u32 %v6982_v43, %v4914_v41 }
 0x603   :  { %v7182_v52 = vld [vmem:[#allocation2 + $0x664] sm:$0xf0] }
 0x604   :  { %4127 = vmatpush.bf16.msrb.mxu1 %v5779_v16  ;;  %4102 = vmatpush.bf16.msrb.mxu0 %v5235_v28  ;;  %v5170_v49 = vld [vmem:[#allocation2 + $0x208] sm:$0xf]  ;;  %v5715_v61 = vor.u32 %v7182_v52, %v5714_v46 }
 0x605   :  { %v7046_v58 = vld [vmem:[#allocation2 + $0x224] sm:$0xf0] }
 0x606   :  { %4115 = vmatpush.bf16.msrb.mxu3 %v5491_v29  ;;  %v5426_v59 = vld [vmem:[#allocation2 + $0x408] sm:$0xf]  ;;  %4090 = vmatpush.bf16.msra.mxu2 %v4947_v42  ;;  %v5171_v4 = vor.u32 %v7046_v58, %v5170_v49 }
 0x607   :  { %v7110_v60 = vld [vmem:[#allocation2 + $0x424] sm:$0xf0] }
 0x608   :  { %v6162_v14 = vld [vmem:[#allocation2 + $0x9c8] sm:$0xf]  ;;  %4128 = vmatpush.bf16.msrb.mxu1 %v5747_v40  ;;  %4103 = vmatpush.bf16.msrb.mxu0 %v5203_v53  ;;  %v5427_v5 = vor.u32 %v7110_v60, %v5426_v59  ;;  %v1292_v60 = vperm.slane %v7770_v21, 1 }
 0x609   :  { %v7294_v48 = vld [vmem:[#allocation2 + $0x9e4] sm:$0xf0] }
 0x60a   :  { %v6418_v51 = vld [vmem:[#allocation2 + $0xbc8] sm:$0xf]  ;;  %4116 = vmatpush.bf16.msrb.mxu3 %v5459_v54  ;;  %v6163_v8 = vor.u32 %v7294_v48, %v6162_v14  ;;  %4091 = vmatpush.bf16.msra.mxu2 %v4915_v62 }
 0x60b   :  { %v7358_v13 = vld [vmem:[#allocation2 + $0xbe4] sm:$0xf0] }
 0x60c   :  { %v6674_v15 = vld [vmem:[#allocation2 + $0xdc8] sm:$0xf]  ;;  %v6419_v9 = vor.u32 %v7358_v13, %v6418_v51  ;;  %4129 = vmatpush.bf16.msrb.mxu1 %v5715_v61  ;;  %4104 = vmatpush.bf16.msrb.mxu0 %v5171_v4  ;;  %v3898_v4 = vpop.f32.mrf.mxu0 }
 0x60d   :  { %v7422_v35 = vld [vmem:[#allocation2 + $0xde4] sm:$0xf0]  ;;  %4092 = vmatmul.bf16.vlgmr.msra.gmra.mxu2 %v7814_v50 }
 0x60e   :  { %v5682_v1 = vld [vmem:[#allocation2 + $0x608] sm:$0xf]  ;;  %v6675_v34 = vor.u32 %v7422_v35, %v6674_v15  ;;  %4117 = vmatpush.bf16.msrb.mxu3 %v5427_v5  ;;  %4136 = vmatpush.bf16.msrb.mxu2 %v6163_v8 }
 0x60f   :  { %v7174_v2 = vld [vmem:[#allocation2 + $0x624] sm:$0xf0]  ;;  %4105 = vmatmul.bf16.vlgmr.msrb.gmra.mxu0 %v7824_v45 }
 0x610   :  { %v6930_v6 = vld [vmem:[#allocation2 + $0xfc8] sm:$0xf]  ;;  %v5683_v3 = vor.u32 %v7174_v2, %v5682_v1  ;;  %4149 = vmatpush.bf16.msra.mxu0 %v6419_v9 }
 0x611   :  { %v7486_v7 = vld [vmem:[#allocation2 + $0xfe4] sm:$0xf0]  ;;  %4118 = vmatmul.bf16.vlgmr.msrb.gmra.mxu3 %v7819_v55 }
 0x612   :  { %v6130_v0 = vld [vmem:[#allocation2 + $0x988] sm:$0xf]  ;;  %v6931_v20 = vor.u32 %v7486_v7, %v6930_v6  ;;  %4162 = vmatpush.bf16.msra.mxu3 %v6675_v34  ;;  %4130 = vmatpush.bf16.msrb.mxu1 %v5683_v3  ;;  %v1308_v7 = vperm.slane %v1292_v60, 1  ;;  %v3924_v34 = vpop.f32.mrf.mxu1 }
 0x613   :  { %v7286_v37 = vld [vmem:[#allocation2 + $0x9a4] sm:$0xf0] }
 0x614   :  { %v6386_v12 = vld [vmem:[#allocation2 + $0xb88] sm:$0xf]  ;;  %v6131_v24 = vor.u32 %v7286_v37, %v6130_v0 }
 0x615   :  { %v7350_v17 = vld [vmem:[#allocation2 + $0xba4] sm:$0xf0]  ;;  %4131 = vmatmul.bf16.vlgmr.msrb.gmra.mxu1 %v7830_v33 }
 0x616   :  { %v6642_v18 = vld [vmem:[#allocation2 + $0xd88] sm:$0xf]  ;;  %v6387_v16 = vor.u32 %v7350_v17, %v6386_v12  ;;  %4175 = vmatpush.bf16.msra.mxu1 %v6931_v20  ;;  %4137 = vmatpush.bf16.msrb.mxu2 %v6131_v24 }
 0x617   :  { %v7414_v19 = vld [vmem:[#allocation2 + $0xda4] sm:$0xf0] }
 0x618   :  { %v6898_v23 = vld [vmem:[#allocation2 + $0xf88] sm:$0xf]  ;;  %v6643_v26 = vor.u32 %v7414_v19, %v6642_v18  ;;  %4150 = vmatpush.bf16.msra.mxu0 %v6387_v16 }
 0x619   :  { %v7478_v11 = vld [vmem:[#allocation2 + $0xfa4] sm:$0xf0] }
 0x61a   :  { %v6098_v25 = vld [vmem:[#allocation2 + $0x948] sm:$0xf]  ;;  %v6899_v32 = vor.u32 %v7478_v11, %v6898_v23  ;;  %4163 = vmatpush.bf16.msra.mxu3 %v6643_v26  ;;  %v3885_v23 = vpop.f32.mrf.mxu2 }
 0x61b   :  { %v7278_v27 = vld [vmem:[#allocation2 + $0x964] sm:$0xf0]  ;;  %v3886_v16 = vadd.f32 %v3885_v23, %v1308_v7  ;;  %v7090_v23 = vld [vmem:[#allocation2 + $0x38c] sm:$0xf] }
 0x61c   :  { %v6354_v28 = vld [vmem:[#allocation2 + $0xb48] sm:$0xf]  ;;  %v6099_v39 = vor.u32 %v7278_v27, %v6098_v25  ;;  %4176 = vmatpush.bf16.msra.mxu1 %v6899_v32  ;;  %v3911_v25 = vpop.f32.mrf.mxu3 }
 0x61d   :  { %v7342_v29 = vld [vmem:[#allocation2 + $0xb64] sm:$0xf0] }
 0x61e   :  { %v6610_v30 = vld [vmem:[#allocation2 + $0xd48] sm:$0xf]  ;;  %v6355_v40 = vor.u32 %v7342_v29, %v6354_v28  ;;  %4138 = vmatpush.bf16.msrb.mxu2 %v6099_v39 }
 0x61f   :  { %v7406_v31 = vld [vmem:[#allocation2 + $0xd64] sm:$0xf0] }
 0x620   :  { %v6866_v36 = vld [vmem:[#allocation2 + $0xf48] sm:$0xf]  ;;  %v6611_v42 = vor.u32 %v7406_v31, %v6610_v30  ;;  %4151 = vmatpush.bf16.msra.mxu0 %v6355_v40 }
 0x621   :  { %v7470_v38 = vld [vmem:[#allocation2 + $0xf64] sm:$0xf0] }
 0x622   :  { %v6066_v41 = vld [vmem:[#allocation2 + $0x908] sm:$0xf]  ;;  %v6867_v49 = vor.u32 %v7470_v38, %v6866_v36  ;;  %4164 = vmatpush.bf16.msra.mxu3 %v6611_v42  ;;  %v3899_v36 = vadd.f32 %v3898_v4, %v3886_v16  ;;  %v7162_v4 = vld [vmem:[#allocation2 + $0x5cc] sm:$0xf] }
 0x623   :  { %v7270_v43 = vld [vmem:[#allocation2 + $0x924] sm:$0xf0]  ;;  %v7154_v16 = vld [vmem:[#allocation2 + $0x58c] sm:$0xf] }
 0x624   :  { %v6322_v46 = vld [vmem:[#allocation2 + $0xb08] sm:$0xf]  ;;  %v6067_v14 = vor.u32 %v7270_v43, %v6066_v41  ;;  %4177 = vmatpush.bf16.msra.mxu1 %v6867_v49  ;;  %v3900_v41 = vpop.f32.mrf.mxu0 }
 0x625   :  { %v7334_v52 = vld [vmem:[#allocation2 + $0xb24] sm:$0xf0]  ;;  %v5588_v41 = vld [vmem:[#allocation2 + $0x568] sm:$0xf0] }
 0x626   :  { %v6578_v53 = vld [vmem:[#allocation2 + $0xd08] sm:$0xf]  ;;  %v6323_v48 = vor.u32 %v7334_v52, %v6322_v46  ;;  %4139 = vmatpush.bf16.msrb.mxu2 %v6067_v14  ;;  %v3912_v46 = vadd.f32 %v3911_v25, %v3899_v36  ;;  %v5620_v25 = vld [vmem:[#allocation2 + $0x5a8] sm:$0xf0] }
 0x627   :  { %v7398_v54 = vld [vmem:[#allocation2 + $0xd24] sm:$0xf0]  ;;  %v5076_v36 = vld [vmem:[#allocation2 + $0x168] sm:$0xf0] }
 0x628   :  { %v6834_v58 = vld [vmem:[#allocation2 + $0xf08] sm:$0xf]  ;;  %v6579_v51 = vor.u32 %v7398_v54, %v6578_v53  ;;  %4152 = vmatpush.bf16.msra.mxu0 %v6323_v48 }
 0x629   :  { %v7462_v59 = vld [vmem:[#allocation2 + $0xf24] sm:$0xf0] }
 0x62a   :  { %v6034_v61 = vld [vmem:[#allocation2 + $0x8c8] sm:$0xf]  ;;  %v6835_v2 = vor.u32 %v7462_v59, %v6834_v58  ;;  %4165 = vmatpush.bf16.msra.mxu3 %v6579_v51  ;;  %v3926_v59 = vpop.f32.mrf.mxu1  ;;  %v7872_v51 = vadd.f32 %v3924_v34, %v3912_v46  ;;  %v7210_v46 = vld [vmem:[#allocation2 + $0x74c] sm:$0xf] }
 0x62b   :  { %v7262_v13 = vld [vmem:[#allocation2 + $0x8e4] sm:$0xf0]  ;;  %v7074_v59 = vld [vmem:[#allocation2 + $0x30c] sm:$0xf] }
 0x62c   :  { %v6290_v15 = vld [vmem:[#allocation2 + $0xac8] sm:$0xf]  ;;  %v6035_v8 = vor.u32 %v7262_v13, %v6034_v61  ;;  %4178 = vmatpush.bf16.msra.mxu1 %v6835_v2  ;;  %v5396_v2 = vld [vmem:[#allocation2 + $0x3e8] sm:$0xf0] }
 0x62d   :  { %v7326_v62 = vld [vmem:[#allocation2 + $0xae4] sm:$0xf0] }
 0x62e   :  { %v6546_v35 = vld [vmem:[#allocation2 + $0xcc8] sm:$0xf]  ;;  %v6291_v9 = vor.u32 %v7326_v62, %v6290_v15  ;;  %4140 = vmatpush.bf16.msrb.mxu2 %v6035_v8  ;;  %v7034_v15 = vld [vmem:[#allocation2 + $0x1cc] sm:$0xf] }
 0x62f   :  { %v7390_v1 = vld [vmem:[#allocation2 + $0xce4] sm:$0xf0]  ;;  %v5140_v62 = vld [vmem:[#allocation2 + $0x1e8] sm:$0xf0] }
 0x630   :  { %v6802_v5 = vld [vmem:[#allocation2 + $0xec8] sm:$0xf]  ;;  %v6547_v3 = vor.u32 %v7390_v1, %v6546_v35  ;;  %4153 = vmatpush.bf16.msra.mxu0 %v6291_v9  ;;  %v7098_v35 = vld [vmem:[#allocation2 + $0x3cc] sm:$0xf]  ;;  %v3887_v1 = vpop.f32.mrf.mxu2  ;;  %v5143_v34 = vor.u32 %v7034_v15, %v5140_v62 }
 0x631   :  { %v7454_v6 = vld [vmem:[#allocation2 + $0xee4] sm:$0xf0]  ;;  %v7202_v15 = vld [vmem:[#allocation2 + $0x70c] sm:$0xf] }
 0x632   :  { %v6002_v0 = vld [vmem:[#allocation2 + $0x888] sm:$0xf]  ;;  %v6803_v20 = vor.u32 %v7454_v6, %v6802_v5  ;;  %4166 = vmatpush.bf16.msra.mxu3 %v6547_v3  ;;  %v5652_v5 = vld [vmem:[#allocation2 + $0x5e8] sm:$0xf0]  ;;  %v3913_v6 = vpop.f32.mrf.mxu3 }
 0x633   :  { %v7254_v37 = vld [vmem:[#allocation2 + $0x8a4] sm:$0xf0]  ;;  %v5812_v62 = vld [vmem:[#allocation2 + $0x728] sm:$0xf0] }
 0x634   :  { %v6258_v12 = vld [vmem:[#allocation2 + $0xa88] sm:$0xf]  ;;  %v6003_v26 = vor.u32 %v7254_v37, %v6002_v0  ;;  %4179 = vmatpush.bf16.msra.mxu1 %v6803_v20  ;;  %v7226_v37 = vld [vmem:[#allocation2 + $0x7cc] sm:$0xf] }
 0x635   :  { %v7318_v17 = vld [vmem:[#allocation2 + $0xaa4] sm:$0xf0]  ;;  %v5108_v20 = vld [vmem:[#allocation2 + $0x1a8] sm:$0xf0] }
 0x636   :  { %v6514_v18 = vld [vmem:[#allocation2 + $0xc88] sm:$0xf]  ;;  %v6259_v27 = vor.u32 %v7318_v17, %v6258_v12  ;;  %4141 = vmatpush.bf16.msrb.mxu2 %v6003_v26  ;;  %v5908_v12 = vld [vmem:[#allocation2 + $0x7e8] sm:$0xf0]  ;;  %v5399_v17 = vor.u32 %v7098_v35, %v5396_v2 }
 0x637   :  { %v7382_v19 = vld [vmem:[#allocation2 + $0xca4] sm:$0xf0]  ;;  %v5911_v26 = vor.u32 %v7226_v37, %v5908_v12  ;;  %v7002_v2 = vld [vmem:[#allocation2 + $0xcc] sm:$0xf] }
 0x638   :  { %v6770_v11 = vld [vmem:[#allocation2 + $0xe88] sm:$0xf]  ;;  %v6515_v29 = vor.u32 %v7382_v19, %v6514_v18  ;;  %4154 = vmatpush.bf16.msra.mxu0 %v6259_v27  ;;  %v5655_v18 = vor.u32 %v7162_v4, %v5652_v5  ;;  %v7026_v19 = vld [vmem:[#allocation2 + $0x18c] sm:$0xf] }
 0x639   :  { %v7446_v24 = vld [vmem:[#allocation2 + $0xea4] sm:$0xf0]  ;;  %v5111_v27 = vor.u32 %v7026_v19, %v5108_v20  ;;  %v5012_v4 = vld [vmem:[#allocation2 + $0xe8] sm:$0xf0] }
 0x63a   :  { %v5970_v28 = vld [vmem:[#allocation2 + $0x848] sm:$0xf]  ;;  %v6771_v40 = vor.u32 %v7446_v24, %v6770_v11  ;;  %4167 = vmatpush.bf16.msra.mxu3 %v6515_v29  ;;  %v5364_v24 = vld [vmem:[#allocation2 + $0x3a8] sm:$0xf0] }
 0x63b   :  { %v7246_v30 = vld [vmem:[#allocation2 + $0x864] sm:$0xf0]  ;;  %v5876_v29 = vld [vmem:[#allocation2 + $0x7a8] sm:$0xf0] }
 0x63c   :  { %v6226_v31 = vld [vmem:[#allocation2 + $0xa48] sm:$0xf]  ;;  %v5971_v52 = vor.u32 %v7246_v30, %v5970_v28  ;;  %4180 = vmatpush.bf16.msra.mxu1 %v6771_v40  ;;  %v7218_v28 = vld [vmem:[#allocation2 + $0x78c] sm:$0xf]  ;;  %v5367_v30 = vor.u32 %v7090_v23, %v5364_v24  ;;  %v3976_v23 = vpop.f32.mrf.mxu1 }
 0x63d   :  { %v7310_v32 = vld [vmem:[#allocation2 + $0xa64] sm:$0xf0]  ;;  %v7146_v40 = vld [vmem:[#allocation2 + $0x54c] sm:$0xf] }
 0x63e   :  { %v6482_v38 = vld [vmem:[#allocation2 + $0xc48] sm:$0xf]  ;;  %v6227_v53 = vor.u32 %v7310_v32, %v6226_v31  ;;  %4142 = vmatpush.bf16.msrb.mxu2 %v5971_v52  ;;  %v5623_v31 = vor.u32 %v7154_v16, %v5620_v25  ;;  %v7018_v32 = vld [vmem:[#allocation2 + $0x14c] sm:$0xf] }
 0x63f   :  { %v7374_v39 = vld [vmem:[#allocation2 + $0xc64] sm:$0xf0]  ;;  %v5844_v52 = vld [vmem:[#allocation2 + $0x768] sm:$0xf0] }
 0x640   :  { %v6738_v42 = vld [vmem:[#allocation2 + $0xe48] sm:$0xf]  ;;  %v6483_v60 = vor.u32 %v7374_v39, %v6482_v38  ;;  %4155 = vmatpush.bf16.msra.mxu0 %v6227_v53  ;;  %v7082_v38 = vld [vmem:[#allocation2 + $0x34c] sm:$0xf] }
 0x641   :  { %v7438_v43 = vld [vmem:[#allocation2 + $0xe64] sm:$0xf0]  ;;  %v5332_v39 = vld [vmem:[#allocation2 + $0x368] sm:$0xf0] }
 0x642   :  { %v5938_v54 = vld [vmem:[#allocation2 + $0x808] sm:$0xf]  ;;  %v6739_v13 = vor.u32 %v7438_v43, %v6738_v42  ;;  %4168 = vmatpush.bf16.msra.mxu3 %v6483_v60  ;;  %v5879_v42 = vor.u32 %v7218_v28, %v5876_v29  ;;  %v5079_v43 = vor.u32 %v7018_v32, %v5076_v36  ;;  %v5335_v53 = vor.u32 %v7082_v38, %v5332_v39  ;;  %v5300_v60 = vld [vmem:[#allocation2 + $0x328] sm:$0xf0] }
 0x643   :  { %v7238_v49 = vld [vmem:[#allocation2 + $0x824] sm:$0xf0]  ;;  %v5303_v35 = vor.u32 %v7074_v59, %v5300_v60  ;;  %v7066_v5 = vld [vmem:[#allocation2 + $0x2cc] sm:$0xf] }
 0x644   :  { %v6194_v58 = vld [vmem:[#allocation2 + $0xa08] sm:$0xf]  ;;  %v5939_v7 = vor.u32 %v7238_v49, %v5938_v54  ;;  %4181 = vmatpush.bf16.msra.mxu1 %v6739_v13  ;;  %v5591_v54 = vor.u32 %v7146_v40, %v5588_v41  ;;  %v7010_v49 = vld [vmem:[#allocation2 + $0x10c] sm:$0xf] }
 0x645   :  { %v7302_v14 = vld [vmem:[#allocation2 + $0xa24] sm:$0xf0]  ;;  %v5268_v6 = vld [vmem:[#allocation2 + $0x2e8] sm:$0xf0] }
 0x646   :  { %v6450_v48 = vld [vmem:[#allocation2 + $0xc08] sm:$0xf]  ;;  %v6195_v8 = vor.u32 %v7302_v14, %v6194_v58  ;;  %4143 = vmatpush.bf16.msrb.mxu2 %v5939_v7  ;;  %v5044_v58 = vld [vmem:[#allocation2 + $0x128] sm:$0xf0]  ;;  %v5271_v12 = vor.u32 %v7066_v5, %v5268_v6 }
 0x647   :  { %v7366_v61 = vld [vmem:[#allocation2 + $0xc24] sm:$0xf0]  ;;  %v7138_v14 = vld [vmem:[#allocation2 + $0x50c] sm:$0xf]  ;;  %v5047_v13 = vor.u32 %v7010_v49, %v5044_v58 }
 0x648   :  { %v6706_v9 = vld [vmem:[#allocation2 + $0xe08] sm:$0xf]  ;;  %v6451_v3 = vor.u32 %v7366_v61, %v6450_v48  ;;  %4156 = vmatpush.bf16.msra.mxu0 %v6195_v8  ;;  %v5556_v48 = vld [vmem:[#allocation2 + $0x528] sm:$0xf0]  ;;  %v5847_v61 = vor.u32 %v7210_v46, %v5844_v52 }
 0x649   :  { %v7430_v0 = vld [vmem:[#allocation2 + $0xe24] sm:$0xf0]  ;;  %4144 = vmatmul.bf16.vlgmr.msrb.gmra.mxu2 %v7838_v56  ;;  %v5559_v1 = vor.u32 %v7138_v14, %v5556_v48  ;;  %v7130_v7 = vld [vmem:[#allocation2 + $0x4cc] sm:$0xf] }
 0x64a   :  { %v6707_v11 = vor.u32 %v7430_v0, %v6706_v9  ;;  %4169 = vmatpush.bf16.msra.mxu3 %v6451_v3  ;;  %4188 = vmatpush.bf16.msra.mxu2 %v5143_v34  ;;  %v5524_v8 = vld [vmem:[#allocation2 + $0x4e8] sm:$0xf0]  ;;  %v5815_v9 = vor.u32 %v7202_v15, %v5812_v62  ;;  %v3950_v0 = vpop.f32.mrf.mxu0  ;;  %v5015_v3 = vor.u32 %v7002_v2, %v5012_v4  ;;  %v3978_v62 = vpop.f32.mrf.mxu1 }
 0x64b   :  { %4157 = vmatmul.bf16.vlgmr.msra.gmra.mxu0 %v7848_v10  ;;  %v7194_v34 = vld [vmem:[#allocation2 + $0x6cc] sm:$0xf] }
 0x64c   :  { %4201 = vmatpush.bf16.msrb.mxu0 %v5399_v17  ;;  %4182 = vmatpush.bf16.msra.mxu1 %v6707_v11  ;;  %v5780_v37 = vld [vmem:[#allocation2 + $0x6e8] sm:$0xf0]  ;;  %v5527_v17 = vor.u32 %v7130_v7, %v5524_v8 }
 0x64d   :  { %4170 = vmatmul.bf16.vlgmr.msra.gmra.mxu3 %v7843_v57  ;;  %v4980_v19 = vld [vmem:[#allocation2 + $0xa8] sm:$0xf0]  ;;  %v5783_v25 = vor.u32 %v7194_v34, %v5780_v37 }
 0x64e   :  { %4214 = vmatpush.bf16.msrb.mxu3 %v5655_v18  ;;  %4189 = vmatpush.bf16.msra.mxu2 %v5111_v27  ;;  %v6994_v18 = vld [vmem:[#allocation2 + $0x8c] sm:$0xf] }
 0x64f   :  { %4183 = vmatmul.bf16.vlgmr.msra.gmra.mxu1 %v7854_v63  ;;  %v7058_v20 = vld [vmem:[#allocation2 + $0x28c] sm:$0xf]  ;;  %v4983_v27 = vor.u32 %v6994_v18, %v4980_v19 }
 0x650   :  { %4227 = vmatpush.bf16.msrb.mxu1 %v5911_v26  ;;  %4202 = vmatpush.bf16.msrb.mxu0 %v5367_v30  ;;  %v5236_v11 = vld [vmem:[#allocation2 + $0x2a8] sm:$0xf0]  ;;  %v3937_v26 = vpop.f32.mrf.mxu2 }
 0x651   :  { %v7122_v24 = vld [vmem:[#allocation2 + $0x48c] sm:$0xf]  ;;  %v3938_v28 = vadd.f32 %v3937_v26, %v7872_v51  ;;  %v5239_v32 = vor.u32 %v7058_v20, %v5236_v11 }
 0x652   :  { %4215 = vmatpush.bf16.msrb.mxu3 %v5623_v31  ;;  %4190 = vmatpush.bf16.msra.mxu2 %v5079_v43  ;;  %v5492_v16 = vld [vmem:[#allocation2 + $0x4a8] sm:$0xf0]  ;;  %v3963_v31 = vpop.f32.mrf.mxu3 }
 0x653   :  { %v7186_v29 = vld [vmem:[#allocation2 + $0x68c] sm:$0xf]  ;;  %v5495_v36 = vor.u32 %v7122_v24, %v5492_v16  ;;  %v3951_v46 = vadd.f32 %v3950_v0, %v3938_v28 }
 0x654   :  { %4228 = vmatpush.bf16.msrb.mxu1 %v5879_v42  ;;  %4203 = vmatpush.bf16.msrb.mxu0 %v5335_v53  ;;  %v5748_v30 = vld [vmem:[#allocation2 + $0x6a8] sm:$0xf0] }
 0x655   :  { %v6986_v38 = vld [vmem:[#allocation2 + $0x4c] sm:$0xf]  ;;  %v5751_v52 = vor.u32 %v7186_v29, %v5748_v30  ;;  %v3964_v49 = vadd.f32 %v3963_v31, %v3951_v46 }
 0x656   :  { %4216 = vmatpush.bf16.msrb.mxu3 %v5591_v54  ;;  %4191 = vmatpush.bf16.msra.mxu2 %v5047_v13  ;;  %v4948_v39 = vld [vmem:[#allocation2 + $0x68] sm:$0xf0]  ;;  %v3952_v54 = vpop.f32.mrf.mxu0 }
 0x657   :  { %v7050_v40 = vld [vmem:[#allocation2 + $0x24c] sm:$0xf]  ;;  %v4951_v51 = vor.u32 %v6986_v38, %v4948_v39 }
 0x658   :  { %4229 = vmatpush.bf16.msrb.mxu1 %v5847_v61  ;;  %4204 = vmatpush.bf16.msrb.mxu0 %v5303_v35  ;;  %v5204_v41 = vld [vmem:[#allocation2 + $0x268] sm:$0xf0] }
 0x659   :  { %v7114_v42 = vld [vmem:[#allocation2 + $0x44c] sm:$0xf]  ;;  %v5207_v14 = vor.u32 %v7050_v40, %v5204_v41 }
 0x65a   :  { %4217 = vmatpush.bf16.msrb.mxu3 %v5559_v1  ;;  %4192 = vmatpush.bf16.msra.mxu2 %v5015_v3  ;;  %v5460_v43 = vld [vmem:[#allocation2 + $0x468] sm:$0xf0]  ;;  %v7879_v1 = vadd.f32 %v3976_v23, %v3964_v49 }
 0x65b   :  { %v6978_v53 = vld [vmem:[#allocation2 + $0xc] sm:$0xf]  ;;  %v5463_v48 = vor.u32 %v7114_v42, %v5460_v43 }
 0x65c   :  { %4230 = vmatpush.bf16.msrb.mxu1 %v5815_v9  ;;  %4205 = vmatpush.bf16.msrb.mxu0 %v5271_v12  ;;  %v4916_v58 = vld [vmem:[#allocation2 + $0x28] sm:$0xf0]  ;;  %v3939_v9 = vpop.f32.mrf.mxu2  ;;  %v3965_v12 = vpop.f32.mrf.mxu3 }
 0x65d   :  { %v7178_v59 = vld [vmem:[#allocation2 + $0x64c] sm:$0xf]  ;;  %v4919_v0 = vor.u32 %v6978_v53, %v4916_v58 }
 0x65e   :  { %4218 = vmatpush.bf16.msrb.mxu3 %v5527_v17  ;;  %4193 = vmatpush.bf16.msra.mxu2 %v4983_v27  ;;  %v5716_v60 = vld [vmem:[#allocation2 + $0x668] sm:$0xf0] }
 0x65f   :  { %v7042_v61 = vld [vmem:[#allocation2 + $0x20c] sm:$0xf]  ;;  %v5719_v5 = vor.u32 %v7178_v59, %v5716_v60 }
 0x660   :  { %4231 = vmatpush.bf16.msrb.mxu1 %v5783_v25  ;;  %4206 = vmatpush.bf16.msrb.mxu0 %v5239_v32  ;;  %v5172_v13 = vld [vmem:[#allocation2 + $0x228] sm:$0xf0] }
 0x661   :  { %v7106_v15 = vld [vmem:[#allocation2 + $0x40c] sm:$0xf]  ;;  %v5175_v17 = vor.u32 %v7042_v61, %v5172_v13 }
 0x662   :  { %4219 = vmatpush.bf16.msrb.mxu3 %v5495_v36  ;;  %v5428_v35 = vld [vmem:[#allocation2 + $0x428] sm:$0xf0]  ;;  %4194 = vmatpush.bf16.msra.mxu2 %v4951_v51 }
 0x663   :  { %v7290_v2 = vld [vmem:[#allocation2 + $0x9cc] sm:$0xf]  ;;  %v5431_v18 = vor.u32 %v7106_v15, %v5428_v35 }
 0x664   :  { %v6164_v4 = vld [vmem:[#allocation2 + $0x9e8] sm:$0xf0]  ;;  %4232 = vmatpush.bf16.msrb.mxu1 %v5751_v52  ;;  %4207 = vmatpush.bf16.msrb.mxu0 %v5207_v14 }
 0x665   :  { %v7354_v6 = vld [vmem:[#allocation2 + $0xbcc] sm:$0xf]  ;;  %v6167_v23 = vor.u32 %v7290_v2, %v6164_v4 }
 0x666   :  { %v6420_v7 = vld [vmem:[#allocation2 + $0xbe8] sm:$0xf0]  ;;  %4220 = vmatpush.bf16.msrb.mxu3 %v5463_v48  ;;  %4195 = vmatpush.bf16.msra.mxu2 %v4919_v0 }
 0x667   :  { %v7418_v8 = vld [vmem:[#allocation2 + $0xdcc] sm:$0xf]  ;;  %v6423_v11 = vor.u32 %v7354_v6, %v6420_v7 }
 0x668   :  { %v6676_v3 = vld [vmem:[#allocation2 + $0xde8] sm:$0xf0]  ;;  %4233 = vmatpush.bf16.msrb.mxu1 %v5719_v5  ;;  %4208 = vmatpush.bf16.msrb.mxu0 %v5175_v17 }
 0x669   :  { %v7170_v34 = vld [vmem:[#allocation2 + $0x60c] sm:$0xf]  ;;  %v6679_v16 = vor.u32 %v7418_v8, %v6676_v3  ;;  %4196 = vmatmul.bf16.vlgmr.msra.gmra.mxu2 %v7814_v50  ;;  %v1293_v8 = vperm.slane %v7770_v21, 5 }
 0x66a   :  { %v5684_v37 = vld [vmem:[#allocation2 + $0x628] sm:$0xf0]  ;;  %4221 = vmatpush.bf16.msrb.mxu3 %v5431_v18  ;;  %4240 = vmatpush.bf16.msrb.mxu2 %v6167_v23  ;;  %v4002_v18 = vpop.f32.mrf.mxu0 }
 0x66b   :  { %v7482_v19 = vld [vmem:[#allocation2 + $0xfcc] sm:$0xf]  ;;  %v5687_v25 = vor.u32 %v7170_v34, %v5684_v37  ;;  %4209 = vmatmul.bf16.vlgmr.msrb.gmra.mxu0 %v7824_v45 }
 0x66c   :  { %v6932_v20 = vld [vmem:[#allocation2 + $0xfe8] sm:$0xf0]  ;;  %4253 = vmatpush.bf16.msra.mxu0 %v6423_v11 }
 0x66d   :  { %v7282_v24 = vld [vmem:[#allocation2 + $0x98c] sm:$0xf]  ;;  %v6935_v31 = vor.u32 %v7482_v19, %v6932_v20  ;;  %4234 = vmatpush.bf16.msrb.mxu1 %v5687_v25  ;;  %4222 = vmatmul.bf16.vlgmr.msrb.gmra.mxu3 %v7819_v55  ;;  %v4028_v25 = vpop.f32.mrf.mxu1 }
 0x66e   :  { %v6132_v26 = vld [vmem:[#allocation2 + $0x9a8] sm:$0xf0]  ;;  %4266 = vmatpush.bf16.msra.mxu3 %v6679_v16  ;;  %v1309_v16 = vperm.slane %v1293_v8, 1 }
 0x66f   :  { %v7346_v27 = vld [vmem:[#allocation2 + $0xb8c] sm:$0xf]  ;;  %v6135_v38 = vor.u32 %v7282_v24, %v6132_v26 }
 0x670   :  { %v6388_v28 = vld [vmem:[#allocation2 + $0xba8] sm:$0xf0]  ;;  %4235 = vmatmul.bf16.vlgmr.msrb.gmra.mxu1 %v7830_v33 }
 0x671   :  { %v7410_v29 = vld [vmem:[#allocation2 + $0xd8c] sm:$0xf]  ;;  %v6391_v39 = vor.u32 %v7346_v27, %v6388_v28  ;;  %4279 = vmatpush.bf16.msra.mxu1 %v6935_v31  ;;  %4241 = vmatpush.bf16.msrb.mxu2 %v6135_v38 }
 0x672   :  { %v6644_v30 = vld [vmem:[#allocation2 + $0xda8] sm:$0xf0] }
 0x673   :  { %v7474_v32 = vld [vmem:[#allocation2 + $0xf8c] sm:$0xf]  ;;  %v6647_v41 = vor.u32 %v7410_v29, %v6644_v30  ;;  %4254 = vmatpush.bf16.msra.mxu0 %v6391_v39  ;;  %v3989_v39 = vpop.f32.mrf.mxu2 }
 0x674   :  { %v6900_v36 = vld [vmem:[#allocation2 + $0xfa8] sm:$0xf0] }
 0x675   :  { %v7274_v40 = vld [vmem:[#allocation2 + $0x94c] sm:$0xf]  ;;  %v6903_v54 = vor.u32 %v7474_v32, %v6900_v36  ;;  %4267 = vmatpush.bf16.msra.mxu3 %v6647_v41 }
 0x676   :  { %v6100_v42 = vld [vmem:[#allocation2 + $0x968] sm:$0xf0] }
 0x677   :  { %v7338_v43 = vld [vmem:[#allocation2 + $0xb4c] sm:$0xf]  ;;  %v6103_v58 = vor.u32 %v7274_v40, %v6100_v42  ;;  %4280 = vmatpush.bf16.msra.mxu1 %v6903_v54 }
 0x678   :  { %v6356_v46 = vld [vmem:[#allocation2 + $0xb68] sm:$0xf0] }
 0x679   :  { %v7402_v52 = vld [vmem:[#allocation2 + $0xd4c] sm:$0xf]  ;;  %v6359_v59 = vor.u32 %v7338_v43, %v6356_v46  ;;  %4242 = vmatpush.bf16.msrb.mxu2 %v6103_v58  ;;  %v3990_v43 = vadd.f32 %v3989_v39, %v1309_v16  ;;  %v4015_v46 = vpop.f32.mrf.mxu3 }
 0x67a   :  { %v6612_v53 = vld [vmem:[#allocation2 + $0xd68] sm:$0xf0] }
 0x67b   :  { %v7466_v51 = vld [vmem:[#allocation2 + $0xf4c] sm:$0xf]  ;;  %v6615_v14 = vor.u32 %v7402_v52, %v6612_v53  ;;  %4255 = vmatpush.bf16.msra.mxu0 %v6359_v59 }
 0x67c   :  { %v6868_v49 = vld [vmem:[#allocation2 + $0xf68] sm:$0xf0] }
 0x67d   :  { %v7266_v60 = vld [vmem:[#allocation2 + $0x90c] sm:$0xf]  ;;  %v6871_v35 = vor.u32 %v7466_v51, %v6868_v49  ;;  %4268 = vmatpush.bf16.msra.mxu3 %v6615_v14  ;;  %v4004_v14 = vpop.f32.mrf.mxu0 }
 0x67e   :  { %v6068_v48 = vld [vmem:[#allocation2 + $0x928] sm:$0xf0]  ;;  %v5594_v14 = vld [vmem:[#allocation2 + $0x550] sm:$0xf] }
 0x67f   :  { %v7330_v61 = vld [vmem:[#allocation2 + $0xb0c] sm:$0xf]  ;;  %v6071_v5 = vor.u32 %v7266_v60, %v6068_v48  ;;  %4281 = vmatpush.bf16.msra.mxu1 %v6871_v35  ;;  %v4003_v60 = vadd.f32 %v4002_v18, %v3990_v43  ;;  %v5658_v18 = vld [vmem:[#allocation2 + $0x5d0] sm:$0xf] }
 0x680   :  { %v6324_v13 = vld [vmem:[#allocation2 + $0xb28] sm:$0xf0] }
 0x681   :  { %v7394_v15 = vld [vmem:[#allocation2 + $0xd0c] sm:$0xf]  ;;  %v6327_v6 = vor.u32 %v7330_v61, %v6324_v13  ;;  %4243 = vmatpush.bf16.msrb.mxu2 %v6071_v5  ;;  %v4030_v5 = vpop.f32.mrf.mxu1 }
 0x682   :  { %v6580_v62 = vld [vmem:[#allocation2 + $0xd28] sm:$0xf0]  ;;  %v7015_v5 = vld [vmem:[#allocation2 + $0x12c] sm:$0xf0] }
 0x683   :  { %v7458_v2 = vld [vmem:[#allocation2 + $0xf0c] sm:$0xf]  ;;  %v6583_v9 = vor.u32 %v7394_v15, %v6580_v62  ;;  %4256 = vmatpush.bf16.msra.mxu0 %v6327_v6 }
 0x684   :  { %v6836_v4 = vld [vmem:[#allocation2 + $0xf28] sm:$0xf0] }
 0x685   :  { %v7258_v7 = vld [vmem:[#allocation2 + $0x8cc] sm:$0xf]  ;;  %v6839_v17 = vor.u32 %v7458_v2, %v6836_v4  ;;  %4269 = vmatpush.bf16.msra.mxu3 %v6583_v9  ;;  %v4016_v4 = vadd.f32 %v4015_v46, %v4003_v60  ;;  %v7087_v60 = vld [vmem:[#allocation2 + $0x36c] sm:$0xf0] }
 0x686   :  { %v6036_v0 = vld [vmem:[#allocation2 + $0x8e8] sm:$0xf0] }
 0x687   :  { %v7322_v3 = vld [vmem:[#allocation2 + $0xacc] sm:$0xf]  ;;  %v6039_v23 = vor.u32 %v7258_v7, %v6036_v0  ;;  %4282 = vmatpush.bf16.msra.mxu1 %v6839_v17  ;;  %v7103_v17 = vld [vmem:[#allocation2 + $0x3ec] sm:$0xf0] }
 0x688   :  { %v6292_v34 = vld [vmem:[#allocation2 + $0xae8] sm:$0xf0] }
 0x689   :  { %v7386_v37 = vld [vmem:[#allocation2 + $0xccc] sm:$0xf]  ;;  %v6295_v11 = vor.u32 %v7322_v3, %v6292_v34  ;;  %4244 = vmatpush.bf16.msrb.mxu2 %v6039_v23  ;;  %v5146_v3 = vld [vmem:[#allocation2 + $0x1d0] sm:$0xf] }
 0x68a   :  { %v6548_v12 = vld [vmem:[#allocation2 + $0xce8] sm:$0xf0]  ;;  %v7039_v34 = vld [vmem:[#allocation2 + $0x1ec] sm:$0xf0] }
 0x68b   :  { %v7450_v19 = vld [vmem:[#allocation2 + $0xecc] sm:$0xf]  ;;  %v6551_v26 = vor.u32 %v7386_v37, %v6548_v12  ;;  %4257 = vmatpush.bf16.msra.mxu0 %v6295_v11  ;;  %v5402_v37 = vld [vmem:[#allocation2 + $0x3d0] sm:$0xf]  ;;  %v7886_v12 = vadd.f32 %v4028_v25, %v4016_v4 }
 0x68c   :  { %v6804_v20 = vld [vmem:[#allocation2 + $0xee8] sm:$0xf0]  ;;  %v5050_v4 = vld [vmem:[#allocation2 + $0x110] sm:$0xf] }
 0x68d   :  { %v7250_v24 = vld [vmem:[#allocation2 + $0x88c] sm:$0xf]  ;;  %v6807_v32 = vor.u32 %v7450_v19, %v6804_v20  ;;  %4270 = vmatpush.bf16.msra.mxu3 %v6551_v26  ;;  %v7167_v19 = vld [vmem:[#allocation2 + $0x5ec] sm:$0xf0]  ;;  %v3991_v20 = vpop.f32.mrf.mxu2  ;;  %v4017_v26 = vpop.f32.mrf.mxu3 }
 0x68e   :  { %v6004_v27 = vld [vmem:[#allocation2 + $0x8a8] sm:$0xf0]  ;;  %v5659_v25 = vor.u32 %v7167_v19, %v5658_v18  ;;  %v5018_v19 = vld [vmem:[#allocation2 + $0xd0] sm:$0xf] }
 0x68f   :  { %v7314_v28 = vld [vmem:[#allocation2 + $0xa8c] sm:$0xf]  ;;  %v6007_v40 = vor.u32 %v7250_v24, %v6004_v27  ;;  %4283 = vmatpush.bf16.msra.mxu1 %v6807_v32  ;;  %v5114_v32 = vld [vmem:[#allocation2 + $0x190] sm:$0xf] }
 0x690   :  { %v6260_v29 = vld [vmem:[#allocation2 + $0xaa8] sm:$0xf0]  ;;  %v7007_v20 = vld [vmem:[#allocation2 + $0xec] sm:$0xf0] }
 0x691   :  { %v7378_v30 = vld [vmem:[#allocation2 + $0xc8c] sm:$0xf]  ;;  %v6263_v41 = vor.u32 %v7314_v28, %v6260_v29  ;;  %4245 = vmatpush.bf16.msrb.mxu2 %v6007_v40  ;;  %v5147_v28 = vor.u32 %v7039_v34, %v5146_v3  ;;  %v5914_v29 = vld [vmem:[#allocation2 + $0x7d0] sm:$0xf]  ;;  %v5051_v3 = vor.u32 %v7015_v5, %v5050_v4 }
 0x692   :  { %v6516_v31 = vld [vmem:[#allocation2 + $0xca8] sm:$0xf0]  ;;  %v7095_v40 = vld [vmem:[#allocation2 + $0x3ac] sm:$0xf0] }
 0x693   :  { %v7442_v36 = vld [vmem:[#allocation2 + $0xe8c] sm:$0xf]  ;;  %v6519_v52 = vor.u32 %v7378_v30, %v6516_v31  ;;  %4258 = vmatpush.bf16.msra.mxu0 %v6263_v41  ;;  %v7231_v30 = vld [vmem:[#allocation2 + $0x7ec] sm:$0xf0]  ;;  %v5403_v31 = vor.u32 %v7103_v17, %v5402_v37 }
 0x694   :  { %v6772_v38 = vld [vmem:[#allocation2 + $0xea8] sm:$0xf0]  ;;  %v5626_v41 = vld [vmem:[#allocation2 + $0x590] sm:$0xf]  ;;  %v5915_v43 = vor.u32 %v7231_v30, %v5914_v29  ;;  %v5019_v29 = vor.u32 %v7007_v20, %v5018_v19 }
 0x695   :  { %v7242_v42 = vld [vmem:[#allocation2 + $0x84c] sm:$0xf]  ;;  %v6775_v59 = vor.u32 %v7442_v36, %v6772_v38  ;;  %4271 = vmatpush.bf16.msra.mxu3 %v6519_v52  ;;  %v7031_v36 = vld [vmem:[#allocation2 + $0x1ac] sm:$0xf0] }
 0x696   :  { %v5972_v53 = vld [vmem:[#allocation2 + $0x868] sm:$0xf0]  ;;  %v5370_v38 = vld [vmem:[#allocation2 + $0x390] sm:$0xf]  ;;  %v5115_v46 = vor.u32 %v7031_v36, %v5114_v32 }
 0x697   :  { %v7306_v54 = vld [vmem:[#allocation2 + $0xa4c] sm:$0xf]  ;;  %v5975_v13 = vor.u32 %v7242_v42, %v5972_v53  ;;  %4284 = vmatpush.bf16.msra.mxu1 %v6775_v59  ;;  %v7159_v42 = vld [vmem:[#allocation2 + $0x5ac] sm:$0xf0] }
 0x698   :  { %v6228_v51 = vld [vmem:[#allocation2 + $0xa68] sm:$0xf0]  ;;  %v5882_v52 = vld [vmem:[#allocation2 + $0x790] sm:$0xf] }
 0x699   :  { %v7370_v49 = vld [vmem:[#allocation2 + $0xc4c] sm:$0xf]  ;;  %v6231_v15 = vor.u32 %v7306_v54, %v6228_v51  ;;  %4246 = vmatpush.bf16.msrb.mxu2 %v5975_v13  ;;  %v7223_v53 = vld [vmem:[#allocation2 + $0x7ac] sm:$0xf0]  ;;  %v5371_v54 = vor.u32 %v7095_v40, %v5370_v38  ;;  %v5627_v51 = vor.u32 %v7159_v42, %v5626_v41  ;;  %v4080_v40 = vpop.f32.mrf.mxu1 }
 0x69a   :  { %v6484_v58 = vld [vmem:[#allocation2 + $0xc68] sm:$0xf0]  ;;  %v5338_v59 = vld [vmem:[#allocation2 + $0x350] sm:$0xf] }
 0x69b   :  { %v7434_v48 = vld [vmem:[#allocation2 + $0xe4c] sm:$0xf]  ;;  %v6487_v6 = vor.u32 %v7370_v49, %v6484_v58  ;;  %4259 = vmatpush.bf16.msra.mxu0 %v6231_v15  ;;  %v5082_v49 = vld [vmem:[#allocation2 + $0x150] sm:$0xf] }
 0x69c   :  { %v6740_v61 = vld [vmem:[#allocation2 + $0xe68] sm:$0xf0]  ;;  %v7023_v58 = vld [vmem:[#allocation2 + $0x16c] sm:$0xf0] }
 0x69d   :  { %v7234_v62 = vld [vmem:[#allocation2 + $0x80c] sm:$0xf]  ;;  %v6743_v0 = vor.u32 %v7434_v48, %v6740_v61  ;;  %4272 = vmatpush.bf16.msra.mxu3 %v6487_v6  ;;  %v7151_v48 = vld [vmem:[#allocation2 + $0x56c] sm:$0xf0]  ;;  %v5883_v61 = vor.u32 %v7223_v53, %v5882_v52  ;;  %v5083_v13 = vor.u32 %v7023_v58, %v5082_v49  ;;  %v4717_v53 = vperm.slane %v7770_v21, 6  ;;  %v4067_v58 = vpop.f32.mrf.mxu3 }
 0x69e   :  { %v5940_v35 = vld [vmem:[#allocation2 + $0x828] sm:$0xf0]  ;;  %v5850_v15 = vld [vmem:[#allocation2 + $0x750] sm:$0xf] }
 0x69f   :  { %v7298_v2 = vld [vmem:[#allocation2 + $0xa0c] sm:$0xf]  ;;  %v5943_v23 = vor.u32 %v7234_v62, %v5940_v35  ;;  %4285 = vmatpush.bf16.msra.mxu1 %v6743_v0  ;;  %v7215_v62 = vld [vmem:[#allocation2 + $0x76c] sm:$0xf0]  ;;  %v5339_v35 = vor.u32 %v7087_v60, %v5338_v59  ;;  %v4733_v5 = vperm.slane %v4717_v53, 2 }
 0x6a0   :  { %v6196_v7 = vld [vmem:[#allocation2 + $0xa28] sm:$0xf0]  ;;  %v5306_v6 = vld [vmem:[#allocation2 + $0x310] sm:$0xf]  ;;  %v5851_v0 = vor.u32 %v7215_v62, %v5850_v15 }
 0x6a1   :  { %v7362_v8 = vld [vmem:[#allocation2 + $0xc0c] sm:$0xf]  ;;  %v6199_v11 = vor.u32 %v7298_v2, %v6196_v7  ;;  %4247 = vmatpush.bf16.msrb.mxu2 %v5943_v23  ;;  %v5595_v2 = vor.u32 %v7151_v48, %v5594_v14  ;;  %v7079_v7 = vld [vmem:[#allocation2 + $0x32c] sm:$0xf0] }
 0x6a2   :  { %v6452_v9 = vld [vmem:[#allocation2 + $0xc28] sm:$0xf0]  ;;  %v5818_v34 = vld [vmem:[#allocation2 + $0x710] sm:$0xf]  ;;  %v5307_v17 = vor.u32 %v7079_v7, %v5306_v6 }
 0x6a3   :  { %v7426_v24 = vld [vmem:[#allocation2 + $0xe0c] sm:$0xf]  ;;  %v6455_v27 = vor.u32 %v7362_v8, %v6452_v9  ;;  %4260 = vmatpush.bf16.msra.mxu0 %v6199_v11  ;;  %v5562_v8 = vld [vmem:[#allocation2 + $0x510] sm:$0xf] }
 0x6a4   :  { %v6708_v16 = vld [vmem:[#allocation2 + $0xe28] sm:$0xf0]  ;;  %4248 = vmatmul.bf16.vlgmr.msrb.gmra.mxu2 %v7838_v56  ;;  %v7143_v9 = vld [vmem:[#allocation2 + $0x52c] sm:$0xf0] }
 0x6a5   :  { %v6711_v39 = vor.u32 %v7426_v24, %v6708_v16  ;;  %4273 = vmatpush.bf16.msra.mxu3 %v6455_v27  ;;  %4292 = vmatpush.bf16.msra.mxu2 %v5147_v28  ;;  %v7207_v37 = vld [vmem:[#allocation2 + $0x72c] sm:$0xf0]  ;;  %v5563_v18 = vor.u32 %v7143_v9, %v5562_v8  ;;  %v4054_v27 = vpop.f32.mrf.mxu0  ;;  %v4716_v28 = vperm.slane %v7770_v21, 2  ;;  %v4708_v21 = vmax.f32 %v7879_v1, 0.0  ;;  %v4082_v1 = vpop.f32.mrf.mxu1 }
 0x6a6   :  { %4261 = vmatmul.bf16.vlgmr.msra.gmra.mxu0 %v7848_v10  ;;  %v5274_v23 = vld [vmem:[#allocation2 + $0x2d0] sm:$0xf]  ;;  %v5819_v26 = vor.u32 %v7207_v37, %v5818_v34 }
 0x6a7   :  { %4305 = vmatpush.bf16.msrb.mxu0 %v5403_v31  ;;  %4286 = vmatpush.bf16.msra.mxu1 %v6711_v39  ;;  %v7071_v11 = vld [vmem:[#allocation2 + $0x2ec] sm:$0xf0] }
 0x6a8   :  { %4274 = vmatmul.bf16.vlgmr.msra.gmra.mxu3 %v7843_v57  ;;  %v5530_v24 = vld [vmem:[#allocation2 + $0x4d0] sm:$0xf] }
 0x6a9   :  { %4318 = vmatpush.bf16.msrb.mxu3 %v5659_v25  ;;  %4293 = vmatpush.bf16.msra.mxu2 %v5115_v46  ;;  %v7135_v16 = vld [vmem:[#allocation2 + $0x4ec] sm:$0xf0]  ;;  %v5275_v25 = vor.u32 %v7071_v11, %v5274_v23  ;;  %v4041_v46 = vpop.f32.mrf.mxu2 }
 0x6aa   :  { %4287 = vmatmul.bf16.vlgmr.msra.gmra.mxu1 %v7854_v63  ;;  %v5786_v30 = vld [vmem:[#allocation2 + $0x6d0] sm:$0xf]  ;;  %v5531_v32 = vor.u32 %v7135_v16, %v5530_v24 }
 0x6ab   :  { %4331 = vmatpush.bf16.msrb.mxu1 %v5915_v43  ;;  %4306 = vmatpush.bf16.msrb.mxu0 %v5371_v54  ;;  %v7199_v31 = vld [vmem:[#allocation2 + $0x6ec] sm:$0xf0]  ;;  %v4732_v54 = vperm.slane %v4716_v28, 2 }
 0x6ac   :  { %v4986_v36 = vld [vmem:[#allocation2 + $0x90] sm:$0xf]  ;;  %v5787_v52 = vor.u32 %v7199_v31, %v5786_v30 }
 0x6ad   :  { %4319 = vmatpush.bf16.msrb.mxu3 %v5627_v51  ;;  %4294 = vmatpush.bf16.msra.mxu2 %v5083_v13  ;;  %v6999_v38 = vld [vmem:[#allocation2 + $0xac] sm:$0xf0]  ;;  %v4042_v51 = vadd.f32 %v4041_v46, %v7886_v12  ;;  %v4056_v8 = vpop.f32.mrf.mxu0  ;;  %v4740_v46 = vmul.f32 %v4732_v54, %v4708_v21 }
 0x6ae   :  { %v5242_v39 = vld [vmem:[#allocation2 + $0x290] sm:$0xf]  ;;  %v4987_v49 = vor.u32 %v6999_v38, %v4986_v36 }
 0x6af   :  { %4332 = vmatpush.bf16.msrb.mxu1 %v5883_v61  ;;  %4307 = vmatpush.bf16.msrb.mxu0 %v5339_v35  ;;  %v7063_v41 = vld [vmem:[#allocation2 + $0x2ac] sm:$0xf0]  ;;  %v4055_v62 = vadd.f32 %v4054_v27, %v4042_v51 }
 0x6b0   :  { %v5498_v42 = vld [vmem:[#allocation2 + $0x490] sm:$0xf]  ;;  %v5243_v14 = vor.u32 %v7063_v41, %v5242_v39  ;;  %v4069_v39 = vpop.f32.mrf.mxu3 }
 0x6b1   :  { %4320 = vmatpush.bf16.msrb.mxu3 %v5595_v2  ;;  %4295 = vmatpush.bf16.msra.mxu2 %v5051_v3  ;;  %v7127_v43 = vld [vmem:[#allocation2 + $0x4ac] sm:$0xf0]  ;;  %v4068_v9 = vadd.f32 %v4067_v58, %v4055_v62  ;;  %v4043_v31 = vpop.f32.mrf.mxu2 }
 0x6b2   :  { %v5754_v59 = vld [vmem:[#allocation2 + $0x690] sm:$0xf]  ;;  %v5499_v48 = vor.u32 %v7127_v43, %v5498_v42  ;;  %v1294_v31 = vperm.slane %v7772_v22, 1 }
 0x6b3   :  { %4333 = vmatpush.bf16.msrb.mxu1 %v5851_v0  ;;  %4308 = vmatpush.bf16.msrb.mxu0 %v5307_v17  ;;  %v7191_v60 = vld [vmem:[#allocation2 + $0x6ac] sm:$0xf0]  ;;  %v4081_v11 = vadd.f32 %v4080_v40, %v4068_v9 }
 0x6b4   :  { %v4954_v61 = vld [vmem:[#allocation2 + $0x50] sm:$0xf]  ;;  %v5755_v12 = vor.u32 %v7191_v60, %v5754_v59 }
 0x6b5   :  { %4321 = vmatpush.bf16.msrb.mxu3 %v5563_v18  ;;  %4296 = vmatpush.bf16.msra.mxu2 %v5019_v29  ;;  %v6991_v13 = vld [vmem:[#allocation2 + $0x6c] sm:$0xf0] }
 0x6b6   :  { %v5210_v15 = vld [vmem:[#allocation2 + $0x250] sm:$0xf]  ;;  %v4955_v0 = vor.u32 %v6991_v13, %v4954_v61 }
 0x6b7   :  { %4334 = vmatpush.bf16.msrb.mxu1 %v5819_v26  ;;  %4309 = vmatpush.bf16.msrb.mxu0 %v5275_v25  ;;  %v7055_v35 = vld [vmem:[#allocation2 + $0x26c] sm:$0xf0]  ;;  %v4709_v25 = vmax.f32 %v4081_v11, 0.0 }
 0x6b8   :  { %v5466_v2 = vld [vmem:[#allocation2 + $0x450] sm:$0xf]  ;;  %v5211_v17 = vor.u32 %v7055_v35, %v5210_v15 }
 0x6b9   :  { %4322 = vmatpush.bf16.msrb.mxu3 %v5531_v32  ;;  %v7119_v4 = vld [vmem:[#allocation2 + $0x46c] sm:$0xf0]  ;;  %4297 = vmatpush.bf16.msra.mxu2 %v4987_v49 }
 0x6ba   :  { %v4922_v6 = vld [vmem:[#allocation2 + $0x10] sm:$0xf]  ;;  %v5467_v18 = vor.u32 %v7119_v4, %v5466_v2 }
 0x6bb   :  { %4335 = vmatpush.bf16.msrb.mxu1 %v5787_v52  ;;  %v6983_v7 = vld [vmem:[#allocation2 + $0x2c] sm:$0xf0]  ;;  %4310 = vmatpush.bf16.msrb.mxu0 %v5243_v14  ;;  %v4741_v52 = vmul.f32 %v4733_v5, %v4709_v25 }
 0x6bc   :  { %v5178_v3 = vld [vmem:[#allocation2 + $0x210] sm:$0xf]  ;;  %v4923_v32 = vor.u32 %v6983_v7, %v4922_v6 }
 0x6bd   :  { %v5722_v34 = vld [vmem:[#allocation2 + $0x650] sm:$0xf]  ;;  %4323 = vmatpush.bf16.msrb.mxu3 %v5499_v48  ;;  %4298 = vmatpush.bf16.msra.mxu2 %v4955_v0  ;;  %v7896_v61 = vadd.f32 %v4741_v52, %v4740_v46 }
 0x6be   :  { %v7183_v37 = vld [vmem:[#allocation2 + $0x66c] sm:$0xf0] }
 0x6bf   :  { %v7047_v19 = vld [vmem:[#allocation2 + $0x22c] sm:$0xf0]  ;;  %4336 = vmatpush.bf16.msrb.mxu1 %v5755_v12  ;;  %v5723_v27 = vor.u32 %v7183_v37, %v5722_v34  ;;  %4311 = vmatpush.bf16.msrb.mxu0 %v5211_v17 }
 0x6c0   :  { %v5434_v20 = vld [vmem:[#allocation2 + $0x410] sm:$0xf]  ;;  %v5179_v41 = vor.u32 %v7047_v19, %v5178_v3 }
 0x6c1   :  { %v7111_v23 = vld [vmem:[#allocation2 + $0x42c] sm:$0xf0]  ;;  %4324 = vmatpush.bf16.msrb.mxu3 %v5467_v18  ;;  %4299 = vmatpush.bf16.msra.mxu2 %v4923_v32 }
 0x6c2   :  { %v6170_v24 = vld [vmem:[#allocation2 + $0x9d0] sm:$0xf]  ;;  %v5435_v42 = vor.u32 %v7111_v23, %v5434_v20 }
 0x6c3   :  { %v7295_v16 = vld [vmem:[#allocation2 + $0x9ec] sm:$0xf0]  ;;  %4337 = vmatpush.bf16.msrb.mxu1 %v5723_v27  ;;  %4312 = vmatpush.bf16.msrb.mxu0 %v5179_v41 }
 0x6c4   :  { %v6426_v26 = vld [vmem:[#allocation2 + $0xbd0] sm:$0xf]  ;;  %v6171_v53 = vor.u32 %v7295_v16, %v6170_v24  ;;  %4300 = vmatmul.bf16.vlgmr.msra.gmra.mxu2 %v7814_v50 }
 0x6c5   :  { %v7359_v28 = vld [vmem:[#allocation2 + $0xbec] sm:$0xf0]  ;;  %4325 = vmatpush.bf16.msrb.mxu3 %v5435_v42 }
 0x6c6   :  { %v6682_v29 = vld [vmem:[#allocation2 + $0xdd0] sm:$0xf]  ;;  %v6427_v51 = vor.u32 %v7359_v28, %v6426_v26  ;;  %4344 = vmatpush.bf16.msrb.mxu2 %v6171_v53  ;;  %4313 = vmatmul.bf16.vlgmr.msrb.gmra.mxu0 %v7824_v45 }
 0x6c7   :  { %v7423_v30 = vld [vmem:[#allocation2 + $0xdec] sm:$0xf0] }
 0x6c8   :  { %v5690_v36 = vld [vmem:[#allocation2 + $0x610] sm:$0xf]  ;;  %v6683_v58 = vor.u32 %v7423_v30, %v6682_v29  ;;  %4357 = vmatpush.bf16.msra.mxu0 %v6427_v51  ;;  %4326 = vmatmul.bf16.vlgmr.msrb.gmra.mxu3 %v7819_v55 }
 0x6c9   :  { %v7175_v38 = vld [vmem:[#allocation2 + $0x62c] sm:$0xf0] }
 0x6ca   :  { %v6938_v40 = vld [vmem:[#allocation2 + $0xfd0] sm:$0xf]  ;;  %v5691_v59 = vor.u32 %v7175_v38, %v5690_v36  ;;  %4370 = vmatpush.bf16.msra.mxu3 %v6683_v58  ;;  %v4132_v58 = vpop.f32.mrf.mxu1 }
 0x6cb   :  { %v7487_v43 = vld [vmem:[#allocation2 + $0xfec] sm:$0xf0] }
 0x6cc   :  { %v6138_v49 = vld [vmem:[#allocation2 + $0x990] sm:$0xf]  ;;  %v6939_v62 = vor.u32 %v7487_v43, %v6938_v40  ;;  %4338 = vmatpush.bf16.msrb.mxu1 %v5691_v59  ;;  %v4106_v40 = vpop.f32.mrf.mxu0 }
 0x6cd   :  { %v7287_v60 = vld [vmem:[#allocation2 + $0x9ac] sm:$0xf0] }
 0x6ce   :  { %v6394_v14 = vld [vmem:[#allocation2 + $0xb90] sm:$0xf]  ;;  %v6139_v2 = vor.u32 %v7287_v60, %v6138_v49  ;;  %v1310_v49 = vperm.slane %v1294_v31, 1 }
 0x6cf   :  { %v7351_v48 = vld [vmem:[#allocation2 + $0xbac] sm:$0xf0]  ;;  %4339 = vmatmul.bf16.vlgmr.msrb.gmra.mxu1 %v7830_v33 }
 0x6d0   :  { %v6650_v13 = vld [vmem:[#allocation2 + $0xd90] sm:$0xf]  ;;  %v6395_v4 = vor.u32 %v7351_v48, %v6394_v14  ;;  %4383 = vmatpush.bf16.msra.mxu1 %v6939_v62  ;;  %4345 = vmatpush.bf16.msrb.mxu2 %v6139_v2  ;;  %v4093_v2 = vpop.f32.mrf.mxu2 }
 0x6d1   :  { %v7415_v15 = vld [vmem:[#allocation2 + $0xdac] sm:$0xf0] }
 0x6d2   :  { %v6906_v35 = vld [vmem:[#allocation2 + $0xf90] sm:$0xf]  ;;  %v6651_v5 = vor.u32 %v7415_v15, %v6650_v13  ;;  %4358 = vmatpush.bf16.msra.mxu0 %v6395_v4 }
 0x6d3   :  { %v7479_v54 = vld [vmem:[#allocation2 + $0xfac] sm:$0xf0] }
 0x6d4   :  { %v6106_v21 = vld [vmem:[#allocation2 + $0x950] sm:$0xf]  ;;  %v6907_v0 = vor.u32 %v7479_v54, %v6906_v35  ;;  %4371 = vmatpush.bf16.msra.mxu3 %v6651_v5 }
 0x6d5   :  { %v7279_v12 = vld [vmem:[#allocation2 + $0x96c] sm:$0xf0] }
 0x6d6   :  { %v6362_v6 = vld [vmem:[#allocation2 + $0xb50] sm:$0xf]  ;;  %v6107_v37 = vor.u32 %v7279_v12, %v6106_v21  ;;  %4384 = vmatpush.bf16.msra.mxu1 %v6907_v0  ;;  %v4094_v12 = vadd.f32 %v4093_v2, %v1310_v49  ;;  %v5372_v2 = vld [vmem:[#allocation2 + $0x3b0] sm:$0xf0] }
 0x6d7   :  { %v7343_v7 = vld [vmem:[#allocation2 + $0xb6c] sm:$0xf0] }
 0x6d8   :  { %v6618_v8 = vld [vmem:[#allocation2 + $0xd50] sm:$0xf]  ;;  %v6363_v17 = vor.u32 %v7343_v7, %v6362_v6  ;;  %4346 = vmatpush.bf16.msrb.mxu2 %v6107_v37  ;;  %v4119_v6 = vpop.f32.mrf.mxu3 }
 0x6d9   :  { %v7407_v9 = vld [vmem:[#allocation2 + $0xd6c] sm:$0xf0] }
 0x6da   :  { %v6874_v3 = vld [vmem:[#allocation2 + $0xf50] sm:$0xf]  ;;  %v6619_v19 = vor.u32 %v7407_v9, %v6618_v8  ;;  %4359 = vmatpush.bf16.msra.mxu0 %v6363_v17  ;;  %v4107_v17 = vadd.f32 %v4106_v40, %v4094_v12  ;;  %v5660_v40 = vld [vmem:[#allocation2 + $0x5f0] sm:$0xf0] }
 0x6db   :  { %v7471_v34 = vld [vmem:[#allocation2 + $0xf6c] sm:$0xf0] }
 0x6dc   :  { %v6074_v18 = vld [vmem:[#allocation2 + $0x910] sm:$0xf]  ;;  %v6875_v16 = vor.u32 %v7471_v34, %v6874_v3  ;;  %4372 = vmatpush.bf16.msra.mxu3 %v6619_v19 }
 0x6dd   :  { %v7271_v20 = vld [vmem:[#allocation2 + $0x92c] sm:$0xf0] }
 0x6de   :  { %v6330_v23 = vld [vmem:[#allocation2 + $0xb10] sm:$0xf]  ;;  %v6075_v28 = vor.u32 %v7271_v20, %v6074_v18  ;;  %4385 = vmatpush.bf16.msra.mxu1 %v6875_v16  ;;  %v4108_v18 = vpop.f32.mrf.mxu0 }
 0x6df   :  { %v7335_v1 = vld [vmem:[#allocation2 + $0xb2c] sm:$0xf0]  ;;  %v5596_v18 = vld [vmem:[#allocation2 + $0x570] sm:$0xf0] }
 0x6e0   :  { %v6586_v11 = vld [vmem:[#allocation2 + $0xd10] sm:$0xf]  ;;  %v6331_v29 = vor.u32 %v7335_v1, %v6330_v23  ;;  %4347 = vmatpush.bf16.msrb.mxu2 %v6075_v28  ;;  %v4121_v49 = vpop.f32.mrf.mxu3 }
 0x6e1   :  { %v7399_v24 = vld [vmem:[#allocation2 + $0xd2c] sm:$0xf0] }
 0x6e2   :  { %v6842_v26 = vld [vmem:[#allocation2 + $0xf10] sm:$0xf]  ;;  %v6587_v25 = vor.u32 %v7399_v24, %v6586_v11  ;;  %4360 = vmatpush.bf16.msra.mxu0 %v6331_v29 }
 0x6e3   :  { %v7463_v27 = vld [vmem:[#allocation2 + $0xf2c] sm:$0xf0] }
 0x6e4   :  { %v6042_v30 = vld [vmem:[#allocation2 + $0x8d0] sm:$0xf]  ;;  %v6843_v42 = vor.u32 %v7463_v27, %v6842_v26  ;;  %4373 = vmatpush.bf16.msra.mxu3 %v6587_v25  ;;  %v4120_v26 = vadd.f32 %v4119_v6, %v4107_v17  ;;  %v4134_v27 = vpop.f32.mrf.mxu1  ;;  %v7219_v6 = vld [vmem:[#allocation2 + $0x794] sm:$0xf] }
 0x6e5   :  { %v7263_v32 = vld [vmem:[#allocation2 + $0x8ec] sm:$0xf0]  ;;  %v7147_v17 = vld [vmem:[#allocation2 + $0x554] sm:$0xf] }
 0x6e6   :  { %v6298_v36 = vld [vmem:[#allocation2 + $0xad0] sm:$0xf]  ;;  %v6043_v52 = vor.u32 %v7263_v32, %v6042_v30  ;;  %4386 = vmatpush.bf16.msra.mxu1 %v6843_v42  ;;  %v7035_v32 = vld [vmem:[#allocation2 + $0x1d4] sm:$0xf]  ;;  %v4158_v49 = vpop.f32.mrf.mxu0 }
 0x6e7   :  { %v7327_v38 = vld [vmem:[#allocation2 + $0xaec] sm:$0xf0]  ;;  %v7163_v42 = vld [vmem:[#allocation2 + $0x5d4] sm:$0xf] }
 0x6e8   :  { %v6554_v39 = vld [vmem:[#allocation2 + $0xcd0] sm:$0xf]  ;;  %v6299_v53 = vor.u32 %v7327_v38, %v6298_v36  ;;  %4348 = vmatpush.bf16.msrb.mxu2 %v6043_v52  ;;  %v5148_v36 = vld [vmem:[#allocation2 + $0x1f0] sm:$0xf0] }
 0x6e9   :  { %v7391_v41 = vld [vmem:[#allocation2 + $0xcec] sm:$0xf0]  ;;  %v7099_v38 = vld [vmem:[#allocation2 + $0x3d4] sm:$0xf] }
 0x6ea   :  { %v6810_v43 = vld [vmem:[#allocation2 + $0xed0] sm:$0xf]  ;;  %v6555_v59 = vor.u32 %v7391_v41, %v6554_v39  ;;  %4361 = vmatpush.bf16.msra.mxu0 %v6299_v53  ;;  %v7903_v39 = vadd.f32 %v4132_v58, %v4120_v26  ;;  %v5404_v41 = vld [vmem:[#allocation2 + $0x3f0] sm:$0xf0]  ;;  %v5663_v58 = vor.u32 %v7163_v42, %v5660_v40 }
 0x6eb   :  { %v7455_v46 = vld [vmem:[#allocation2 + $0xeec] sm:$0xf0]  ;;  %v5052_v26 = vld [vmem:[#allocation2 + $0x130] sm:$0xf0] }
 0x6ec   :  { %v6010_v51 = vld [vmem:[#allocation2 + $0x890] sm:$0xf]  ;;  %v6811_v62 = vor.u32 %v7455_v46, %v6810_v43  ;;  %4374 = vmatpush.bf16.msra.mxu3 %v6555_v59  ;;  %v4095_v43 = vpop.f32.mrf.mxu2  ;;  %v7075_v27 = vld [vmem:[#allocation2 + $0x314] sm:$0xf] }
 0x6ed   :  { %v7255_v60 = vld [vmem:[#allocation2 + $0x8ac] sm:$0xf0]  ;;  %v7003_v42 = vld [vmem:[#allocation2 + $0xd4] sm:$0xf] }
 0x6ee   :  { %v6266_v14 = vld [vmem:[#allocation2 + $0xa90] sm:$0xf]  ;;  %v6011_v4 = vor.u32 %v7255_v60, %v6010_v51  ;;  %4387 = vmatpush.bf16.msra.mxu1 %v6811_v62  ;;  %v5151_v60 = vor.u32 %v7035_v32, %v5148_v36  ;;  %v5116_v62 = vld [vmem:[#allocation2 + $0x1b0] sm:$0xf0] }
 0x6ef   :  { %v7319_v48 = vld [vmem:[#allocation2 + $0xaac] sm:$0xf0]  ;;  %v7203_v32 = vld [vmem:[#allocation2 + $0x714] sm:$0xf] }
 0x6f0   :  { %v6522_v13 = vld [vmem:[#allocation2 + $0xc90] sm:$0xf]  ;;  %v6267_v21 = vor.u32 %v7319_v48, %v6266_v14  ;;  %4349 = vmatpush.bf16.msrb.mxu2 %v6011_v4  ;;  %v7227_v14 = vld [vmem:[#allocation2 + $0x7d4] sm:$0xf] }
 0x6f1   :  { %v7383_v15 = vld [vmem:[#allocation2 + $0xcac] sm:$0xf0]  ;;  %v5916_v48 = vld [vmem:[#allocation2 + $0x7f0] sm:$0xf0] }
 0x6f2   :  { %v6778_v35 = vld [vmem:[#allocation2 + $0xe90] sm:$0xf]  ;;  %v6523_v7 = vor.u32 %v7383_v15, %v6522_v13  ;;  %4362 = vmatpush.bf16.msra.mxu0 %v6267_v21  ;;  %v5407_v13 = vor.u32 %v7099_v38, %v5404_v41  ;;  %v7027_v15 = vld [vmem:[#allocation2 + $0x194] sm:$0xf] }
 0x6f3   :  { %v7447_v54 = vld [vmem:[#allocation2 + $0xeac] sm:$0xf0]  ;;  %v7155_v4 = vld [vmem:[#allocation2 + $0x594] sm:$0xf]  ;;  %v5119_v12 = vor.u32 %v7027_v15, %v5116_v62 }
 0x6f4   :  { %v5978_v5 = vld [vmem:[#allocation2 + $0x850] sm:$0xf]  ;;  %v6779_v37 = vor.u32 %v7447_v54, %v6778_v35  ;;  %4375 = vmatpush.bf16.msra.mxu3 %v6523_v7  ;;  %v7091_v35 = vld [vmem:[#allocation2 + $0x394] sm:$0xf] }
 0x6f5   :  { %v7247_v8 = vld [vmem:[#allocation2 + $0x86c] sm:$0xf0]  ;;  %v5628_v21 = vld [vmem:[#allocation2 + $0x5b0] sm:$0xf0] }
 0x6f6   :  { %v6234_v9 = vld [vmem:[#allocation2 + $0xa50] sm:$0xf]  ;;  %v5979_v23 = vor.u32 %v7247_v8, %v5978_v5  ;;  %4388 = vmatpush.bf16.msra.mxu1 %v6779_v37  ;;  %v5919_v5 = vor.u32 %v7227_v14, %v5916_v48  ;;  %v5884_v7 = vld [vmem:[#allocation2 + $0x7b0] sm:$0xf0]  ;;  %v5375_v8 = vor.u32 %v7091_v35, %v5372_v2  ;;  %v4184_v35 = vpop.f32.mrf.mxu1 }
 0x6f7   :  { %v7311_v0 = vld [vmem:[#allocation2 + $0xa6c] sm:$0xf0]  ;;  %v5340_v37 = vld [vmem:[#allocation2 + $0x370] sm:$0xf0] }
 0x6f8   :  { %v6490_v3 = vld [vmem:[#allocation2 + $0xc50] sm:$0xf]  ;;  %v6235_v1 = vor.u32 %v7311_v0, %v6234_v9  ;;  %4350 = vmatpush.bf16.msrb.mxu2 %v5979_v23  ;;  %v5631_v9 = vor.u32 %v7155_v4, %v5628_v21  ;;  %v7019_v0 = vld [vmem:[#allocation2 + $0x154] sm:$0xf]  ;;  %v4145_v21 = vpop.f32.mrf.mxu2 }
 0x6f9   :  { %v7375_v34 = vld [vmem:[#allocation2 + $0xc6c] sm:$0xf0]  ;;  %v7211_v23 = vld [vmem:[#allocation2 + $0x754] sm:$0xf] }
 0x6fa   :  { %v6746_v19 = vld [vmem:[#allocation2 + $0xe50] sm:$0xf]  ;;  %v6491_v28 = vor.u32 %v7375_v34, %v6490_v3  ;;  %4363 = vmatpush.bf16.msra.mxu0 %v6235_v1  ;;  %v5084_v3 = vld [vmem:[#allocation2 + $0x170] sm:$0xf0] }
 0x6fb   :  { %v7439_v20 = vld [vmem:[#allocation2 + $0xe6c] sm:$0xf0]  ;;  %v7083_v34 = vld [vmem:[#allocation2 + $0x354] sm:$0xf] }
 0x6fc   :  { %v5946_v11 = vld [vmem:[#allocation2 + $0x810] sm:$0xf]  ;;  %v6747_v25 = vor.u32 %v7439_v20, %v6746_v19  ;;  %4376 = vmatpush.bf16.msra.mxu3 %v6491_v28  ;;  %v5887_v19 = vor.u32 %v7219_v6, %v5884_v7  ;;  %v5087_v20 = vor.u32 %v7019_v0, %v5084_v3  ;;  %v5852_v1 = vld [vmem:[#allocation2 + $0x770] sm:$0xf0]  ;;  %v4146_v6 = vadd.f32 %v4145_v21, %v7903_v39 }
 0x6fd   :  { %v7239_v24 = vld [vmem:[#allocation2 + $0x82c] sm:$0xf0]  ;;  %v5308_v28 = vld [vmem:[#allocation2 + $0x330] sm:$0xf0] }
 0x6fe   :  { %v6202_v16 = vld [vmem:[#allocation2 + $0xa10] sm:$0xf]  ;;  %v5947_v46 = vor.u32 %v7239_v24, %v5946_v11  ;;  %4389 = vmatpush.bf16.msra.mxu1 %v6747_v25  ;;  %v5343_v11 = vor.u32 %v7083_v34, %v5340_v37  ;;  %v5599_v24 = vor.u32 %v7147_v17, %v5596_v18  ;;  %v5820_v36 = vld [vmem:[#allocation2 + $0x730] sm:$0xf0]  ;;  %v5311_v38 = vor.u32 %v7075_v27, %v5308_v28 }
 0x6ff   :  { %v7303_v29 = vld [vmem:[#allocation2 + $0xa2c] sm:$0xf0]  ;;  %v5020_v40 = vld [vmem:[#allocation2 + $0xf0] sm:$0xf0] }
 0x700   :  { %v6458_v30 = vld [vmem:[#allocation2 + $0xc10] sm:$0xf]  ;;  %v6203_v52 = vor.u32 %v7303_v29, %v6202_v16  ;;  %4351 = vmatpush.bf16.msrb.mxu2 %v5947_v46  ;;  %v7011_v16 = vld [vmem:[#allocation2 + $0x114] sm:$0xf] }
 0x701   :  { %v7367_v31 = vld [vmem:[#allocation2 + $0xc2c] sm:$0xf0]  ;;  %v7139_v29 = vld [vmem:[#allocation2 + $0x514] sm:$0xf]  ;;  %v5055_v25 = vor.u32 %v7011_v16, %v5052_v26  ;;  %v4160_v26 = vpop.f32.mrf.mxu0 }
 0x702   :  { %v6714_v53 = vld [vmem:[#allocation2 + $0xe10] sm:$0xf]  ;;  %v6459_v59 = vor.u32 %v7367_v31, %v6458_v30  ;;  %4364 = vmatpush.bf16.msra.mxu0 %v6203_v52  ;;  %v5564_v30 = vld [vmem:[#allocation2 + $0x530] sm:$0xf0]  ;;  %v5855_v31 = vor.u32 %v7211_v23, %v5852_v1 }
 0x703   :  { %v7431_v51 = vld [vmem:[#allocation2 + $0xe2c] sm:$0xf0]  ;;  %4352 = vmatmul.bf16.vlgmr.msrb.gmra.mxu2 %v7838_v56  ;;  %v5567_v41 = vor.u32 %v7139_v29, %v5564_v30  ;;  %v7067_v43 = vld [vmem:[#allocation2 + $0x2d4] sm:$0xf] }
 0x704   :  { %v6715_v54 = vor.u32 %v7431_v51, %v6714_v53  ;;  %4377 = vmatpush.bf16.msra.mxu3 %v6459_v59  ;;  %4396 = vmatpush.bf16.msra.mxu2 %v5151_v60  ;;  %v5276_v46 = vld [vmem:[#allocation2 + $0x2f0] sm:$0xf0]  ;;  %v5823_v51 = vor.u32 %v7203_v32, %v5820_v36  ;;  %v5023_v59 = vor.u32 %v7003_v42, %v5020_v40  ;;  %v4186_v42 = vpop.f32.mrf.mxu1 }
 0x705   :  { %4365 = vmatmul.bf16.vlgmr.msra.gmra.mxu0 %v7848_v10  ;;  %v7131_v52 = vld [vmem:[#allocation2 + $0x4d4] sm:$0xf]  ;;  %v5279_v48 = vor.u32 %v7067_v43, %v5276_v46 }
 0x706   :  { %4409 = vmatpush.bf16.msrb.mxu0 %v5407_v13  ;;  %4390 = vmatpush.bf16.msra.mxu1 %v6715_v54  ;;  %v5532_v53 = vld [vmem:[#allocation2 + $0x4f0] sm:$0xf0] }
 0x707   :  { %4378 = vmatmul.bf16.vlgmr.msra.gmra.mxu3 %v7843_v57  ;;  %v7195_v60 = vld [vmem:[#allocation2 + $0x6d4] sm:$0xf]  ;;  %v5535_v13 = vor.u32 %v7131_v52, %v5532_v53 }
 0x708   :  { %4422 = vmatpush.bf16.msrb.mxu3 %v5663_v58  ;;  %4397 = vmatpush.bf16.msra.mxu2 %v5119_v12  ;;  %v5788_v14 = vld [vmem:[#allocation2 + $0x6f0] sm:$0xf0]  ;;  %v4718_v12 = vperm.slane %v7772_v22, 2 }
 0x709   :  { %4391 = vmatmul.bf16.vlgmr.msra.gmra.mxu1 %v7854_v63  ;;  %v6995_v58 = vld [vmem:[#allocation2 + $0x94] sm:$0xf] }
 0x70a   :  { %4435 = vmatpush.bf16.msrb.mxu1 %v5919_v5  ;;  %4410 = vmatpush.bf16.msrb.mxu0 %v5375_v8  ;;  %v4988_v15 = vld [vmem:[#allocation2 + $0xb0] sm:$0xf0]  ;;  %v5791_v5 = vor.u32 %v7195_v60, %v5788_v14  ;;  %v4171_v8 = vpop.f32.mrf.mxu3  ;;  %v4147_v60 = vpop.f32.mrf.mxu2 }
 0x70b   :  { %v7059_v62 = vld [vmem:[#allocation2 + $0x294] sm:$0xf]  ;;  %v4991_v7 = vor.u32 %v6995_v58, %v4988_v15 }
 0x70c   :  { %4423 = vmatpush.bf16.msrb.mxu3 %v5631_v9  ;;  %4398 = vmatpush.bf16.msra.mxu2 %v5087_v20  ;;  %v5244_v54 = vld [vmem:[#allocation2 + $0x2b0] sm:$0xf0] }
 0x70d   :  { %v7123_v2 = vld [vmem:[#allocation2 + $0x494] sm:$0xf]  ;;  %v5247_v3 = vor.u32 %v7059_v62, %v5244_v54 }
 0x70e   :  { %4436 = vmatpush.bf16.msrb.mxu1 %v5887_v19  ;;  %4411 = vmatpush.bf16.msrb.mxu0 %v5343_v11  ;;  %v5500_v4 = vld [vmem:[#allocation2 + $0x4b0] sm:$0xf0]  ;;  %v4159_v19 = vadd.f32 %v4158_v49, %v4146_v6  ;;  %v4734_v11 = vperm.slane %v4718_v12, 2 }
 0x70f   :  { %v7187_v9 = vld [vmem:[#allocation2 + $0x694] sm:$0xf]  ;;  %v5503_v34 = vor.u32 %v7123_v2, %v5500_v4 }
 0x710   :  { %4424 = vmatpush.bf16.msrb.mxu3 %v5599_v24  ;;  %4399 = vmatpush.bf16.msra.mxu2 %v5055_v25  ;;  %v5756_v0 = vld [vmem:[#allocation2 + $0x6b0] sm:$0xf0]  ;;  %v4172_v27 = vadd.f32 %v4171_v8, %v4159_v19 }
 0x711   :  { %v6987_v37 = vld [vmem:[#allocation2 + $0x54] sm:$0xf]  ;;  %v5759_v24 = vor.u32 %v7187_v9, %v5756_v0 }
 0x712   :  { %4437 = vmatpush.bf16.msrb.mxu1 %v5855_v31  ;;  %4412 = vmatpush.bf16.msrb.mxu0 %v5311_v38  ;;  %v4956_v17 = vld [vmem:[#allocation2 + $0x70] sm:$0xf0]  ;;  %v4185_v40 = vadd.f32 %v4184_v35, %v4172_v27  ;;  %v4173_v15 = vpop.f32.mrf.mxu3 }
 0x713   :  { %v7051_v18 = vld [vmem:[#allocation2 + $0x254] sm:$0xf]  ;;  %v4959_v28 = vor.u32 %v6987_v37, %v4956_v17 }
 0x714   :  { %4425 = vmatpush.bf16.msrb.mxu3 %v5567_v41  ;;  %4400 = vmatpush.bf16.msra.mxu2 %v5023_v59  ;;  %v5212_v20 = vld [vmem:[#allocation2 + $0x270] sm:$0xf0]  ;;  %v4710_v14 = vmax.f32 %v4185_v40, 0.0 }
 0x715   :  { %v7115_v23 = vld [vmem:[#allocation2 + $0x454] sm:$0xf]  ;;  %v5215_v25 = vor.u32 %v7051_v18, %v5212_v20 }
 0x716   :  { %4438 = vmatpush.bf16.msrb.mxu1 %v5823_v51  ;;  %4413 = vmatpush.bf16.msrb.mxu0 %v5279_v48  ;;  %v5468_v1 = vld [vmem:[#allocation2 + $0x470] sm:$0xf0]  ;;  %v4742_v4 = vmul.f32 %v4734_v11, %v4710_v14 }
 0x717   :  { %v6979_v16 = vld [vmem:[#allocation2 + $0x14] sm:$0xf]  ;;  %v5471_v32 = vor.u32 %v7115_v23, %v5468_v1 }
 0x718   :  { %4426 = vmatpush.bf16.msrb.mxu3 %v5535_v13  ;;  %v4924_v39 = vld [vmem:[#allocation2 + $0x30] sm:$0xf0]  ;;  %4401 = vmatpush.bf16.msra.mxu2 %v4991_v7 }
 0x719   :  { %v7043_v29 = vld [vmem:[#allocation2 + $0x214] sm:$0xf]  ;;  %v4927_v48 = vor.u32 %v6979_v16, %v4924_v39 }
 0x71a   :  { %4439 = vmatpush.bf16.msrb.mxu1 %v5791_v5  ;;  %v7179_v30 = vld [vmem:[#allocation2 + $0x654] sm:$0xf]  ;;  %4414 = vmatpush.bf16.msrb.mxu0 %v5247_v3  ;;  %v7912_v3 = vadd.f32 %v7896_v61, %v4742_v4 }
 0x71b   :  { %v5724_v31 = vld [vmem:[#allocation2 + $0x670] sm:$0xf0] }
 0x71c   :  { %4427 = vmatpush.bf16.msrb.mxu3 %v5503_v34  ;;  %v5180_v36 = vld [vmem:[#allocation2 + $0x230] sm:$0xf0]  ;;  %v5727_v53 = vor.u32 %v7179_v30, %v5724_v31  ;;  %4402 = vmatpush.bf16.msra.mxu2 %v4959_v28 }
 0x71d   :  { %v7107_v38 = vld [vmem:[#allocation2 + $0x414] sm:$0xf]  ;;  %v5183_v62 = vor.u32 %v7043_v29, %v5180_v36 }
 0x71e   :  { %v5436_v41 = vld [vmem:[#allocation2 + $0x430] sm:$0xf0]  ;;  %4440 = vmatpush.bf16.msrb.mxu1 %v5759_v24  ;;  %4415 = vmatpush.bf16.msrb.mxu0 %v5215_v25 }
 0x71f   :  { %v7291_v43 = vld [vmem:[#allocation2 + $0x9d4] sm:$0xf]  ;;  %v5439_v54 = vor.u32 %v7107_v38, %v5436_v41 }
 0x720   :  { %v6172_v46 = vld [vmem:[#allocation2 + $0x9f0] sm:$0xf0]  ;;  %4428 = vmatpush.bf16.msrb.mxu3 %v5471_v32  ;;  %4403 = vmatpush.bf16.msra.mxu2 %v4927_v48 }
 0x721   :  { %v7355_v52 = vld [vmem:[#allocation2 + $0xbd4] sm:$0xf]  ;;  %v6175_v21 = vor.u32 %v7291_v43, %v6172_v46 }
 0x722   :  { %v6428_v51 = vld [vmem:[#allocation2 + $0xbf0] sm:$0xf0]  ;;  %4441 = vmatpush.bf16.msrb.mxu1 %v5727_v53  ;;  %4416 = vmatpush.bf16.msrb.mxu0 %v5183_v62 }
 0x723   :  { %v7419_v49 = vld [vmem:[#allocation2 + $0xdd4] sm:$0xf]  ;;  %v6431_v5 = vor.u32 %v7355_v52, %v6428_v51  ;;  %4404 = vmatmul.bf16.vlgmr.msra.gmra.mxu2 %v7814_v50 }
 0x724   :  { %v6684_v59 = vld [vmem:[#allocation2 + $0xdf0] sm:$0xf0]  ;;  %4429 = vmatpush.bf16.msrb.mxu3 %v5439_v54  ;;  %4448 = vmatpush.bf16.msrb.mxu2 %v6175_v21  ;;  %v4210_v54 = vpop.f32.mrf.mxu0 }
 0x725   :  { %v7171_v13 = vld [vmem:[#allocation2 + $0x614] sm:$0xf]  ;;  %v6687_v6 = vor.u32 %v7419_v49, %v6684_v59  ;;  %4417 = vmatmul.bf16.vlgmr.msrb.gmra.mxu0 %v7824_v45  ;;  %v1295_v59 = vperm.slane %v7772_v22, 5 }
 0x726   :  { %v5692_v58 = vld [vmem:[#allocation2 + $0x630] sm:$0xf0]  ;;  %4461 = vmatpush.bf16.msra.mxu0 %v6431_v5 }
 0x727   :  { %v7483_v35 = vld [vmem:[#allocation2 + $0xfd4] sm:$0xf]  ;;  %v5695_v7 = vor.u32 %v7171_v13, %v5692_v58  ;;  %4430 = vmatmul.bf16.vlgmr.msrb.gmra.mxu3 %v7819_v55 }
 0x728   :  { %v6940_v2 = vld [vmem:[#allocation2 + $0xff0] sm:$0xf0]  ;;  %4474 = vmatpush.bf16.msra.mxu3 %v6687_v6  ;;  %v4236_v6 = vpop.f32.mrf.mxu1 }
 0x729   :  { %v7283_v12 = vld [vmem:[#allocation2 + $0x994] sm:$0xf]  ;;  %v6943_v17 = vor.u32 %v7483_v35, %v6940_v2  ;;  %4442 = vmatpush.bf16.msrb.mxu1 %v5695_v7 }
 0x72a   :  { %v6140_v8 = vld [vmem:[#allocation2 + $0x9b0] sm:$0xf0] }
 0x72b   :  { %v7347_v9 = vld [vmem:[#allocation2 + $0xb94] sm:$0xf]  ;;  %v6143_v20 = vor.u32 %v7283_v12, %v6140_v8  ;;  %v1311_v12 = vperm.slane %v1295_v59, 1 }
 0x72c   :  { %v6396_v0 = vld [vmem:[#allocation2 + $0xbb0] sm:$0xf0]  ;;  %4443 = vmatmul.bf16.vlgmr.msrb.gmra.mxu1 %v7830_v33 }
 0x72d   :  { %v7411_v34 = vld [vmem:[#allocation2 + $0xd94] sm:$0xf]  ;;  %v6399_v23 = vor.u32 %v7347_v9, %v6396_v0  ;;  %4487 = vmatpush.bf16.msra.mxu1 %v6943_v17  ;;  %4449 = vmatpush.bf16.msrb.mxu2 %v6143_v20  ;;  %v4197_v20 = vpop.f32.mrf.mxu2 }
 0x72e   :  { %v6652_v37 = vld [vmem:[#allocation2 + $0xdb0] sm:$0xf0] }
 0x72f   :  { %v7475_v18 = vld [vmem:[#allocation2 + $0xf94] sm:$0xf]  ;;  %v6655_v11 = vor.u32 %v7411_v34, %v6652_v37  ;;  %4462 = vmatpush.bf16.msra.mxu0 %v6399_v23 }
 0x730   :  { %v6908_v19 = vld [vmem:[#allocation2 + $0xfb0] sm:$0xf0] }
 0x731   :  { %v7275_v1 = vld [vmem:[#allocation2 + $0x954] sm:$0xf]  ;;  %v6911_v27 = vor.u32 %v7475_v18, %v6908_v19  ;;  %4475 = vmatpush.bf16.msra.mxu3 %v6655_v11 }
 0x732   :  { %v6108_v24 = vld [vmem:[#allocation2 + $0x970] sm:$0xf0] }
 0x733   :  { %v7339_v16 = vld [vmem:[#allocation2 + $0xb54] sm:$0xf]  ;;  %v6111_v30 = vor.u32 %v7275_v1, %v6108_v24  ;;  %4488 = vmatpush.bf16.msra.mxu1 %v6911_v27  ;;  %v4198_v24 = vadd.f32 %v4197_v20, %v1311_v12  ;;  %v7096_v20 = vld [vmem:[#allocation2 + $0x3b4] sm:$0xf0] }
 0x734   :  { %v6364_v61 = vld [vmem:[#allocation2 + $0xb70] sm:$0xf0] }
 0x735   :  { %v7403_v39 = vld [vmem:[#allocation2 + $0xd54] sm:$0xf]  ;;  %v6367_v31 = vor.u32 %v7339_v16, %v6364_v61  ;;  %4450 = vmatpush.bf16.msrb.mxu2 %v6111_v30  ;;  %v4223_v16 = vpop.f32.mrf.mxu3 }
 0x736   :  { %v6620_v26 = vld [vmem:[#allocation2 + $0xd70] sm:$0xf0] }
 0x737   :  { %v7467_v28 = vld [vmem:[#allocation2 + $0xf54] sm:$0xf]  ;;  %v6623_v32 = vor.u32 %v7403_v39, %v6620_v26  ;;  %4463 = vmatpush.bf16.msra.mxu0 %v6367_v31  ;;  %v4211_v31 = vadd.f32 %v4210_v54, %v4198_v24  ;;  %v7168_v54 = vld [vmem:[#allocation2 + $0x5f4] sm:$0xf0] }
 0x738   :  { %v6876_v29 = vld [vmem:[#allocation2 + $0xf70] sm:$0xf0] }
 0x739   :  { %v7267_v25 = vld [vmem:[#allocation2 + $0x914] sm:$0xf]  ;;  %v6879_v43 = vor.u32 %v7467_v28, %v6876_v29  ;;  %4476 = vmatpush.bf16.msra.mxu3 %v6623_v32 }
 0x73a   :  { %v6076_v36 = vld [vmem:[#allocation2 + $0x930] sm:$0xf0] }
 0x73b   :  { %v7331_v38 = vld [vmem:[#allocation2 + $0xb14] sm:$0xf]  ;;  %v6079_v53 = vor.u32 %v7267_v25, %v6076_v36  ;;  %4489 = vmatpush.bf16.msra.mxu1 %v6879_v43  ;;  %v4212_v25 = vpop.f32.mrf.mxu0 }
 0x73c   :  { %v6332_v41 = vld [vmem:[#allocation2 + $0xb30] sm:$0xf0]  ;;  %v7152_v25 = vld [vmem:[#allocation2 + $0x574] sm:$0xf0] }
 0x73d   :  { %v7395_v42 = vld [vmem:[#allocation2 + $0xd14] sm:$0xf]  ;;  %v6335_v51 = vor.u32 %v7331_v38, %v6332_v41  ;;  %4451 = vmatpush.bf16.msrb.mxu2 %v6079_v53  ;;  %v4225_v12 = vpop.f32.mrf.mxu3 }
 0x73e   :  { %v6588_v40 = vld [vmem:[#allocation2 + $0xd30] sm:$0xf0] }
 0x73f   :  { %v7459_v46 = vld [vmem:[#allocation2 + $0xf14] sm:$0xf]  ;;  %v6591_v60 = vor.u32 %v7395_v42, %v6588_v40  ;;  %4464 = vmatpush.bf16.msra.mxu0 %v6335_v51 }
 0x740   :  { %v6844_v52 = vld [vmem:[#allocation2 + $0xf30] sm:$0xf0] }
 0x741   :  { %v7259_v49 = vld [vmem:[#allocation2 + $0x8d4] sm:$0xf]  ;;  %v6847_v62 = vor.u32 %v7459_v46, %v6844_v52  ;;  %4477 = vmatpush.bf16.msra.mxu3 %v6591_v60  ;;  %v4224_v46 = vadd.f32 %v4223_v16, %v4211_v31  ;;  %v4238_v52 = vpop.f32.mrf.mxu1  ;;  %v5890_v16 = vld [vmem:[#allocation2 + $0x798] sm:$0xf] }
 0x742   :  { %v6044_v14 = vld [vmem:[#allocation2 + $0x8f0] sm:$0xf0]  ;;  %v5602_v31 = vld [vmem:[#allocation2 + $0x558] sm:$0xf] }
 0x743   :  { %v7323_v48 = vld [vmem:[#allocation2 + $0xad4] sm:$0xf]  ;;  %v6047_v4 = vor.u32 %v7259_v49, %v6044_v14  ;;  %4490 = vmatpush.bf16.msra.mxu1 %v6847_v62  ;;  %v5154_v14 = vld [vmem:[#allocation2 + $0x1d8] sm:$0xf]  ;;  %v4262_v12 = vpop.f32.mrf.mxu0 }
 0x744   :  { %v6300_v13 = vld [vmem:[#allocation2 + $0xaf0] sm:$0xf0]  ;;  %v5666_v62 = vld [vmem:[#allocation2 + $0x5d8] sm:$0xf] }
 0x745   :  { %v7387_v58 = vld [vmem:[#allocation2 + $0xcd4] sm:$0xf]  ;;  %v6303_v21 = vor.u32 %v7323_v48, %v6300_v13  ;;  %4452 = vmatpush.bf16.msrb.mxu2 %v6047_v4  ;;  %v7040_v48 = vld [vmem:[#allocation2 + $0x1f4] sm:$0xf0] }
 0x746   :  { %v6556_v15 = vld [vmem:[#allocation2 + $0xcf0] sm:$0xf0]  ;;  %v5410_v13 = vld [vmem:[#allocation2 + $0x3d8] sm:$0xf] }
 0x747   :  { %v7451_v35 = vld [vmem:[#allocation2 + $0xed4] sm:$0xf]  ;;  %v6559_v7 = vor.u32 %v7387_v58, %v6556_v15  ;;  %4465 = vmatpush.bf16.msra.mxu0 %v6303_v21  ;;  %v7919_v58 = vadd.f32 %v4236_v6, %v4224_v46  ;;  %v7104_v15 = vld [vmem:[#allocation2 + $0x3f4] sm:$0xf0]  ;;  %v5667_v6 = vor.u32 %v7168_v54, %v5666_v62 }
 0x748   :  { %v6812_v2 = vld [vmem:[#allocation2 + $0xef0] sm:$0xf0]  ;;  %v7016_v46 = vld [vmem:[#allocation2 + $0x134] sm:$0xf0] }
 0x749   :  { %v7251_v5 = vld [vmem:[#allocation2 + $0x894] sm:$0xf]  ;;  %v6815_v17 = vor.u32 %v7451_v35, %v6812_v2  ;;  %4478 = vmatpush.bf16.msra.mxu3 %v6559_v7  ;;  %v4199_v35 = vpop.f32.mrf.mxu2  ;;  %v5314_v52 = vld [vmem:[#allocation2 + $0x318] sm:$0xf] }
 0x74a   :  { %v6012_v8 = vld [vmem:[#allocation2 + $0x8b0] sm:$0xf0]  ;;  %v5026_v62 = vld [vmem:[#allocation2 + $0xd8] sm:$0xf] }
 0x74b   :  { %v7315_v9 = vld [vmem:[#allocation2 + $0xa94] sm:$0xf]  ;;  %v6015_v23 = vor.u32 %v7251_v5, %v6012_v8  ;;  %4491 = vmatpush.bf16.msra.mxu1 %v6815_v17  ;;  %v5155_v8 = vor.u32 %v7040_v48, %v5154_v14  ;;  %v7032_v17 = vld [vmem:[#allocation2 + $0x1b4] sm:$0xf0] }
 0x74c   :  { %v6268_v0 = vld [vmem:[#allocation2 + $0xab0] sm:$0xf0]  ;;  %v5826_v14 = vld [vmem:[#allocation2 + $0x718] sm:$0xf] }
 0x74d   :  { %v7379_v34 = vld [vmem:[#allocation2 + $0xc94] sm:$0xf]  ;;  %v6271_v1 = vor.u32 %v7315_v9, %v6268_v0  ;;  %4453 = vmatpush.bf16.msrb.mxu2 %v6015_v23  ;;  %v5922_v9 = vld [vmem:[#allocation2 + $0x7d8] sm:$0xf] }
 0x74e   :  { %v6524_v37 = vld [vmem:[#allocation2 + $0xcb0] sm:$0xf0]  ;;  %v7232_v0 = vld [vmem:[#allocation2 + $0x7f4] sm:$0xf0] }
 0x74f   :  { %v7443_v18 = vld [vmem:[#allocation2 + $0xe94] sm:$0xf]  ;;  %v6527_v61 = vor.u32 %v7379_v34, %v6524_v37  ;;  %4466 = vmatpush.bf16.msra.mxu0 %v6271_v1  ;;  %v5411_v34 = vor.u32 %v7104_v15, %v5410_v13  ;;  %v5122_v37 = vld [vmem:[#allocation2 + $0x198] sm:$0xf] }
 0x750   :  { %v6780_v19 = vld [vmem:[#allocation2 + $0xeb0] sm:$0xf0]  ;;  %v5634_v23 = vld [vmem:[#allocation2 + $0x598] sm:$0xf]  ;;  %v5123_v24 = vor.u32 %v7032_v17, %v5122_v37 }
 0x751   :  { %v7243_v11 = vld [vmem:[#allocation2 + $0x854] sm:$0xf]  ;;  %v6783_v30 = vor.u32 %v7443_v18, %v6780_v19  ;;  %4479 = vmatpush.bf16.msra.mxu3 %v6527_v61  ;;  %v5378_v18 = vld [vmem:[#allocation2 + $0x398] sm:$0xf] }
 0x752   :  { %v5980_v39 = vld [vmem:[#allocation2 + $0x870] sm:$0xf0]  ;;  %v7160_v1 = vld [vmem:[#allocation2 + $0x5b4] sm:$0xf0] }
 0x753   :  { %v7307_v26 = vld [vmem:[#allocation2 + $0xa54] sm:$0xf]  ;;  %v5983_v38 = vor.u32 %v7243_v11, %v5980_v39  ;;  %4492 = vmatpush.bf16.msra.mxu1 %v6783_v30  ;;  %v5923_v11 = vor.u32 %v7232_v0, %v5922_v9  ;;  %v7224_v61 = vld [vmem:[#allocation2 + $0x7b4] sm:$0xf0]  ;;  %v5379_v39 = vor.u32 %v7096_v20, %v5378_v18  ;;  %v4288_v18 = vpop.f32.mrf.mxu1 }
 0x754   :  { %v6236_v27 = vld [vmem:[#allocation2 + $0xa70] sm:$0xf0]  ;;  %v7088_v30 = vld [vmem:[#allocation2 + $0x374] sm:$0xf0] }
 0x755   :  { %v7371_v28 = vld [vmem:[#allocation2 + $0xc54] sm:$0xf]  ;;  %v6239_v41 = vor.u32 %v7307_v26, %v6236_v27  ;;  %4454 = vmatpush.bf16.msrb.mxu2 %v5983_v38  ;;  %v5635_v26 = vor.u32 %v7160_v1, %v5634_v23  ;;  %v5090_v27 = vld [vmem:[#allocation2 + $0x158] sm:$0xf]  ;;  %v4249_v1 = vpop.f32.mrf.mxu2 }
 0x756   :  { %v6492_v29 = vld [vmem:[#allocation2 + $0xc70] sm:$0xf0]  ;;  %v5858_v38 = vld [vmem:[#allocation2 + $0x758] sm:$0xf] }
 0x757   :  { %v7435_v32 = vld [vmem:[#allocation2 + $0xe54] sm:$0xf]  ;;  %v6495_v53 = vor.u32 %v7371_v28, %v6492_v29  ;;  %4467 = vmatpush.bf16.msra.mxu0 %v6239_v41  ;;  %v7024_v28 = vld [vmem:[#allocation2 + $0x174] sm:$0xf0] }
 0x758   :  { %v6748_v36 = vld [vmem:[#allocation2 + $0xe70] sm:$0xf0]  ;;  %v5346_v29 = vld [vmem:[#allocation2 + $0x358] sm:$0xf] }
 0x759   :  { %v7235_v42 = vld [vmem:[#allocation2 + $0x814] sm:$0xf]  ;;  %v6751_v60 = vor.u32 %v7435_v32, %v6748_v36  ;;  %4480 = vmatpush.bf16.msra.mxu3 %v6495_v53  ;;  %v5891_v32 = vor.u32 %v7224_v61, %v5890_v16  ;;  %v5091_v36 = vor.u32 %v7024_v28, %v5090_v27  ;;  %v7216_v41 = vld [vmem:[#allocation2 + $0x774] sm:$0xf0]  ;;  %v4250_v16 = vadd.f32 %v4249_v1, %v7919_v58 }
 0x75a   :  { %v5948_v40 = vld [vmem:[#allocation2 + $0x830] sm:$0xf0]  ;;  %v7080_v53 = vld [vmem:[#allocation2 + $0x334] sm:$0xf0] }
 0x75b   :  { %v7299_v43 = vld [vmem:[#allocation2 + $0xa14] sm:$0xf]  ;;  %v5951_v2 = vor.u32 %v7235_v42, %v5948_v40  ;;  %4493 = vmatpush.bf16.msra.mxu1 %v6751_v60  ;;  %v5347_v42 = vor.u32 %v7088_v30, %v5346_v29  ;;  %v5603_v40 = vor.u32 %v7152_v25, %v5602_v31  ;;  %v7208_v48 = vld [vmem:[#allocation2 + $0x734] sm:$0xf0]  ;;  %v5315_v13 = vor.u32 %v7080_v53, %v5314_v52 }
 0x75c   :  { %v6204_v51 = vld [vmem:[#allocation2 + $0xa30] sm:$0xf0]  ;;  %v7008_v54 = vld [vmem:[#allocation2 + $0xf4] sm:$0xf0] }
 0x75d   :  { %v7363_v49 = vld [vmem:[#allocation2 + $0xc14] sm:$0xf]  ;;  %v6207_v4 = vor.u32 %v7299_v43, %v6204_v51  ;;  %4455 = vmatpush.bf16.msrb.mxu2 %v5951_v2  ;;  %v5058_v43 = vld [vmem:[#allocation2 + $0x118] sm:$0xf] }
 0x75e   :  { %v6460_v59 = vld [vmem:[#allocation2 + $0xc30] sm:$0xf0]  ;;  %v5570_v51 = vld [vmem:[#allocation2 + $0x518] sm:$0xf]  ;;  %v5059_v60 = vor.u32 %v7016_v46, %v5058_v43  ;;  %v4264_v43 = vpop.f32.mrf.mxu0 }
 0x75f   :  { %v7427_v21 = vld [vmem:[#allocation2 + $0xe14] sm:$0xf]  ;;  %v6463_v7 = vor.u32 %v7363_v49, %v6460_v59  ;;  %4468 = vmatpush.bf16.msra.mxu0 %v6207_v4  ;;  %v7144_v49 = vld [vmem:[#allocation2 + $0x534] sm:$0xf0]  ;;  %v5859_v59 = vor.u32 %v7216_v41, %v5858_v38 }
 0x760   :  { %v6716_v5 = vld [vmem:[#allocation2 + $0xe30] sm:$0xf0]  ;;  %4456 = vmatmul.bf16.vlgmr.msrb.gmra.mxu2 %v7838_v56  ;;  %v5571_v15 = vor.u32 %v7144_v49, %v5570_v51  ;;  %v5282_v35 = vld [vmem:[#allocation2 + $0x2d8] sm:$0xf] }
 0x761   :  { %v6719_v19 = vor.u32 %v7427_v21, %v6716_v5  ;;  %4481 = vmatpush.bf16.msra.mxu3 %v6463_v7  ;;  %4500 = vmatpush.bf16.msra.mxu2 %v5155_v8  ;;  %v7072_v2 = vld [vmem:[#allocation2 + $0x2f4] sm:$0xf0]  ;;  %v5827_v5 = vor.u32 %v7208_v48, %v5826_v14  ;;  %v5027_v7 = vor.u32 %v7008_v54, %v5026_v62 }
 0x762   :  { %4469 = vmatmul.bf16.vlgmr.msra.gmra.mxu0 %v7848_v10  ;;  %v5538_v4 = vld [vmem:[#allocation2 + $0x4d8] sm:$0xf]  ;;  %v5283_v0 = vor.u32 %v7072_v2, %v5282_v35 }
 0x763   :  { %4513 = vmatpush.bf16.msrb.mxu0 %v5411_v34  ;;  %4494 = vmatpush.bf16.msra.mxu1 %v6719_v19  ;;  %v7136_v21 = vld [vmem:[#allocation2 + $0x4f4] sm:$0xf0] }
 0x764   :  { %4482 = vmatmul.bf16.vlgmr.msra.gmra.mxu3 %v7843_v57  ;;  %v5794_v8 = vld [vmem:[#allocation2 + $0x6d8] sm:$0xf]  ;;  %v5539_v34 = vor.u32 %v7136_v21, %v5538_v4 }
 0x765   :  { %4526 = vmatpush.bf16.msrb.mxu3 %v5667_v6  ;;  %4501 = vmatpush.bf16.msra.mxu2 %v5123_v24  ;;  %v7200_v9 = vld [vmem:[#allocation2 + $0x6f4] sm:$0xf0]  ;;  %v4719_v24 = vperm.slane %v7772_v22, 6 }
 0x766   :  { %4495 = vmatmul.bf16.vlgmr.msra.gmra.mxu1 %v7854_v63  ;;  %v4994_v6 = vld [vmem:[#allocation2 + $0x98] sm:$0xf] }
 0x767   :  { %4539 = vmatpush.bf16.msrb.mxu1 %v5923_v11  ;;  %4514 = vmatpush.bf16.msrb.mxu0 %v5379_v39  ;;  %v7000_v37 = vld [vmem:[#allocation2 + $0xb4] sm:$0xf0]  ;;  %v5795_v11 = vor.u32 %v7200_v9, %v5794_v8  ;;  %v4275_v39 = vpop.f32.mrf.mxu3  ;;  %v4735_v22 = vperm.slane %v4719_v24, 2 }
 0x768   :  { %v5250_v17 = vld [vmem:[#allocation2 + $0x298] sm:$0xf]  ;;  %v4995_v61 = vor.u32 %v7000_v37, %v4994_v6 }
 0x769   :  { %4527 = vmatpush.bf16.msrb.mxu3 %v5635_v26  ;;  %4502 = vmatpush.bf16.msra.mxu2 %v5091_v36  ;;  %v7064_v19 = vld [vmem:[#allocation2 + $0x2b4] sm:$0xf0] }
 0x76a   :  { %v5506_v20 = vld [vmem:[#allocation2 + $0x498] sm:$0xf]  ;;  %v5251_v28 = vor.u32 %v7064_v19, %v5250_v17 }
 0x76b   :  { %4540 = vmatpush.bf16.msrb.mxu1 %v5891_v32  ;;  %4515 = vmatpush.bf16.msrb.mxu0 %v5347_v42  ;;  %v7128_v23 = vld [vmem:[#allocation2 + $0x4b4] sm:$0xf0]  ;;  %v4263_v32 = vadd.f32 %v4262_v12, %v4250_v16 }
 0x76c   :  { %v5762_v26 = vld [vmem:[#allocation2 + $0x698] sm:$0xf]  ;;  %v5507_v29 = vor.u32 %v7128_v23, %v5506_v20 }
 0x76d   :  { %4528 = vmatpush.bf16.msrb.mxu3 %v5603_v40  ;;  %4503 = vmatpush.bf16.msra.mxu2 %v5059_v60  ;;  %v7192_v27 = vld [vmem:[#allocation2 + $0x6b4] sm:$0xf0]  ;;  %v4276_v46 = vadd.f32 %v4275_v39, %v4263_v32 }
 0x76e   :  { %v4962_v30 = vld [vmem:[#allocation2 + $0x58] sm:$0xf]  ;;  %v5763_v42 = vor.u32 %v7192_v27, %v5762_v26 }
 0x76f   :  { %4541 = vmatpush.bf16.msrb.mxu1 %v5859_v59  ;;  %4516 = vmatpush.bf16.msrb.mxu0 %v5315_v13  ;;  %v6992_v31 = vld [vmem:[#allocation2 + $0x74] sm:$0xf0]  ;;  %v4289_v62 = vadd.f32 %v4288_v18, %v4276_v46  ;;  %v4277_v6 = vpop.f32.mrf.mxu3 }
 0x770   :  { %v5218_v25 = vld [vmem:[#allocation2 + $0x258] sm:$0xf]  ;;  %v4963_v52 = vor.u32 %v6992_v31, %v4962_v30 }
 0x771   :  { %4529 = vmatpush.bf16.msrb.mxu3 %v5571_v15  ;;  %4504 = vmatpush.bf16.msra.mxu2 %v5027_v7  ;;  %v7056_v36 = vld [vmem:[#allocation2 + $0x274] sm:$0xf0]  ;;  %v4290_v15 = vpop.f32.mrf.mxu1  ;;  %v4251_v7 = vpop.f32.mrf.mxu2  ;;  %v4711_v8 = vmax.f32 %v4289_v62, 0.0 }
 0x772   :  { %v5474_v38 = vld [vmem:[#allocation2 + $0x458] sm:$0xf]  ;;  %v5219_v59 = vor.u32 %v7056_v36, %v5218_v25 }
 0x773   :  { %4542 = vmatpush.bf16.msrb.mxu1 %v5827_v5  ;;  %4517 = vmatpush.bf16.msrb.mxu0 %v5283_v0  ;;  %v7120_v41 = vld [vmem:[#allocation2 + $0x474] sm:$0xf0]  ;;  %v4743_v20 = vmul.f32 %v4735_v22, %v4711_v8 }
 0x774   :  { %v4930_v40 = vld [vmem:[#allocation2 + $0x18] sm:$0xf]  ;;  %v5475_v60 = vor.u32 %v7120_v41, %v5474_v38 }
 0x775   :  { %4530 = vmatpush.bf16.msrb.mxu3 %v5539_v34  ;;  %v6984_v58 = vld [vmem:[#allocation2 + $0x34] sm:$0xf0]  ;;  %4505 = vmatpush.bf16.msra.mxu2 %v4995_v61  ;;  %v7928_v27 = vadd.f32 %v7912_v3, %v4743_v20 }
 0x776   :  { %v5186_v53 = vld [vmem:[#allocation2 + $0x218] sm:$0xf]  ;;  %v4931_v9 = vor.u32 %v6984_v58, %v4930_v40 }
 0x777   :  { %4543 = vmatpush.bf16.msrb.mxu1 %v5795_v11  ;;  %v5730_v51 = vld [vmem:[#allocation2 + $0x658] sm:$0xf]  ;;  %4518 = vmatpush.bf16.msrb.mxu0 %v5251_v28 }
 0x778   :  { %v7184_v49 = vld [vmem:[#allocation2 + $0x674] sm:$0xf0] }
 0x779   :  { %4531 = vmatpush.bf16.msrb.mxu3 %v5507_v29  ;;  %v7048_v14 = vld [vmem:[#allocation2 + $0x234] sm:$0xf0]  ;;  %v5731_v4 = vor.u32 %v7184_v49, %v5730_v51  ;;  %4506 = vmatpush.bf16.msra.mxu2 %v4963_v52 }
 0x77a   :  { %v5442_v48 = vld [vmem:[#allocation2 + $0x418] sm:$0xf]  ;;  %v5187_v37 = vor.u32 %v7048_v14, %v5186_v53 }
 0x77b   :  { %v7112_v13 = vld [vmem:[#allocation2 + $0x434] sm:$0xf0]  ;;  %4544 = vmatpush.bf16.msrb.mxu1 %v5763_v42  ;;  %4519 = vmatpush.bf16.msrb.mxu0 %v5219_v59 }
 0x77c   :  { %v6178_v54 = vld [vmem:[#allocation2 + $0x9d8] sm:$0xf]  ;;  %v5443_v17 = vor.u32 %v7112_v13, %v5442_v48 }
 0x77d   :  { %v7296_v35 = vld [vmem:[#allocation2 + $0x9f4] sm:$0xf0]  ;;  %4532 = vmatpush.bf16.msrb.mxu3 %v5475_v60  ;;  %4507 = vmatpush.bf16.msra.mxu2 %v4931_v9 }
 0x77e   :  { %v6434_v2 = vld [vmem:[#allocation2 + $0xbd8] sm:$0xf]  ;;  %v6179_v23 = vor.u32 %v7296_v35, %v6178_v54 }
 0x77f   :  { %v7360_v21 = vld [vmem:[#allocation2 + $0xbf4] sm:$0xf0]  ;;  %4545 = vmatpush.bf16.msrb.mxu1 %v5731_v4  ;;  %4520 = vmatpush.bf16.msrb.mxu0 %v5187_v37  ;;  %v4314_v37 = vpop.f32.mrf.mxu0 }
 0x780   :  { %v6690_v5 = vld [vmem:[#allocation2 + $0xdd8] sm:$0xf]  ;;  %v6435_v1 = vor.u32 %v7360_v21, %v6434_v2  ;;  %4508 = vmatmul.bf16.vlgmr.msra.gmra.mxu2 %v7814_v50 }
 0x781   :  { %v7424_v12 = vld [vmem:[#allocation2 + $0xdf4] sm:$0xf0]  ;;  %4533 = vmatpush.bf16.msrb.mxu3 %v5443_v17  ;;  %4552 = vmatpush.bf16.msrb.mxu2 %v6179_v23 }
 0x782   :  { %v5698_v0 = vld [vmem:[#allocation2 + $0x618] sm:$0xf]  ;;  %v6691_v24 = vor.u32 %v7424_v12, %v6690_v5  ;;  %4521 = vmatmul.bf16.vlgmr.msrb.gmra.mxu0 %v7824_v45  ;;  %v1296_v5 = vperm.slane %v7784_v44, 1 }
 0x783   :  { %v7176_v34 = vld [vmem:[#allocation2 + $0x634] sm:$0xf0]  ;;  %4565 = vmatpush.bf16.msra.mxu0 %v6435_v1 }
 0x784   :  { %v6946_v18 = vld [vmem:[#allocation2 + $0xfd8] sm:$0xf]  ;;  %v5699_v16 = vor.u32 %v7176_v34, %v5698_v0  ;;  %4534 = vmatmul.bf16.vlgmr.msrb.gmra.mxu3 %v7819_v55  ;;  %v1312_v1 = vperm.slane %v1296_v5, 1 }
 0x785   :  { %v7488_v19 = vld [vmem:[#allocation2 + $0xff4] sm:$0xf0]  ;;  %4578 = vmatpush.bf16.msra.mxu3 %v6691_v24 }
 0x786   :  { %v6146_v11 = vld [vmem:[#allocation2 + $0x998] sm:$0xf]  ;;  %v6947_v30 = vor.u32 %v7488_v19, %v6946_v18  ;;  %4546 = vmatpush.bf16.msrb.mxu1 %v5699_v16 }
 0x787   :  { %v7288_v61 = vld [vmem:[#allocation2 + $0x9b4] sm:$0xf0] }
 0x788   :  { %v6402_v39 = vld [vmem:[#allocation2 + $0xb98] sm:$0xf]  ;;  %v6147_v32 = vor.u32 %v7288_v61, %v6146_v11  ;;  %v4340_v11 = vpop.f32.mrf.mxu1 }
 0x789   :  { %v7352_v26 = vld [vmem:[#allocation2 + $0xbb4] sm:$0xf0]  ;;  %4547 = vmatmul.bf16.vlgmr.msrb.gmra.mxu1 %v7830_v33 }
 0x78a   :  { %v6658_v28 = vld [vmem:[#allocation2 + $0xd98] sm:$0xf]  ;;  %v6403_v36 = vor.u32 %v7352_v26, %v6402_v39  ;;  %4591 = vmatpush.bf16.msra.mxu1 %v6947_v30  ;;  %4553 = vmatpush.bf16.msrb.mxu2 %v6147_v32 }
 0x78b   :  { %v7416_v29 = vld [vmem:[#allocation2 + $0xdb4] sm:$0xf0] }
 0x78c   :  { %v6914_v31 = vld [vmem:[#allocation2 + $0xf98] sm:$0xf]  ;;  %v6659_v41 = vor.u32 %v7416_v29, %v6658_v28  ;;  %4566 = vmatpush.bf16.msra.mxu0 %v6403_v36 }
 0x78d   :  { %v7480_v25 = vld [vmem:[#allocation2 + $0xfb4] sm:$0xf0] }
 0x78e   :  { %v6114_v38 = vld [vmem:[#allocation2 + $0x958] sm:$0xf]  ;;  %v6915_v43 = vor.u32 %v7480_v25, %v6914_v31  ;;  %4579 = vmatpush.bf16.msra.mxu3 %v6659_v41  ;;  %v4301_v25 = vpop.f32.mrf.mxu2 }
 0x78f   :  { %v7280_v22 = vld [vmem:[#allocation2 + $0x974] sm:$0xf0]  ;;  %v4302_v41 = vadd.f32 %v4301_v25, %v1312_v1  ;;  %v7156_v25 = vld [vmem:[#allocation2 + $0x59c] sm:$0xf] }
 0x790   :  { %v6370_v42 = vld [vmem:[#allocation2 + $0xb58] sm:$0xf]  ;;  %v6115_v53 = vor.u32 %v7280_v22, %v6114_v38  ;;  %4592 = vmatpush.bf16.msra.mxu1 %v6915_v43  ;;  %v4327_v22 = vpop.f32.mrf.mxu3 }
 0x791   :  { %v7344_v3 = vld [vmem:[#allocation2 + $0xb74] sm:$0xf0] }
 0x792   :  { %v6626_v40 = vld [vmem:[#allocation2 + $0xd58] sm:$0xf]  ;;  %v6371_v51 = vor.u32 %v7344_v3, %v6370_v42  ;;  %4554 = vmatpush.bf16.msrb.mxu2 %v6115_v53  ;;  %v4315_v53 = vadd.f32 %v4314_v37, %v4302_v41  ;;  %v7220_v41 = vld [vmem:[#allocation2 + $0x79c] sm:$0xf] }
 0x793   :  { %v7408_v58 = vld [vmem:[#allocation2 + $0xd74] sm:$0xf0] }
 0x794   :  { %v6882_v46 = vld [vmem:[#allocation2 + $0xf58] sm:$0xf]  ;;  %v6627_v59 = vor.u32 %v7408_v58, %v6626_v40  ;;  %4567 = vmatpush.bf16.msra.mxu0 %v6371_v51  ;;  %v4316_v51 = vpop.f32.mrf.mxu0 }
 0x795   :  { %v7472_v52 = vld [vmem:[#allocation2 + $0xf74] sm:$0xf0] }
 0x796   :  { %v6082_v49 = vld [vmem:[#allocation2 + $0x918] sm:$0xf]  ;;  %v6883_v62 = vor.u32 %v7472_v52, %v6882_v46  ;;  %4580 = vmatpush.bf16.msra.mxu3 %v6627_v59  ;;  %v4303_v37 = vpop.f32.mrf.mxu2 }
 0x797   :  { %v7272_v60 = vld [vmem:[#allocation2 + $0x934] sm:$0xf0]  ;;  %v5284_v37 = vld [vmem:[#allocation2 + $0x2f8] sm:$0xf0] }
 0x798   :  { %v6338_v14 = vld [vmem:[#allocation2 + $0xb18] sm:$0xf]  ;;  %v6083_v2 = vor.u32 %v7272_v60, %v6082_v49  ;;  %4593 = vmatpush.bf16.msra.mxu1 %v6883_v62  ;;  %v4328_v62 = vadd.f32 %v4327_v22, %v4315_v53  ;;  %v5892_v22 = vld [vmem:[#allocation2 + $0x7b8] sm:$0xf0] }
 0x799   :  { %v7336_v48 = vld [vmem:[#allocation2 + $0xb34] sm:$0xf0]  ;;  %v5604_v53 = vld [vmem:[#allocation2 + $0x578] sm:$0xf0]  ;;  %v5895_v51 = vor.u32 %v7220_v41, %v5892_v22 }
 0x79a   :  { %v6594_v13 = vld [vmem:[#allocation2 + $0xd18] sm:$0xf]  ;;  %v6339_v4 = vor.u32 %v7336_v48, %v6338_v14  ;;  %4555 = vmatpush.bf16.msrb.mxu2 %v6083_v2 }
 0x79b   :  { %v7400_v15 = vld [vmem:[#allocation2 + $0xd34] sm:$0xf0] }
 0x79c   :  { %v6850_v54 = vld [vmem:[#allocation2 + $0xf18] sm:$0xf]  ;;  %v6595_v12 = vor.u32 %v7400_v15, %v6594_v13  ;;  %4568 = vmatpush.bf16.msra.mxu0 %v6339_v4 }
 0x79d   :  { %v7464_v35 = vld [vmem:[#allocation2 + $0xf34] sm:$0xf0] }
 0x79e   :  { %v6050_v21 = vld [vmem:[#allocation2 + $0x8d8] sm:$0xf]  ;;  %v6851_v6 = vor.u32 %v7464_v35, %v6850_v54  ;;  %4581 = vmatpush.bf16.msra.mxu3 %v6595_v12  ;;  %v4342_v54 = vpop.f32.mrf.mxu1  ;;  %v7036_v12 = vld [vmem:[#allocation2 + $0x1dc] sm:$0xf] }
 0x79f   :  { %v7264_v7 = vld [vmem:[#allocation2 + $0x8f4] sm:$0xf0]  ;;  %v5316_v54 = vld [vmem:[#allocation2 + $0x338] sm:$0xf0] }
 0x7a0   :  { %v6306_v8 = vld [vmem:[#allocation2 + $0xad8] sm:$0xf]  ;;  %v6051_v19 = vor.u32 %v7264_v7, %v6050_v21  ;;  %4594 = vmatpush.bf16.msra.mxu1 %v6851_v6  ;;  %v5156_v7 = vld [vmem:[#allocation2 + $0x1f8] sm:$0xf0] }
 0x7a1   :  { %v7328_v9 = vld [vmem:[#allocation2 + $0xaf4] sm:$0xf0]  ;;  %v5668_v6 = vld [vmem:[#allocation2 + $0x5f8] sm:$0xf0] }
 0x7a2   :  { %v6562_v0 = vld [vmem:[#allocation2 + $0xcd8] sm:$0xf]  ;;  %v6307_v20 = vor.u32 %v7328_v9, %v6306_v8  ;;  %4556 = vmatpush.bf16.msrb.mxu2 %v6051_v19  ;;  %v7100_v8 = vld [vmem:[#allocation2 + $0x3dc] sm:$0xf]  ;;  %v7935_v9 = vadd.f32 %v4340_v11, %v4328_v62 }
 0x7a3   :  { %v7392_v34 = vld [vmem:[#allocation2 + $0xcf4] sm:$0xf0]  ;;  %v7076_v62 = vld [vmem:[#allocation2 + $0x31c] sm:$0xf] }
 0x7a4   :  { %v6818_v17 = vld [vmem:[#allocation2 + $0xed8] sm:$0xf]  ;;  %v6563_v24 = vor.u32 %v7392_v34, %v6562_v0  ;;  %4569 = vmatpush.bf16.msra.mxu0 %v6307_v20  ;;  %v5412_v0 = vld [vmem:[#allocation2 + $0x3f8] sm:$0xf0] }
 0x7a5   :  { %v7456_v18 = vld [vmem:[#allocation2 + $0xef4] sm:$0xf0]  ;;  %v7164_v34 = vld [vmem:[#allocation2 + $0x5dc] sm:$0xf] }
 0x7a6   :  { %v6018_v23 = vld [vmem:[#allocation2 + $0x898] sm:$0xf]  ;;  %v6819_v29 = vor.u32 %v7456_v18, %v6818_v17  ;;  %4582 = vmatpush.bf16.msra.mxu3 %v6563_v24  ;;  %v5159_v24 = vor.u32 %v7036_v12, %v5156_v7  ;;  %v5671_v11 = vor.u32 %v7164_v34, %v5668_v6  ;;  %v5828_v12 = vld [vmem:[#allocation2 + $0x738] sm:$0xf0]  ;;  %v5319_v7 = vor.u32 %v7076_v62, %v5316_v54 }
 0x7a7   :  { %v7256_v16 = vld [vmem:[#allocation2 + $0x8b4] sm:$0xf0]  ;;  %v5028_v34 = vld [vmem:[#allocation2 + $0xf8] sm:$0xf0] }
 0x7a8   :  { %v6274_v61 = vld [vmem:[#allocation2 + $0xa98] sm:$0xf]  ;;  %v6019_v32 = vor.u32 %v7256_v16, %v6018_v23  ;;  %4595 = vmatpush.bf16.msra.mxu1 %v6819_v29  ;;  %v4329_v23 = vpop.f32.mrf.mxu3  ;;  %v7228_v16 = vld [vmem:[#allocation2 + $0x7dc] sm:$0xf] }
 0x7a9   :  { %v7320_v39 = vld [vmem:[#allocation2 + $0xab4] sm:$0xf0]  ;;  %v7092_v29 = vld [vmem:[#allocation2 + $0x39c] sm:$0xf] }
 0x7aa   :  { %v6530_v26 = vld [vmem:[#allocation2 + $0xc98] sm:$0xf]  ;;  %v6275_v36 = vor.u32 %v7320_v39, %v6274_v61  ;;  %4557 = vmatpush.bf16.msrb.mxu2 %v6019_v32  ;;  %v5924_v61 = vld [vmem:[#allocation2 + $0x7f8] sm:$0xf0]  ;;  %v5415_v39 = vor.u32 %v7100_v8, %v5412_v0 }
 0x7ab   :  { %v7384_v28 = vld [vmem:[#allocation2 + $0xcb4] sm:$0xf0]  ;;  %v5636_v32 = vld [vmem:[#allocation2 + $0x5b8] sm:$0xf0] }
 0x7ac   :  { %v6786_v30 = vld [vmem:[#allocation2 + $0xe98] sm:$0xf]  ;;  %v6531_v42 = vor.u32 %v7384_v28, %v6530_v26  ;;  %4570 = vmatpush.bf16.msra.mxu0 %v6275_v36  ;;  %v7028_v26 = vld [vmem:[#allocation2 + $0x19c] sm:$0xf]  ;;  %v5927_v36 = vor.u32 %v7228_v16, %v5924_v61 }
 0x7ad   :  { %v7448_v31 = vld [vmem:[#allocation2 + $0xeb4] sm:$0xf0]  ;;  %v5124_v28 = vld [vmem:[#allocation2 + $0x1b8] sm:$0xf0] }
 0x7ae   :  { %v5986_v38 = vld [vmem:[#allocation2 + $0x858] sm:$0xf]  ;;  %v6787_v52 = vor.u32 %v7448_v31, %v6786_v30  ;;  %4583 = vmatpush.bf16.msra.mxu3 %v6531_v42  ;;  %v5380_v31 = vld [vmem:[#allocation2 + $0x3b8] sm:$0xf0] }
 0x7af   :  { %v7248_v3 = vld [vmem:[#allocation2 + $0x874] sm:$0xf0]  ;;  %v5383_v42 = vor.u32 %v7092_v29, %v5380_v31  ;;  %v7004_v0 = vld [vmem:[#allocation2 + $0xdc] sm:$0xf] }
 0x7b0   :  { %v6242_v40 = vld [vmem:[#allocation2 + $0xa58] sm:$0xf]  ;;  %v5987_v60 = vor.u32 %v7248_v3, %v5986_v38  ;;  %4596 = vmatpush.bf16.msra.mxu1 %v6787_v52  ;;  %v5127_v38 = vor.u32 %v7028_v26, %v5124_v28  ;;  %v5639_v3 = vor.u32 %v7156_v25, %v5636_v32  ;;  %v7148_v52 = vld [vmem:[#allocation2 + $0x55c] sm:$0xf]  ;;  %v5031_v23 = vor.u32 %v7004_v0, %v5028_v34  ;;  %v4392_v28 = vpop.f32.mrf.mxu1  ;;  %v4353_v25 = vpop.f32.mrf.mxu2 }
 0x7b1   :  { %v7312_v58 = vld [vmem:[#allocation2 + $0xa74] sm:$0xf0]  ;;  %v7068_v6 = vld [vmem:[#allocation2 + $0x2dc] sm:$0xf]  ;;  %v4379_v22 = vpop.f32.mrf.mxu3 }
 0x7b2   :  { %v6498_v43 = vld [vmem:[#allocation2 + $0xc58] sm:$0xf]  ;;  %v6243_v14 = vor.u32 %v7312_v58, %v6242_v40  ;;  %4558 = vmatpush.bf16.msrb.mxu2 %v5987_v60  ;;  %v7020_v40 = vld [vmem:[#allocation2 + $0x15c] sm:$0xf]  ;;  %v5287_v16 = vor.u32 %v7068_v6, %v5284_v37 }
 0x7b3   :  { %v7376_v46 = vld [vmem:[#allocation2 + $0xc74] sm:$0xf0]  ;;  %v5092_v58 = vld [vmem:[#allocation2 + $0x178] sm:$0xf0] }
 0x7b4   :  { %v6754_v49 = vld [vmem:[#allocation2 + $0xe58] sm:$0xf]  ;;  %v6499_v35 = vor.u32 %v7376_v46, %v6498_v43  ;;  %4571 = vmatpush.bf16.msra.mxu0 %v6243_v14  ;;  %v7084_v43 = vld [vmem:[#allocation2 + $0x35c] sm:$0xf] }
 0x7b5   :  { %v7440_v59 = vld [vmem:[#allocation2 + $0xe74] sm:$0xf0]  ;;  %v5348_v46 = vld [vmem:[#allocation2 + $0x378] sm:$0xf0] }
 0x7b6   :  { %v5954_v48 = vld [vmem:[#allocation2 + $0x818] sm:$0xf]  ;;  %v6755_v5 = vor.u32 %v7440_v59, %v6754_v49  ;;  %4584 = vmatpush.bf16.msra.mxu3 %v6499_v35  ;;  %v5095_v49 = vor.u32 %v7020_v40, %v5092_v58  ;;  %v7212_v59 = vld [vmem:[#allocation2 + $0x75c] sm:$0xf]  ;;  %v5351_v14 = vor.u32 %v7084_v43, %v5348_v46 }
 0x7b7   :  { %v7240_v13 = vld [vmem:[#allocation2 + $0x834] sm:$0xf0]  ;;  %v5860_v60 = vld [vmem:[#allocation2 + $0x778] sm:$0xf0] }
 0x7b8   :  { %v6210_v15 = vld [vmem:[#allocation2 + $0xa18] sm:$0xf]  ;;  %v5955_v17 = vor.u32 %v7240_v13, %v5954_v48  ;;  %4597 = vmatpush.bf16.msra.mxu1 %v6755_v5  ;;  %v5607_v48 = vor.u32 %v7148_v52, %v5604_v53  ;;  %v7012_v13 = vld [vmem:[#allocation2 + $0x11c] sm:$0xf] }
 0x7b9   :  { %v7304_v2 = vld [vmem:[#allocation2 + $0xa34] sm:$0xf0]  ;;  %v7140_v35 = vld [vmem:[#allocation2 + $0x51c] sm:$0xf] }
 0x7ba   :  { %v6466_v4 = vld [vmem:[#allocation2 + $0xc18] sm:$0xf]  ;;  %v6211_v18 = vor.u32 %v7304_v2, %v6210_v15  ;;  %4559 = vmatpush.bf16.msrb.mxu2 %v5955_v17  ;;  %v5060_v15 = vld [vmem:[#allocation2 + $0x138] sm:$0xf0] }
 0x7bb   :  { %v7368_v21 = vld [vmem:[#allocation2 + $0xc34] sm:$0xf0]  ;;  %v5572_v2 = vld [vmem:[#allocation2 + $0x538] sm:$0xf0] }
 0x7bc   :  { %v6722_v19 = vld [vmem:[#allocation2 + $0xe18] sm:$0xf]  ;;  %v6467_v1 = vor.u32 %v7368_v21, %v6466_v4  ;;  %4572 = vmatpush.bf16.msra.mxu0 %v6211_v18  ;;  %v5863_v4 = vor.u32 %v7212_v59, %v5860_v60  ;;  %v5063_v21 = vor.u32 %v7012_v13, %v5060_v15  ;;  %v7204_v5 = vld [vmem:[#allocation2 + $0x71c] sm:$0xf]  ;;  %v5575_v8 = vor.u32 %v7140_v35, %v5572_v2 }
 0x7bd   :  { %v7432_v20 = vld [vmem:[#allocation2 + $0xe34] sm:$0xf0]  ;;  %4560 = vmatmul.bf16.vlgmr.msrb.gmra.mxu2 %v7838_v56  ;;  %v7132_v17 = vld [vmem:[#allocation2 + $0x4dc] sm:$0xf] }
 0x7be   :  { %v6723_v30 = vor.u32 %v7432_v20, %v6722_v19  ;;  %4585 = vmatpush.bf16.msra.mxu3 %v6467_v1  ;;  %4604 = vmatpush.bf16.msra.mxu2 %v5159_v24  ;;  %v5540_v18 = vld [vmem:[#allocation2 + $0x4f8] sm:$0xf0]  ;;  %v5831_v19 = vor.u32 %v7204_v5, %v5828_v12  ;;  %v4366_v20 = vpop.f32.mrf.mxu0 }
 0x7bf   :  { %4573 = vmatmul.bf16.vlgmr.msra.gmra.mxu0 %v7848_v10  ;;  %v7196_v1 = vld [vmem:[#allocation2 + $0x6dc] sm:$0xf]  ;;  %v5543_v61 = vor.u32 %v7132_v17, %v5540_v18 }
 0x7c0   :  { %4617 = vmatpush.bf16.msrb.mxu0 %v5415_v39  ;;  %4598 = vmatpush.bf16.msra.mxu1 %v6723_v30  ;;  %v5796_v24 = vld [vmem:[#allocation2 + $0x6f8] sm:$0xf0] }
 0x7c1   :  { %4586 = vmatmul.bf16.vlgmr.msra.gmra.mxu3 %v7843_v57  ;;  %v6996_v39 = vld [vmem:[#allocation2 + $0x9c] sm:$0xf]  ;;  %v5799_v32 = vor.u32 %v7196_v1, %v5796_v24 }
 0x7c2   :  { %4630 = vmatpush.bf16.msrb.mxu3 %v5671_v11  ;;  %4605 = vmatpush.bf16.msra.mxu2 %v5127_v38  ;;  %v4996_v11 = vld [vmem:[#allocation2 + $0xb8] sm:$0xf0]  ;;  %v4354_v38 = vadd.f32 %v4353_v25, %v7935_v9 }
 0x7c3   :  { %4599 = vmatmul.bf16.vlgmr.msra.gmra.mxu1 %v7854_v63  ;;  %v7060_v26 = vld [vmem:[#allocation2 + $0x29c] sm:$0xf]  ;;  %v4999_v41 = vor.u32 %v6996_v39, %v4996_v11  ;;  %v4381_v39 = vpop.f32.mrf.mxu3 }
 0x7c4   :  { %4643 = vmatpush.bf16.msrb.mxu1 %v5927_v36  ;;  %4618 = vmatpush.bf16.msrb.mxu0 %v5383_v42  ;;  %v5252_v29 = vld [vmem:[#allocation2 + $0x2b8] sm:$0xf0]  ;;  %v4720_v36 = vperm.slane %v7784_v44, 2  ;;  %v4367_v53 = vadd.f32 %v4366_v20, %v4354_v38 }
 0x7c5   :  { %v7124_v30 = vld [vmem:[#allocation2 + $0x49c] sm:$0xf]  ;;  %v5255_v40 = vor.u32 %v7060_v26, %v5252_v29 }
 0x7c6   :  { %4631 = vmatpush.bf16.msrb.mxu3 %v5639_v3  ;;  %4606 = vmatpush.bf16.msra.mxu2 %v5095_v49  ;;  %v5508_v31 = vld [vmem:[#allocation2 + $0x4b8] sm:$0xf0]  ;;  %v4736_v60 = vperm.slane %v4720_v36, 2  ;;  %v4368_v13 = vpop.f32.mrf.mxu0  ;;  %v4380_v15 = vadd.f32 %v4379_v22, %v4367_v53 }
 0x7c7   :  { %v7188_v42 = vld [vmem:[#allocation2 + $0x69c] sm:$0xf]  ;;  %v5511_v58 = vor.u32 %v7124_v30, %v5508_v31 }
 0x7c8   :  { %4644 = vmatpush.bf16.msrb.mxu1 %v5895_v51  ;;  %4619 = vmatpush.bf16.msrb.mxu0 %v5351_v14  ;;  %v5764_v3 = vld [vmem:[#allocation2 + $0x6b8] sm:$0xf0]  ;;  %v4393_v0 = vadd.f32 %v4392_v28, %v4380_v15 }
 0x7c9   :  { %v6988_v43 = vld [vmem:[#allocation2 + $0x5c] sm:$0xf]  ;;  %v5767_v14 = vor.u32 %v7188_v42, %v5764_v3 }
 0x7ca   :  { %4632 = vmatpush.bf16.msrb.mxu3 %v5607_v48  ;;  %4607 = vmatpush.bf16.msra.mxu2 %v5063_v21  ;;  %v4964_v46 = vld [vmem:[#allocation2 + $0x78] sm:$0xf0]  ;;  %v4712_v1 = vmax.f32 %v4393_v0, 0.0 }
 0x7cb   :  { %v7052_v52 = vld [vmem:[#allocation2 + $0x25c] sm:$0xf]  ;;  %v4967_v62 = vor.u32 %v6988_v43, %v4964_v46 }
 0x7cc   :  { %4645 = vmatpush.bf16.msrb.mxu1 %v5863_v4  ;;  %4620 = vmatpush.bf16.msrb.mxu0 %v5319_v7  ;;  %v5220_v51 = vld [vmem:[#allocation2 + $0x278] sm:$0xf0]  ;;  %v4744_v30 = vmul.f32 %v4736_v60, %v4712_v1 }
 0x7cd   :  { %v7116_v49 = vld [vmem:[#allocation2 + $0x45c] sm:$0xf]  ;;  %v5223_v4 = vor.u32 %v7052_v52, %v5220_v51 }
 0x7ce   :  { %4633 = vmatpush.bf16.msrb.mxu3 %v5575_v8  ;;  %4608 = vmatpush.bf16.msra.mxu2 %v5031_v23  ;;  %v5476_v59 = vld [vmem:[#allocation2 + $0x478] sm:$0xf0]  ;;  %v4394_v8 = vpop.f32.mrf.mxu1  ;;  %v4355_v23 = vpop.f32.mrf.mxu2  ;;  %v7944_v3 = vadd.f32 %v7928_v27, %v4744_v30 }
 0x7cf   :  { %v6980_v48 = vld [vmem:[#allocation2 + $0x1c] sm:$0xf]  ;;  %v5479_v21 = vor.u32 %v7116_v49, %v5476_v59 }
 0x7d0   :  { %4646 = vmatpush.bf16.msrb.mxu1 %v5831_v19  ;;  %4621 = vmatpush.bf16.msrb.mxu0 %v5287_v16  ;;  %v4932_v9 = vld [vmem:[#allocation2 + $0x38] sm:$0xf0] }
 0x7d1   :  { %v7044_v54 = vld [vmem:[#allocation2 + $0x21c] sm:$0xf]  ;;  %v4935_v24 = vor.u32 %v6980_v48, %v4932_v9 }
 0x7d2   :  { %4634 = vmatpush.bf16.msrb.mxu3 %v5543_v61  ;;  %4609 = vmatpush.bf16.msra.mxu2 %v4999_v41  ;;  %v7180_v35 = vld [vmem:[#allocation2 + $0x65c] sm:$0xf] }
 0x7d3   :  { %v5732_v2 = vld [vmem:[#allocation2 + $0x678] sm:$0xf0] }
 0x7d4   :  { %4647 = vmatpush.bf16.msrb.mxu1 %v5799_v32  ;;  %4622 = vmatpush.bf16.msrb.mxu0 %v5255_v40  ;;  %v5188_v5 = vld [vmem:[#allocation2 + $0x238] sm:$0xf0]  ;;  %v5735_v17 = vor.u32 %v7180_v35, %v5732_v2 }
 0x7d5   :  { %v7108_v12 = vld [vmem:[#allocation2 + $0x41c] sm:$0xf]  ;;  %v5191_v11 = vor.u32 %v7044_v54, %v5188_v5 }
 0x7d6   :  { %4635 = vmatpush.bf16.msrb.mxu3 %v5511_v58  ;;  %v5444_v7 = vld [vmem:[#allocation2 + $0x438] sm:$0xf0]  ;;  %4610 = vmatpush.bf16.msra.mxu2 %v4967_v62 }
 0x7d7   :  { %v7292_v34 = vld [vmem:[#allocation2 + $0x9dc] sm:$0xf]  ;;  %v5447_v26 = vor.u32 %v7108_v12, %v5444_v7 }
 0x7d8   :  { %v6180_v6 = vld [vmem:[#allocation2 + $0x9f8] sm:$0xf0]  ;;  %4648 = vmatpush.bf16.msrb.mxu1 %v5767_v14  ;;  %4623 = vmatpush.bf16.msrb.mxu0 %v5223_v4 }
 0x7d9   :  { %v7356_v37 = vld [vmem:[#allocation2 + $0xbdc] sm:$0xf]  ;;  %v6183_v31 = vor.u32 %v7292_v34, %v6180_v6 }
 0x7da   :  { %v6436_v18 = vld [vmem:[#allocation2 + $0xbf8] sm:$0xf0]  ;;  %4636 = vmatpush.bf16.msrb.mxu3 %v5479_v21  ;;  %4611 = vmatpush.bf16.msra.mxu2 %v4935_v24  ;;  %v4418_v24 = vpop.f32.mrf.mxu0 }
 0x7db   :  { %v7420_v19 = vld [vmem:[#allocation2 + $0xddc] sm:$0xf]  ;;  %v6439_v25 = vor.u32 %v7356_v37, %v6436_v18  ;;  %v1297_v37 = vperm.slane %v7784_v44, 5 }
 0x7dc   :  { %v6692_v20 = vld [vmem:[#allocation2 + $0xdf8] sm:$0xf0]  ;;  %4649 = vmatpush.bf16.msrb.mxu1 %v5735_v17  ;;  %4624 = vmatpush.bf16.msrb.mxu0 %v5191_v11 }
 0x7dd   :  { %v7172_v16 = vld [vmem:[#allocation2 + $0x61c] sm:$0xf]  ;;  %v6695_v36 = vor.u32 %v7420_v19, %v6692_v20  ;;  %4612 = vmatmul.bf16.vlgmr.msra.gmra.mxu2 %v7814_v50 }
 0x7de   :  { %v5700_v61 = vld [vmem:[#allocation2 + $0x638] sm:$0xf0]  ;;  %4637 = vmatpush.bf16.msrb.mxu3 %v5447_v26  ;;  %4656 = vmatpush.bf16.msrb.mxu2 %v6183_v31 }
 0x7df   :  { %v7484_v28 = vld [vmem:[#allocation2 + $0xfdc] sm:$0xf]  ;;  %v5703_v38 = vor.u32 %v7172_v16, %v5700_v61  ;;  %4625 = vmatmul.bf16.vlgmr.msrb.gmra.mxu0 %v7824_v45 }
 0x7e0   :  { %v6948_v29 = vld [vmem:[#allocation2 + $0xff8] sm:$0xf0]  ;;  %4669 = vmatpush.bf16.msra.mxu0 %v6439_v25 }
 0x7e1   :  { %v7284_v32 = vld [vmem:[#allocation2 + $0x99c] sm:$0xf]  ;;  %v6951_v43 = vor.u32 %v7484_v28, %v6948_v29  ;;  %4650 = vmatpush.bf16.msrb.mxu1 %v5703_v38  ;;  %4638 = vmatmul.bf16.vlgmr.msrb.gmra.mxu3 %v7819_v55  ;;  %v1313_v28 = vperm.slane %v1297_v37, 1  ;;  %v4444_v29 = vpop.f32.mrf.mxu1 }
 0x7e2   :  { %v6148_v41 = vld [vmem:[#allocation2 + $0x9b8] sm:$0xf0]  ;;  %4682 = vmatpush.bf16.msra.mxu3 %v6695_v36 }
 0x7e3   :  { %v7348_v22 = vld [vmem:[#allocation2 + $0xb9c] sm:$0xf]  ;;  %v6151_v53 = vor.u32 %v7284_v32, %v6148_v41 }
 0x7e4   :  { %v6404_v42 = vld [vmem:[#allocation2 + $0xbb8] sm:$0xf0]  ;;  %4651 = vmatmul.bf16.vlgmr.msrb.gmra.mxu1 %v7830_v33 }
 0x7e5   :  { %v7412_v40 = vld [vmem:[#allocation2 + $0xd9c] sm:$0xf]  ;;  %v6407_v51 = vor.u32 %v7348_v22, %v6404_v42  ;;  %4695 = vmatpush.bf16.msra.mxu1 %v6951_v43  ;;  %4657 = vmatpush.bf16.msrb.mxu2 %v6151_v53  ;;  %v4431_v53 = vpop.f32.mrf.mxu3 }
 0x7e6   :  { %v6660_v58 = vld [vmem:[#allocation2 + $0xdb8] sm:$0xf0] }
 0x7e7   :  { %v7476_v46 = vld [vmem:[#allocation2 + $0xf9c] sm:$0xf]  ;;  %v6663_v59 = vor.u32 %v7412_v40, %v6660_v58  ;;  %4670 = vmatpush.bf16.msra.mxu0 %v6407_v51  ;;  %v4405_v40 = vpop.f32.mrf.mxu2 }
 0x7e8   :  { %v6916_v52 = vld [vmem:[#allocation2 + $0xfb8] sm:$0xf0] }
 0x7e9   :  { %v7276_v49 = vld [vmem:[#allocation2 + $0x95c] sm:$0xf]  ;;  %v6919_v13 = vor.u32 %v7476_v46, %v6916_v52  ;;  %4683 = vmatpush.bf16.msra.mxu3 %v6663_v59  ;;  %v4406_v52 = vadd.f32 %v4405_v40, %v1313_v28 }
 0x7ea   :  { %v6116_v60 = vld [vmem:[#allocation2 + $0x978] sm:$0xf0] }
 0x7eb   :  { %v7340_v14 = vld [vmem:[#allocation2 + $0xb5c] sm:$0xf]  ;;  %v6119_v54 = vor.u32 %v7276_v49, %v6116_v60  ;;  %4696 = vmatpush.bf16.msra.mxu1 %v6919_v13  ;;  %v4420_v13 = vpop.f32.mrf.mxu0 }
 0x7ec   :  { %v6372_v27 = vld [vmem:[#allocation2 + $0xb78] sm:$0xf0] }
 0x7ed   :  { %v7404_v48 = vld [vmem:[#allocation2 + $0xd5c] sm:$0xf]  ;;  %v6375_v35 = vor.u32 %v7340_v14, %v6372_v27  ;;  %4658 = vmatpush.bf16.msrb.mxu2 %v6119_v54 }
 0x7ee   :  { %v6628_v9 = vld [vmem:[#allocation2 + $0xd78] sm:$0xf0] }
 0x7ef   :  { %v7468_v15 = vld [vmem:[#allocation2 + $0xf5c] sm:$0xf]  ;;  %v6631_v4 = vor.u32 %v7404_v48, %v6628_v9  ;;  %4671 = vmatpush.bf16.msra.mxu0 %v6375_v35  ;;  %v4419_v9 = vadd.f32 %v4418_v24, %v4406_v52  ;;  %v4407_v37 = vpop.f32.mrf.mxu2 }
 0x7f0   :  { %v6884_v62 = vld [vmem:[#allocation2 + $0xf78] sm:$0xf0] }
 0x7f1   :  { %v7268_v2 = vld [vmem:[#allocation2 + $0x91c] sm:$0xf]  ;;  %v6887_v55 = vor.u32 %v7468_v15, %v6884_v62  ;;  %4684 = vmatpush.bf16.msra.mxu3 %v6631_v4  ;;  %v4432_v4 = vadd.f32 %v4431_v53, %v4419_v9 }
 0x7f2   :  { %v6084_v21 = vld [vmem:[#allocation2 + $0x938] sm:$0xf0] }
 0x7f3   :  { %v7332_v5 = vld [vmem:[#allocation2 + $0xb1c] sm:$0xf]  ;;  %v6087_v45 = vor.u32 %v7268_v2, %v6084_v21  ;;  %4697 = vmatpush.bf16.msra.mxu1 %v6887_v55  ;;  %v4446_v21 = vpop.f32.mrf.mxu1 }
 0x7f4   :  { %v6340_v12 = vld [vmem:[#allocation2 + $0xb38] sm:$0xf0] }
 0x7f5   :  { %v7396_v50 = vld [vmem:[#allocation2 + $0xd1c] sm:$0xf]  ;;  %v6343_v34 = vor.u32 %v7332_v5, %v6340_v12  ;;  %4659 = vmatpush.bf16.msrb.mxu2 %v6087_v45  ;;  %v4445_v45 = vadd.f32 %v4444_v29, %v4432_v4 }
 0x7f6   :  { %v6596_v7 = vld [vmem:[#allocation2 + $0xd38] sm:$0xf0] }
 0x7f7   :  { %v7460_v8 = vld [vmem:[#allocation2 + $0xf1c] sm:$0xf]  ;;  %v6599_v17 = vor.u32 %v7396_v50, %v6596_v7  ;;  %4672 = vmatpush.bf16.msra.mxu0 %v6343_v34  ;;  %v4457_v24 = vpop.f32.mrf.mxu2 }
 0x7f8   :  { %v6852_v0 = vld [vmem:[#allocation2 + $0xf38] sm:$0xf0] }
 0x7f9   :  { %v7260_v6 = vld [vmem:[#allocation2 + $0x8dc] sm:$0xf]  ;;  %v6855_v1 = vor.u32 %v7460_v8, %v6852_v0  ;;  %4685 = vmatpush.bf16.msra.mxu3 %v6599_v17 }
 0x7fa   :  { %v6052_v18 = vld [vmem:[#allocation2 + $0x8f8] sm:$0xf0] }
 0x7fb   :  { %v7324_v19 = vld [vmem:[#allocation2 + $0xadc] sm:$0xf]  ;;  %v6055_v39 = vor.u32 %v7260_v6, %v6052_v18  ;;  %4698 = vmatpush.bf16.msra.mxu1 %v6855_v1  ;;  %v4496_v1 = vpop.f32.mrf.mxu1 }
 0x7fc   :  { %v6308_v20 = vld [vmem:[#allocation2 + $0xaf8] sm:$0xf0] }
 0x7fd   :  { %v7388_v33 = vld [vmem:[#allocation2 + $0xcdc] sm:$0xf]  ;;  %v6311_v11 = vor.u32 %v7324_v19, %v6308_v20  ;;  %4660 = vmatpush.bf16.msrb.mxu2 %v6055_v39  ;;  %v4433_v19 = vpop.f32.mrf.mxu3 }
 0x7fe   :  { %v6564_v23 = vld [vmem:[#allocation2 + $0xcf8] sm:$0xf0] }
 0x7ff   :  { %v7452_v16 = vld [vmem:[#allocation2 + $0xedc] sm:$0xf]  ;;  %v6567_v30 = vor.u32 %v7388_v33, %v6564_v23  ;;  %4673 = vmatpush.bf16.msra.mxu0 %v6311_v11  ;;  %v4470_v23 = vpop.f32.mrf.mxu0  ;;  %v4721_v11 = vperm.slane %v7784_v44, 6 }
 0x800   :  { %v6820_v61 = vld [vmem:[#allocation2 + $0xef8] sm:$0xf0] }
 0x801   :  { %v7252_v26 = vld [vmem:[#allocation2 + $0x89c] sm:$0xf]  ;;  %v6823_v41 = vor.u32 %v7452_v16, %v6820_v61  ;;  %4686 = vmatpush.bf16.msra.mxu3 %v6567_v30  ;;  %v4458_v16 = vadd.f32 %v4457_v24, %v4445_v45  ;;  %v1299_v45 = vperm.slane %v7788_v47, 5 }
 0x802   :  { %v6020_v31 = vld [vmem:[#allocation2 + $0x8b8] sm:$0xf0] }
 0x803   :  { %v7316_v25 = vld [vmem:[#allocation2 + $0xa9c] sm:$0xf]  ;;  %v6023_v58 = vor.u32 %v7252_v26, %v6020_v31  ;;  %4699 = vmatpush.bf16.msra.mxu1 %v6823_v41  ;;  %v4471_v39 = vadd.f32 %v4470_v23, %v4458_v16  ;;  %v4498_v29 = vpop.f32.mrf.mxu1  ;;  %v4737_v31 = vperm.slane %v4721_v11, 2  ;;  %v1315_v37 = vperm.slane %v1299_v45, 1 }
 0x804   :  { %v6276_v32 = vld [vmem:[#allocation2 + $0xab8] sm:$0xf0]  ;;  %v4723_v11 = vperm.slane %v7788_v47, 6 }
 0x805   :  { %v7380_v36 = vld [vmem:[#allocation2 + $0xc9c] sm:$0xf]  ;;  %v6279_v43 = vor.u32 %v7316_v25, %v6276_v32  ;;  %4661 = vmatpush.bf16.msrb.mxu2 %v6023_v58  ;;  %v4483_v61 = vpop.f32.mrf.mxu3 }
 0x806   :  { %v6532_v38 = vld [vmem:[#allocation2 + $0xcb8] sm:$0xf0]  ;;  %v4484_v28 = vadd.f32 %v4483_v61, %v4471_v39 }
 0x807   :  { %v7444_v22 = vld [vmem:[#allocation2 + $0xe9c] sm:$0xf]  ;;  %v6535_v51 = vor.u32 %v7380_v36, %v6532_v38  ;;  %4674 = vmatpush.bf16.msra.mxu0 %v6279_v43  ;;  %v4472_v26 = vpop.f32.mrf.mxu0 }
 0x808   :  { %v6788_v42 = vld [vmem:[#allocation2 + $0xeb8] sm:$0xf0]  ;;  %v4497_v30 = vadd.f32 %v4496_v1, %v4484_v28 }
 0x809   :  { %v7244_v46 = vld [vmem:[#allocation2 + $0x85c] sm:$0xf]  ;;  %v6791_v48 = vor.u32 %v7444_v22, %v6788_v42  ;;  %4687 = vmatpush.bf16.msra.mxu3 %v6535_v51 }
 0x80a   :  { %v5988_v49 = vld [vmem:[#allocation2 + $0x878] sm:$0xf0]  ;;  %v4713_v25 = vmax.f32 %v4497_v30, 0.0  ;;  %v4739_v30 = vperm.slane %v4723_v11, 2 }
 0x80b   :  { %v7308_v59 = vld [vmem:[#allocation2 + $0xa5c] sm:$0xf]  ;;  %v5991_v54 = vor.u32 %v7244_v46, %v5988_v49  ;;  %4700 = vmatpush.bf16.msra.mxu1 %v6791_v48  ;;  %v4548_v41 = vpop.f32.mrf.mxu1  ;;  %v4722_v48 = vperm.slane %v7788_v47, 2 }
 0x80c   :  { %v6244_v60 = vld [vmem:[#allocation2 + $0xa78] sm:$0xf0]  ;;  %v4745_v32 = vmul.f32 %v4737_v31, %v4713_v25 }
 0x80d   :  { %v7372_v14 = vld [vmem:[#allocation2 + $0xc5c] sm:$0xf]  ;;  %v6247_v35 = vor.u32 %v7308_v59, %v6244_v60  ;;  %4662 = vmatpush.bf16.msrb.mxu2 %v5991_v54  ;;  %v4738_v54 = vperm.slane %v4722_v48, 2 }
 0x80e   :  { %v6500_v27 = vld [vmem:[#allocation2 + $0xc78] sm:$0xf0] }
 0x80f   :  { %v7436_v15 = vld [vmem:[#allocation2 + $0xe5c] sm:$0xf]  ;;  %v6503_v5 = vor.u32 %v7372_v14, %v6500_v27  ;;  %4675 = vmatpush.bf16.msra.mxu0 %v6247_v35  ;;  %v4522_v36 = vpop.f32.mrf.mxu0 }
 0x810   :  { %v6756_v62 = vld [vmem:[#allocation2 + $0xe78] sm:$0xf0] }
 0x811   :  { %v7236_v2 = vld [vmem:[#allocation2 + $0x81c] sm:$0xf]  ;;  %v6759_v0 = vor.u32 %v7436_v15, %v6756_v62  ;;  %4688 = vmatpush.bf16.msra.mxu3 %v6503_v5 }
 0x812   :  { %v5956_v12 = vld [vmem:[#allocation2 + $0x838] sm:$0xf0] }
 0x813   :  { %v7300_v50 = vld [vmem:[#allocation2 + $0xa1c] sm:$0xf]  ;;  %v5959_v17 = vor.u32 %v7236_v2, %v5956_v12  ;;  %4701 = vmatpush.bf16.msra.mxu1 %v6759_v0  ;;  %v4550_v46 = vpop.f32.mrf.mxu1 }
 0x814   :  { %v6212_v7 = vld [vmem:[#allocation2 + $0xa38] sm:$0xf0] }
 0x815   :  { %v7364_v55 = vld [vmem:[#allocation2 + $0xc1c] sm:$0xf]  ;;  %v6215_v18 = vor.u32 %v7300_v50, %v6212_v7  ;;  %4663 = vmatpush.bf16.msrb.mxu2 %v5959_v17 }
 0x816   :  { %v6468_v8 = vld [vmem:[#allocation2 + $0xc38] sm:$0xf0] }
 0x817   :  { %v7428_v34 = vld [vmem:[#allocation2 + $0xe1c] sm:$0xf]  ;;  %v6471_v20 = vor.u32 %v7364_v55, %v6468_v8  ;;  %4676 = vmatpush.bf16.msra.mxu0 %v6215_v18  ;;  %v4524_v58 = vpop.f32.mrf.mxu0 }
 0x818   :  { %v6724_v6 = vld [vmem:[#allocation2 + $0xe38] sm:$0xf0]  ;;  %4664 = vmatmul.bf16.vlgmr.msrb.gmra.mxu2 %v7838_v56  ;;  %v4459_v56 = vpop.f32.mrf.mxu2 }
 0x819   :  { %v6727_v33 = vor.u32 %v7428_v34, %v6724_v6  ;;  %4689 = vmatpush.bf16.msra.mxu3 %v6471_v20 }
 0x81a   :  { %4677 = vmatmul.bf16.vlgmr.msra.gmra.mxu0 %v7848_v10  ;;  %v4485_v10 = vpop.f32.mrf.mxu3 }
 0x81b   :  { %4702 = vmatpush.bf16.msra.mxu1 %v6727_v33 }
 0x81c   :  { %4690 = vmatmul.bf16.vlgmr.msra.gmra.mxu3 %v7843_v57  ;;  %v4752_v57 = vadd.f32 %v7944_v3, %v4745_v32 }
 0x81e   :  { %4703 = vmatmul.bf16.vlgmr.msra.gmra.mxu1 %v7854_v63  ;;  %v1298_v63 = vperm.slane %v7788_v47, 1 }
 0x820   :  { %v1314_v38 = vperm.slane %v1298_v63, 1  ;;  %v4509_v22 = vpop.f32.mrf.mxu2 }
 0x822   :  { %v4510_v42 = vadd.f32 %v4509_v22, %v1314_v38  ;;  %v4535_v40 = vpop.f32.mrf.mxu3 }
 0x824   :  { %v4523_v44 = vadd.f32 %v4522_v36, %v4510_v42 }
 0x826   :  { %v4536_v43 = vadd.f32 %v4535_v40, %v4523_v44 }
 0x828   :  { %v4549_v52 = vadd.f32 %v4548_v41, %v4536_v43  ;;  %v4511_v53 = vpop.f32.mrf.mxu2 }
 0x82a   :  { %v4537_v51 = vpop.f32.mrf.mxu3 }
 0x83c   :  { %v4574_v49 = vpop.f32.mrf.mxu0 }
 0x840   :  { %v4600_v59 = vpop.f32.mrf.mxu1  ;;  %v4561_v60 = vpop.f32.mrf.mxu2 }
 0x841   :  { %v4562_v14 = vadd.f32 %v4561_v60, %v4549_v52 }
 0x843   :  { %v4575_v27 = vadd.f32 %v4574_v49, %v4562_v14 }
 0x844   :  { %v4587_v3 = vpop.f32.mrf.mxu3  ;;  %v4576_v9 = vpop.f32.mrf.mxu0 }
 0x845   :  { %v4588_v13 = vadd.f32 %v4587_v3, %v4575_v27 }
 0x847   :  { %v4601_v62 = vadd.f32 %v4600_v59, %v4588_v13 }
 0x848   :  { %v4602_v15 = vpop.f32.mrf.mxu1  ;;  %v4563_v35 = vpop.f32.mrf.mxu2 }
 0x849   :  { %v4714_v2 = vmax.f32 %v4601_v62, 0.0 }
 0x84b   :  { %v4746_v21 = vmul.f32 %v4738_v54, %v4714_v2 }
 0x84c   :  { %v4589_v4 = vpop.f32.mrf.mxu3 }
 0x84d   :  { %v4753_v5 = vadd.f32 %v4752_v57, %v4746_v21  ;;  %v4757_v57 = vstv %s7973_s6 }
 0x85c   :  { %v4626_v12 = vpop.f32.mrf.mxu0 }
 0x860   :  { %v4613_v7 = vpop.f32.mrf.mxu2 }
 0x861   :  { %v4652_v50 = vpop.f32.mrf.mxu1  ;;  %v4614_v17 = vadd.f32 %v4613_v7, %v1315_v37 }
 0x863   :  { %v4627_v18 = vadd.f32 %v4626_v12, %v4614_v17 }
 0x864   :  { %v4639_v55 = vpop.f32.mrf.mxu3  ;;  %v4628_v8 = vpop.f32.mrf.mxu0 }
 0x865   :  { %v4640_v20 = vadd.f32 %v4639_v55, %v4627_v18 }
 0x867   :  { %v4653_v23 = vadd.f32 %v4652_v50, %v4640_v20 }
 0x868   :  { %v4615_v34 = vpop.f32.mrf.mxu2 }
 0x869   :  { %v4654_v0 = vpop.f32.mrf.mxu1 }
 0x86c   :  { %v4641_v6 = vpop.f32.mrf.mxu3 }
 0x897   :  { %v4678_v19 = vpop.f32.mrf.mxu0 }
 0x89b   :  { %v4704_v33 = vpop.f32.mrf.mxu1  ;;  %v4665_v1 = vpop.f32.mrf.mxu2 }
 0x89c   :  { %v4666_v24 = vadd.f32 %v4665_v1, %v4653_v23 }
 0x89e   :  { %v4679_v39 = vadd.f32 %v4678_v19, %v4666_v24 }
 0x89f   :  { %v4691_v16 = vpop.f32.mrf.mxu3  ;;  %v4680_v61 = vpop.f32.mrf.mxu0 }
 0x8a0   :  { %v4692_v28 = vadd.f32 %v4691_v16, %v4679_v39 }
 0x8a2   :  { %v4705_v29 = vadd.f32 %v4704_v33, %v4692_v28 }
 0x8a3   :  { %v4706_v26 = vpop.f32.mrf.mxu1  ;;  %v4667_v31 = vpop.f32.mrf.mxu2 }
 0x8a4   :  { %v4715_v56 = vmax.f32 %v4705_v29, 0.0 }
 0x8a6   :  { %v4747_v10 = vmul.f32 %v4739_v30, %v4715_v56 }
 0x8a7   :  { %v4693_v25 = vpop.f32.mrf.mxu3 }
 0x8a8   :  { %v4754_v32 = vadd.f32 %v4753_v5, %v4747_v10 }
 0x8aa   :  { %4755 = vadd.xlane.f32.xlu0 %v4754_v32 }
 0x91d   :  { %v4756_v63 = vpop.xlane.xlu0 %4755 }
 0x91e   :  { %v4758_v36 = vadd.f32 %v4757_v57, %v4756_v63 }
 0x920   :  { %v4759_v38 = vmul.f32 0.5, %v4758_v36 }
 0x922   :  { %7513 = vtanh.f32 %v4759_v38 }
 0x928   :  { %v7514_v41 = vpop.eup %7513 }
 0x929   :  { %v4761_v47 = vmul.f32 0.5, %v7514_v41 }
 0x92b   :  { %v4762_v22 = vadd.f32 0.5, %v4761_v47 }
 0x92d   :  { %4764 = vst.msk [vmem:[%s7974_s7] sm:$0xff] %vm4763_vm2, %v4762_v22 }
 0x92e   :  { %4769 = vsyncpa [#allocation6], 1 }
 0x92f   :  { %4770 = vsyncpa [#allocation8], 1 }
 0x930   :  { %4771 = vsyncmov [#allocation3] }
 0x933   :  { %s4772_s29 = vpop.sfrf %4771 }
 0x934   :  { %p6952_p0 = scmp.ne.s32.totalorder %s4772_s29, 0 }
 0x936   :  { %4776 = shalt.err (%p6952_p0)  }

</bundles_post_ra>
